<compile_context>
chip_gen: v6e
topology: v6e:2x2x1
jax: 0.10.0
libtpu: 0.0.40
codegen_flags: <defaults>
</compile_context>

<pallas_src>
import functools

import jax
import jax.numpy as jnp
from jax.experimental import pallas as pl
from jax.experimental.pallas import tpu as pltpu


# --------------------------------------------------------------------------
# Pallas kernels
# --------------------------------------------------------------------------

def _conv_kernel(*refs, prelu):
    """Single-K-step GEMM epilogue-fused conv: o = act(W @ x + b).
    W:(OC,CK) bf16, x:(CK,tn) bf16, b:(OC,1) f32, alpha: SMEM scalar."""
    if prelu:
        w_ref, x_ref, b_ref, alpha_ref, o_ref = refs
    else:
        w_ref, x_ref, b_ref, o_ref = refs
    r = jnp.dot(w_ref[...], x_ref[...], preferred_element_type=jnp.float32)
    r = r + b_ref[...]
    if prelu:
        a = alpha_ref[0]
        r = jnp.maximum(r, 0.0) + a * jnp.minimum(r, 0.0)
    o_ref[...] = r


def _bmm_kernel(a_ref, b_ref, o_ref):
    """Per-sample single-K-step GEMM (no bias)."""
    o_ref[...] = jnp.dot(a_ref[...], b_ref[...],
                         preferred_element_type=jnp.float32)


def _nla_kernel(e2t_ref, e1_ref, asm_ref, o_ref):
    """Fused NonLocalAttention (per sample):
       s[k,q] = sum_c e2[c,k]*e1[c,q]; softmax over k; out = asm @ p."""
    s = jnp.dot(e2t_ref[...], e1_ref[...], preferred_element_type=jnp.float32)
    s = s - jnp.max(s, axis=0, keepdims=True)
    e = jnp.exp(s)
    p = e / jnp.sum(e, axis=0, keepdims=True)
    o_ref[...] = jnp.dot(asm_ref[...], p, preferred_element_type=jnp.float32)


def _csa_corr_kernel(wt_ref, px_ref, rs_ref, o_ref):
    """Fused CSA correlation + per-patch L2-norm scaling + softmax (per sample):
       s[l,q] = (sum_ck w[ck,l]*px[ck,q]) * rscale[l]; softmax over l."""
    s = jnp.dot(wt_ref[...], px_ref[...], preferred_element_type=jnp.float32)
    s = s * rs_ref[...]
    s = s - jnp.max(s, axis=0, keepdims=True)
    e = jnp.exp(s)
    o_ref[...] = e / jnp.sum(e, axis=0, keepdims=True)


# --------------------------------------------------------------------------
# Pallas wrappers
# --------------------------------------------------------------------------

def _lane_tile(L):
    if L > 512 and L % 128 == 0:
        for c in (512, 256, 128):
            if L % c == 0:
                return c
    return L


def batched_wx(w, patches, bias, alpha=None, act=None):
    """(OC,CK) @ (N,CK,L) -> (N,OC,L) f32 with fused bias (+PReLU) epilogue.
    Single K step; the weight block index is grid-invariant (fetched once)."""
    OC, CK = w.shape
    N, CK2, L = patches.shape
    assert CK == CK2
    tn = _lane_tile(L)
    prelu = (act == 'prelu')
    in_specs = [pl.BlockSpec((OC, CK), lambda n, j: (0, 0)),
                pl.BlockSpec((None, CK, tn), lambda n, j: (n, 0, j)),
                pl.BlockSpec((OC, 1), lambda n, j: (0, 0))]
    args = [w, patches, bias]
    if prelu:
        in_specs.append(pl.BlockSpec(memory_space=pltpu.MemorySpace.SMEM))
        args.append(alpha)
    return pl.pallas_call(
        functools.partial(_conv_kernel, prelu=prelu),
        out_shape=jax.ShapeDtypeStruct((N, OC, L), jnp.float32),
        grid=(N, L // tn),
        in_specs=in_specs,
        out_specs=pl.BlockSpec((None, OC, tn), lambda n, j: (n, 0, j)),
        compiler_params=pltpu.CompilerParams(
            dimension_semantics=("parallel", "parallel")),
    )(*args)


def bmm_f32(a, b):
    """(N,M,K) @ (N,K,L) -> (N,M,L) f32, single K step per batch element."""
    N, M, K = a.shape
    N2, K2, L = b.shape
    assert N == N2 and K == K2
    tn = _lane_tile(L)
    return pl.pallas_call(
        _bmm_kernel,
        out_shape=jax.ShapeDtypeStruct((N, M, L), jnp.float32),
        grid=(N, L // tn),
        in_specs=[pl.BlockSpec((None, M, K), lambda n, j: (n, 0, 0)),
                  pl.BlockSpec((None, K, tn), lambda n, j: (n, 0, j))],
        out_specs=pl.BlockSpec((None, M, tn), lambda n, j: (n, 0, j)),
        compiler_params=pltpu.CompilerParams(
            dimension_semantics=("parallel", "parallel")),
    )(a, b)


# --------------------------------------------------------------------------
# Conv glue (im2col in JAX, GEMM + epilogue in Pallas)
# --------------------------------------------------------------------------

def im2col(xp, kh, kw, stride):
    """xp: already-padded NCHW. Returns (N, C*kh*kw, oh*ow) in torch.nn.Unfold
    order (channel-major, then kh, kw)."""
    N, C, H, W = xp.shape
    oh = (H - kh) // stride + 1
    ow = (W - kw) // stride + 1
    cols = [xp[:, :, i:i + stride * oh:stride, j:j + stride * ow:stride]
            for i in range(kh) for j in range(kw)]
    p = jnp.stack(cols, axis=2)                    # (N, C, kh*kw, oh, ow)
    return p.reshape(N, C * kh * kw, oh * ow)


def same_pad_amounts(H, W, kh, kw, sh, sw):
    out_rows = (H + sh - 1) // sh
    out_cols = (W + sw - 1) // sw
    pad_rows = max(0, (out_rows - 1) * sh + kh - H)
    pad_cols = max(0, (out_cols - 1) * sw + kw - W)
    pt = pad_rows // 2
    pL = pad_cols // 2
    return pt, pad_rows - pt, pL, pad_cols - pL


def extract_image_patches(x, k, s):
    """'same'-padded unfold, like the PyTorch helper."""
    N, C, H, W = x.shape
    pt, pb, pL, pr = same_pad_amounts(H, W, k, k, s, s)
    xp = jnp.pad(x, ((0, 0), (0, 0), (pt, pb), (pL, pr)))
    return im2col(xp, k, k, s)


def bilinear_resize(x, scale):
    """F.interpolate(mode='bilinear', align_corners=False)."""
    N, C, H, W = x.shape
    OH, OW = int(H * scale), int(W * scale)

    def idx_w(in_size, out_size):
        ratio = in_size / out_size
        d = (jnp.arange(out_size, dtype=jnp.float32) + 0.5) * ratio - 0.5
        d = jnp.clip(d, 0.0, in_size - 1)
        lo = jnp.floor(d).astype(jnp.int32)
        hi = jnp.minimum(lo + 1, in_size - 1)
        return lo, hi, d - lo

    lo, hi, fr = idx_w(H, OH)
    x = (x[:, :, lo, :] * (1.0 - fr)[None, None, :, None]
         + x[:, :, hi, :] * fr[None, None, :, None])
    lo, hi, fr = idx_w(W, OW)
    x = x[:, :, :, lo] * (1.0 - fr) + x[:, :, :, hi] * fr
    return x


def conv_nchw(x, p, k, stride=1, padding=0, act=None):
    """PyTorch-semantics Conv2d (+bias, optional fused PReLU), NCHW in/out."""
    N, C, H, W = x.shape
    if k == 1 and stride == 1 and padding == 0:
        patches = x.astype(jnp.bfloat16).reshape(N, C, H * W)
        oh, ow = H, W
    else:
        if isinstance(padding, int):
            padding = (padding,) * 4
        pt, pb, pL, pr = padding
        xp = jnp.pad(x.astype(jnp.bfloat16),
                     ((0, 0), (0, 0), (pt, pb), (pL, pr)))
        oh = (H + pt + pb - k) // stride + 1
        ow = (W + pL + pr - k) // stride + 1
        patches = im2col(xp, k, k, stride)
    out = batched_wx(p['wm'], patches, p['b'], p.get('alpha'), act)
    return out.reshape(N, -1, oh, ow)


def subpixel_deconv(x, p, scale, act=None):
    """ConvTranspose2d(k=3*scale, stride=scale, padding=scale) (+PReLU) as
    scale^2 phase-stacked 3x3 convs (pad=1) + pixel shuffle (no zero-stuffing).
    p['wm'] holds the phase-stacked sub-kernels built in prepare_params."""
    N, _, H, W = x.shape
    out4 = conv_nchw(x, p, 3, stride=1, padding=1, act=act)   # (N, s*s*OC, H, W)
    OC = out4.shape[1] // (scale * scale)
    out = out4.reshape(N, scale, scale, OC, H, W)
    return out.transpose(0, 3, 4, 1, 5, 2).reshape(N, OC, scale * H, scale * W)


# --------------------------------------------------------------------------
# Model blocks
# --------------------------------------------------------------------------

def non_local_attention(x, p):
    e1 = conv_nchw(x, p['match1'], 1, act='prelu')       # (N, C/2, H, W)
    e2 = conv_nchw(x, p['match2'], 1, act='prelu')
    asm = conv_nchw(x, p['assembly'], 1, act='prelu')    # (N, C, H, W)
    N, Cr, H, W = e1.shape
    C = asm.shape[1]
    HW = H * W
    e1 = e1.reshape(N, Cr, HW)
    e2t = jnp.swapaxes(e2.reshape(N, Cr, HW), 1, 2)      # tiny (N,HW,C/2) transpose
    asm = asm.reshape(N, C, HW)
    out = pl.pallas_call(
        _nla_kernel,
        out_shape=jax.ShapeDtypeStruct((N, C, HW), jnp.float32),
        grid=(N,),
        in_specs=[pl.BlockSpec((None, HW, Cr), lambda n: (n, 0, 0)),
                  pl.BlockSpec((None, Cr, HW), lambda n: (n, 0, 0)),
                  pl.BlockSpec((None, C, HW), lambda n: (n, 0, 0))],
        out_specs=pl.BlockSpec((None, C, HW), lambda n: (n, 0, 0)),
        compiler_params=pltpu.CompilerParams(
            dimension_semantics=("parallel",)),
    )(e2t, e1, asm)
    return out.reshape(N, C, H, W)


def cross_scale_attention(x, p, scale):
    ksize, softmax_scale, escape_nan = 3, 10.0, 1e-4
    N, _, H, W = x.shape
    embed_w = conv_nchw(x, p['assembly'], 1, act='prelu')      # (N, C, H, W)
    match_input = conv_nchw(x, p['match1'], 1, act='prelu')    # (N, C/2, H, W)
    C = embed_w.shape[1]
    kernel = scale * ksize

    # matching kernels from the bilinearly downscaled reference (f32 throughout)
    ref = conv_nchw(bilinear_resize(x, 1.0 / scale), p['match2'], 1, act='prelu')
    w = extract_image_patches(ref, ksize, 1)                   # (N, Cr*9, Lr)
    Lr = w.shape[-1]
    norm = jnp.sqrt(jnp.sum(w * w, axis=1, keepdims=True))     # (N, 1, Lr)
    rscale = softmax_scale / jnp.maximum(norm, escape_nan)
    rscale = jnp.swapaxes(rscale, 1, 2)                        # (N, Lr, 1)
    wt = jnp.swapaxes(w, 1, 2)                                 # (N, Lr, Cr*9)

    # fused correlation + norm-scaling + softmax (per sample)
    pt, pb, pL, pr = same_pad_amounts(H, W, ksize, ksize, 1, 1)
    xi = jnp.pad(match_input, ((0, 0), (0, 0), (pt, pb), (pL, pr)))
    px = im2col(xi, ksize, ksize, 1)                           # (N, Cr*9, H*W)
    y = pl.pallas_call(
        _csa_corr_kernel,
        out_shape=jax.ShapeDtypeStruct((N, Lr, H * W), jnp.float32),
        grid=(N,),
        in_specs=[pl.BlockSpec((None, Lr, wt.shape[-1]), lambda n: (n, 0, 0)),
                  pl.BlockSpec((None, px.shape[1], H * W), lambda n: (n, 0, 0)),
                  pl.BlockSpec((None, Lr, 1), lambda n: (n, 0, 0))],
        out_specs=pl.BlockSpec((None, Lr, H * W), lambda n: (n, 0, 0)),
        compiler_params=pltpu.CompilerParams(
            dimension_semantics=("parallel",)),
    )(wt, px, rscale)

    # per-sample ConvTranspose2d(kernel, stride=scale, padding=scale) of y with
    # patches of embed_w as weights, in sub-pixel (scale^2 x 3x3) form.
    raw_w = extract_image_patches(embed_w, kernel, scale)      # (N, C*kernel^2, L)
    L = raw_w.shape[-1]
    assert L == Lr
    wt5 = raw_w.reshape(N, C, kernel, kernel, L)               # [n, c, ki, kj, l]
    wf = jnp.flip(wt5, axis=(2, 3)).transpose(0, 1, 4, 2, 3)   # Wf[n, c, l, a, b]
    subs = [wf[:, :, :, (scale - 1 - ry)::scale, (scale - 1 - rx)::scale]
            for ry in range(scale) for rx in range(scale)]     # (N, C, L, 3, 3)
    # fold the reference's final /6 into the weights (saves one HBM pass)
    wd = (jnp.stack(subs, axis=1) * (1.0 / 6.0)).reshape(
        N, scale * scale * C, L * 9).astype(jnp.bfloat16)

    yp = jnp.pad(y.reshape(N, Lr, H, W).astype(jnp.bfloat16),
                 ((0, 0), (0, 0), (1, 1), (1, 1)))
    py = im2col(yp, 3, 3, 1)                                   # (N, Lr*9, H*W)
    out4 = bmm_f32(wd, py)                                     # (N, s*s*C, H*W)
    out = out4.reshape(N, scale, scale, C, H, W)
    return out.transpose(0, 3, 4, 1, 5, 2).reshape(N, C, scale * H, scale * W)


def resnet_block(x, p):
    # DBPN-style ResnetBlock: conv3x3 -> PReLU -> conv3x3, + residual
    out = conv_nchw(x, p['c1'], 3, stride=1, padding=1, act='prelu')
    out = conv_nchw(out, p['c2'], 3, stride=1, padding=1, act=None)
    return out + x


def multisource_projection(x, p, scale):
    up_factor = {2: 2, 3: 3, 4: 2}[scale]
    down = non_local_attention(x, p['nla'])
    down_map = subpixel_deconv(down, p['upsample'], up_factor, act='prelu')
    up_map = cross_scale_attention(x, p['csa'], up_factor)
    err = resnet_block(up_map - down_map, p['encoder'])
    return down_map + err


# --------------------------------------------------------------------------
# Deterministic parameter init (PyTorch layout) + one-time kernel-ready prep
# --------------------------------------------------------------------------

class KeyGen:
    def __init__(self, key):
        self.key = key

    def __call__(self):
        self.key, sub = jax.random.split(self.key)
        return sub


def init_params(key, in_channel, scale):
    kg = KeyGen(key)
    C = in_channel

    def conv_w(oc, ic, k):
        return jax.random.normal(kg(), (oc, ic, k, k), jnp.float32) / jnp.sqrt(ic * k * k)

    def deconv_w(ic, oc, k):
        return jax.random.normal(kg(), (ic, oc, k, k), jnp.float32) / jnp.sqrt(ic * k * k)

    def convblock(ic, oc, k):
        return {'w': conv_w(oc, ic, k), 'b': jnp.zeros((oc,), jnp.float32),
                'alpha': jnp.asarray(0.25, jnp.float32)}     # nn.PReLU() default

    def attention_p():
        return {'match1': convblock(C, C // 2, 1),
                'match2': convblock(C, C // 2, 1),
                'assembly': convblock(C, C, 1)}

    deconv_k = {2: 6, 3: 9, 4: 6}[scale]
    return {
        'nla': attention_p(),
        'csa': attention_p(),
        'upsample': {'w': deconv_w(C, C, deconv_k),
                     'b': jnp.zeros((C,), jnp.float32),
                     'alpha': jnp.asarray(0.25, jnp.float32)},
        'encoder': {'w1': conv_w(C, C, 3), 'b1': jnp.zeros((C,), jnp.float32),
                    'w2': conv_w(C, C, 3), 'b2': jnp.zeros((C,), jnp.float32),
                    'alpha': jnp.asarray(0.25, jnp.float32)},
    }


def _prep_conv(w, b, alpha=None):
    oc = w.shape[0]
    d = {'wm': w.reshape(oc, -1).astype(jnp.bfloat16),
         'b': b.astype(jnp.float32).reshape(oc, 1)}
    if alpha is not None:
        d['alpha'] = jnp.reshape(jnp.asarray(alpha, jnp.float32), (1,))
    return d


def _prep_subpixel_deconv(w, b, alpha, scale):
    """ConvTranspose2d weight (IC, OC, 3s, 3s), stride=s, padding=s ->
    phase-stacked conv-equivalent (s*s*OC, IC*9) sub-kernels + tiled bias."""
    ic, oc, k, _ = w.shape
    assert k == 3 * scale
    wf = jnp.flip(w, axis=(2, 3)).transpose(1, 0, 2, 3)       # Wf[oc, ic, a, b]
    subs = [wf[:, :, (scale - 1 - ry)::scale, (scale - 1 - rx)::scale]
            for ry in range(scale) for rx in range(scale)]    # each (OC, IC, 3, 3)
    wm = jnp.stack(subs, axis=0).reshape(scale * scale * oc, ic * 9)
    bm = jnp.tile(b, scale * scale).reshape(-1, 1)
    return {'wm': wm.astype(jnp.bfloat16), 'b': bm.astype(jnp.float32),
            'alpha': jnp.reshape(jnp.asarray(alpha, jnp.float32), (1,))}


def prepare_params(params, scale):
    """Hoist all weight reshapes / flips / sub-pixel restacking / casts out of
    the forward pass (one-time)."""
    up_factor = {2: 2, 3: 3, 4: 2}[scale]

    def cb(p):
        return _prep_conv(p['w'], p['b'], p['alpha'])

    def att(p):
        return {k: cb(p[k]) for k in ('match1', 'match2', 'assembly')}

    enc = params['encoder']
    return {
        'nla': att(params['nla']),
        'csa': att(params['csa']),
        'upsample': _prep_subpixel_deconv(params['upsample']['w'],
                                          params['upsample']['b'],
                                          params['upsample']['alpha'], up_factor),
        'encoder': {'c1': _prep_conv(enc['w1'], enc['b1'], enc['alpha']),
                    'c2': _prep_conv(enc['w2'], enc['b2'])},
    }


# --------------------------------------------------------------------------

if __name__ == "__main__":
    IN_CH, H, W, BATCH, MODULE_SCALE = 64, 8, 8, 2, 2
    root = jax.random.PRNGKey(0)
    x = jax.random.normal(root, (BATCH, IN_CH, H, W), jnp.float32)

    params = init_params(jax.random.fold_in(root, 1), IN_CH, MODULE_SCALE)
    prep = prepare_params(params, MODULE_SCALE)      # one-time weight prep

    fwd = jax.jit(functools.partial(multisource_projection, scale=MODULE_SCALE))
    out = fwd(x, prep)
    jax.block_until_ready(out)

    up = {2: 2, 3: 3, 4: 2}[MODULE_SCALE]
    assert out.shape == (BATCH, IN_CH, H * up, W * up), out.shape
    assert bool(jnp.all(jnp.isfinite(out)))
    print("KERNEL_OK")
</pallas_src>

<mosaic_0001>
module attributes {stable_mosaic.version = 11 : i64} {
  func.func @_conv_kernel(%arg0: i32, %arg1: i32, %arg2: memref<32x64xbf16, #tpu.memory_space<vmem>>, %arg3: memref<1x64x16xbf16, #tpu.memory_space<vmem>>, %arg4: memref<32x1xf32, #tpu.memory_space<vmem>>, %arg5: memref<1xf32, #tpu.memory_space<smem>>, %arg6: memref<1x32x16xf32, #tpu.memory_space<vmem>>) attributes {dimension_semantics = [#tpu.dimension_semantics<parallel>, #tpu.dimension_semantics<parallel>], iteration_bounds = array<i64: 2, 1>, scalar_prefetch = 0 : i64, scratch_operands = 0 : i64, tpu.core_type = #tpu.core_type<tc>, window_params = [{pipeline_mode = #tpu.pipeline_mode<synchronous>, transform_indices = @transform_0, window_bounds = array<i64: 32, 64>}, {transform_indices = @transform_1, window_bounds = array<i64: 1, 64, 16>}, {pipeline_mode = #tpu.pipeline_mode<synchronous>, transform_indices = @transform_2, window_bounds = array<i64: 32, 1>}, {transform_indices = @transform_3, window_bounds = array<i64: 1>}, {transform_indices = @transform_4, window_bounds = array<i64: 1, 32, 16>}]} {
    %c0 = arith.constant 0 : index
    %c0_0 = arith.constant 0 : index
    %0 = vector.load %arg2[%c0, %c0_0] : memref<32x64xbf16, #tpu.memory_space<vmem>>, vector<32x64xbf16>
    %c0_1 = arith.constant 0 : index
    %c0_2 = arith.constant 0 : index
    %c0_3 = arith.constant 0 : index
    %1 = vector.load %arg3[%c0_1, %c0_2, %c0_3] : memref<1x64x16xbf16, #tpu.memory_space<vmem>>, vector<1x64x16xbf16>
    %2 = vector.shape_cast %1 : vector<1x64x16xbf16> to vector<64x16xbf16>
    %cst = arith.constant dense<0.000000e+00> : vector<32x16xf32>
    %3 = tpu.matmul %0, %2, %cst {dimension_numbers = #tpu.dot_dimension_numbers<[1], [0], [0], [1], [0, 0, 1, 1], [], []>} : vector<32x64xbf16>, vector<64x16xbf16>, vector<32x16xf32> -> vector<32x16xf32>
    %c0_4 = arith.constant 0 : index
    %c0_5 = arith.constant 0 : index
    %4 = vector.load %arg4[%c0_4, %c0_5] : memref<32x1xf32, #tpu.memory_space<vmem>>, vector<32x1xf32>
    %5 = vector.broadcast %4 : vector<32x1xf32> to vector<32x16xf32>
    %6 = arith.addf %3, %5 : vector<32x16xf32>
    %c0_6 = arith.constant 0 : index
    %7 = memref.load %arg5[%c0_6] : memref<1xf32, #tpu.memory_space<smem>>
    %cst_7 = arith.constant 0.000000e+00 : f32
    %8 = vector.broadcast %cst_7 : f32 to vector<32x16xf32>
    %9 = arith.maximumf %6, %8 : vector<32x16xf32>
    %cst_8 = arith.constant 0.000000e+00 : f32
    %10 = vector.broadcast %cst_8 : f32 to vector<32x16xf32>
    %11 = arith.minimumf %6, %10 : vector<32x16xf32>
    %12 = vector.broadcast %7 : f32 to vector<32x16xf32>
    %13 = arith.mulf %12, %11 : vector<32x16xf32>
    %14 = arith.addf %9, %13 : vector<32x16xf32>
    %c0_9 = arith.constant 0 : index
    %c0_10 = arith.constant 0 : index
    %c0_11 = arith.constant 0 : index
    %15 = vector.load %arg6[%c0_9, %c0_10, %c0_11] : memref<1x32x16xf32, #tpu.memory_space<vmem>>, vector<1x32x16xf32>
    %16 = vector.shape_cast %15 : vector<1x32x16xf32> to vector<32x16xf32>
    %17 = vector.shape_cast %14 : vector<32x16xf32> to vector<1x32x16xf32>
    tpu.vector_store %arg6[%c0_9, %c0_10, %c0_11], %17 {strides = array<i32>} : memref<1x32x16xf32, #tpu.memory_space<vmem>>, vector<1x32x16xf32>,
    return
  }
  func.func @transform_0(%arg0: i32, %arg1: i32) -> (i32, i32) {
    %c0_i32 = arith.constant 0 : i32
    %c0_i32_0 = arith.constant 0 : i32
    %c0_i32_1 = arith.constant 0 : i32
    return %c0_i32, %c0_i32_0 : i32, i32
  }
  func.func @transform_1(%arg0: i32, %arg1: i32) -> (i32, i32, i32) {
    %c0_i32 = arith.constant 0 : i32
    %c0_i32_0 = arith.constant 0 : i32
    return %arg0, %c0_i32, %arg1 : i32, i32, i32
  }
  func.func @transform_2(%arg0: i32, %arg1: i32) -> (i32, i32) {
    %c0_i32 = arith.constant 0 : i32
    %c0_i32_0 = arith.constant 0 : i32
    %c0_i32_1 = arith.constant 0 : i32
    return %c0_i32, %c0_i32_0 : i32, i32
  }
  func.func @transform_3(%arg0: i32, %arg1: i32) -> i32 {
    %c0_i32 = arith.constant 0 : i32
    %c0_i32_0 = arith.constant 0 : i32
    return %c0_i32 : i32
  }
  func.func @transform_4(%arg0: i32, %arg1: i32) -> (i32, i32, i32) {
    %c0_i32 = arith.constant 0 : i32
    %c0_i32_0 = arith.constant 0 : i32
    return %arg0, %c0_i32, %arg1 : i32, i32, i32
  }
}

module attributes {stable_mosaic.version = 11 : i64} {
  func.func @_conv_kernel(%arg0: i32, %arg1: i32, %arg2: memref<32x64xbf16, #tpu.memory_space<vmem>>, %arg3: memref<1x64x64xbf16, #tpu.memory_space<vmem>>, %arg4: memref<32x1xf32, #tpu.memory_space<vmem>>, %arg5: memref<1xf32, #tpu.memory_space<smem>>, %arg6: memref<1x32x64xf32, #tpu.memory_space<vmem>>) attributes {dimension_semantics = [#tpu.dimension_semantics<parallel>, #tpu.dimension_semantics<parallel>], iteration_bounds = array<i64: 2, 1>, scalar_prefetch = 0 : i64, scratch_operands = 0 : i64, tpu.core_type = #tpu.core_type<tc>, window_params = [{pipeline_mode = #tpu.pipeline_mode<synchronous>, transform_indices = @transform_0, window_bounds = array<i64: 32, 64>}, {transform_indices = @transform_1, window_bounds = array<i64: 1, 64, 64>}, {pipeline_mode = #tpu.pipeline_mode<synchronous>, transform_indices = @transform_2, window_bounds = array<i64: 32, 1>}, {transform_indices = @transform_3, window_bounds = array<i64: 1>}, {transform_indices = @transform_4, window_bounds = array<i64: 1, 32, 64>}]} {
    %c0 = arith.constant 0 : index
    %c0_0 = arith.constant 0 : index
    %0 = vector.load %arg2[%c0, %c0_0] : memref<32x64xbf16, #tpu.memory_space<vmem>>, vector<32x64xbf16>
    %c0_1 = arith.constant 0 : index
    %c0_2 = arith.constant 0 : index
    %c0_3 = arith.constant 0 : index
    %1 = vector.load %arg3[%c0_1, %c0_2, %c0_3] : memref<1x64x64xbf16, #tpu.memory_space<vmem>>, vector<1x64x64xbf16>
    %2 = vector.shape_cast %1 : vector<1x64x64xbf16> to vector<64x64xbf16>
    %cst = arith.constant dense<0.000000e+00> : vector<32x64xf32>
    %3 = tpu.matmul %0, %2, %cst {dimension_numbers = #tpu.dot_dimension_numbers<[1], [0], [0], [1], [0, 0, 1, 1], [], []>} : vector<32x64xbf16>, vector<64x64xbf16>, vector<32x64xf32> -> vector<32x64xf32>
    %c0_4 = arith.constant 0 : index
    %c0_5 = arith.constant 0 : index
    %4 = vector.load %arg4[%c0_4, %c0_5] : memref<32x1xf32, #tpu.memory_space<vmem>>, vector<32x1xf32>
    %5 = vector.broadcast %4 : vector<32x1xf32> to vector<32x64xf32>
    %6 = arith.addf %3, %5 : vector<32x64xf32>
    %c0_6 = arith.constant 0 : index
    %7 = memref.load %arg5[%c0_6] : memref<1xf32, #tpu.memory_space<smem>>
    %cst_7 = arith.constant 0.000000e+00 : f32
    %8 = vector.broadcast %cst_7 : f32 to vector<32x64xf32>
    %9 = arith.maximumf %6, %8 : vector<32x64xf32>
    %cst_8 = arith.constant 0.000000e+00 : f32
    %10 = vector.broadcast %cst_8 : f32 to vector<32x64xf32>
    %11 = arith.minimumf %6, %10 : vector<32x64xf32>
    %12 = vector.broadcast %7 : f32 to vector<32x64xf32>
    %13 = arith.mulf %12, %11 : vector<32x64xf32>
    %14 = arith.addf %9, %13 : vector<32x64xf32>
    %c0_9 = arith.constant 0 : index
    %c0_10 = arith.constant 0 : index
    %c0_11 = arith.constant 0 : index
    %15 = vector.load %arg6[%c0_9, %c0_10, %c0_11] : memref<1x32x64xf32, #tpu.memory_space<vmem>>, vector<1x32x64xf32>
    %16 = vector.shape_cast %15 : vector<1x32x64xf32> to vector<32x64xf32>
    %17 = vector.shape_cast %14 : vector<32x64xf32> to vector<1x32x64xf32>
    tpu.vector_store %arg6[%c0_9, %c0_10, %c0_11], %17 {strides = array<i32>} : memref<1x32x64xf32, #tpu.memory_space<vmem>>, vector<1x32x64xf32>,
    return
  }
  func.func @transform_0(%arg0: i32, %arg1: i32) -> (i32, i32) {
    %c0_i32 = arith.constant 0 : i32
    %c0_i32_0 = arith.constant 0 : i32
    %c0_i32_1 = arith.constant 0 : i32
    return %c0_i32, %c0_i32_0 : i32, i32
  }
  func.func @transform_1(%arg0: i32, %arg1: i32) -> (i32, i32, i32) {
    %c0_i32 = arith.constant 0 : i32
    %c0_i32_0 = arith.constant 0 : i32
    return %arg0, %c0_i32, %arg1 : i32, i32, i32
  }
  func.func @transform_2(%arg0: i32, %arg1: i32) -> (i32, i32) {
    %c0_i32 = arith.constant 0 : i32
    %c0_i32_0 = arith.constant 0 : i32
    %c0_i32_1 = arith.constant 0 : i32
    return %c0_i32, %c0_i32_0 : i32, i32
  }
  func.func @transform_3(%arg0: i32, %arg1: i32) -> i32 {
    %c0_i32 = arith.constant 0 : i32
    %c0_i32_0 = arith.constant 0 : i32
    return %c0_i32 : i32
  }
  func.func @transform_4(%arg0: i32, %arg1: i32) -> (i32, i32, i32) {
    %c0_i32 = arith.constant 0 : i32
    %c0_i32_0 = arith.constant 0 : i32
    return %arg0, %c0_i32, %arg1 : i32, i32, i32
  }
}

module attributes {stable_mosaic.version = 11 : i64} {
  func.func @_csa_corr_kernel(%arg0: i32, %arg1: memref<1x16x288xf32, #tpu.memory_space<vmem>>, %arg2: memref<1x288x64xf32, #tpu.memory_space<vmem>>, %arg3: memref<1x16x1xf32, #tpu.memory_space<vmem>>, %arg4: memref<1x16x64xf32, #tpu.memory_space<vmem>>) attributes {dimension_semantics = [#tpu.dimension_semantics<parallel>], iteration_bounds = array<i64: 2>, scalar_prefetch = 0 : i64, scratch_operands = 0 : i64, tpu.core_type = #tpu.core_type<tc>, window_params = [{transform_indices = @transform_0, window_bounds = array<i64: 1, 16, 288>}, {transform_indices = @transform_1, window_bounds = array<i64: 1, 288, 64>}, {transform_indices = @transform_2, window_bounds = array<i64: 1, 16, 1>}, {transform_indices = @transform_3, window_bounds = array<i64: 1, 16, 64>}]} {
    %c0 = arith.constant 0 : index
    %c0_0 = arith.constant 0 : index
    %c0_1 = arith.constant 0 : index
    %0 = vector.load %arg1[%c0, %c0_0, %c0_1] : memref<1x16x288xf32, #tpu.memory_space<vmem>>, vector<1x16x288xf32>
    %1 = vector.shape_cast %0 : vector<1x16x288xf32> to vector<16x288xf32>
    %c0_2 = arith.constant 0 : index
    %c0_3 = arith.constant 0 : index
    %c0_4 = arith.constant 0 : index
    %2 = vector.load %arg2[%c0_2, %c0_3, %c0_4] : memref<1x288x64xf32, #tpu.memory_space<vmem>>, vector<1x288x64xf32>
    %3 = vector.shape_cast %2 : vector<1x288x64xf32> to vector<288x64xf32>
    %cst = arith.constant dense<0.000000e+00> : vector<16x64xf32>
    %4 = tpu.matmul %1, %3, %cst {dimension_numbers = #tpu.dot_dimension_numbers<[1], [0], [0], [1], [0, 0, 1, 1], [], []>} : vector<16x288xf32>, vector<288x64xf32>, vector<16x64xf32> -> vector<16x64xf32>
    %c0_5 = arith.constant 0 : index
    %c0_6 = arith.constant 0 : index
    %c0_7 = arith.constant 0 : index
    %5 = vector.load %arg3[%c0_5, %c0_6, %c0_7] : memref<1x16x1xf32, #tpu.memory_space<vmem>>, vector<1x16x1xf32>
    %6 = vector.shape_cast %5 : vector<1x16x1xf32> to vector<16x1xf32>
    %7 = vector.broadcast %6 : vector<16x1xf32> to vector<16x64xf32>
    %8 = arith.mulf %4, %7 : vector<16x64xf32>
    %cst_8 = arith.constant dense<0xFF800000> : vector<64xf32>
    %9 = vector.multi_reduction <maximumf>, %8, %cst_8 [0] : vector<16x64xf32> to vector<64xf32>
    %10 = vector.shape_cast %9 : vector<64xf32> to vector<1x64xf32>
    %11 = vector.broadcast %10 : vector<1x64xf32> to vector<16x64xf32>
    %12 = arith.subf %8, %11 : vector<16x64xf32>
    %13 = math.exp %12 : vector<16x64xf32>
    %cst_9 = arith.constant dense<0.000000e+00> : vector<64xf32>
    %14 = vector.multi_reduction <add>, %13, %cst_9 [0] : vector<16x64xf32> to vector<64xf32>
    %15 = vector.shape_cast %14 : vector<64xf32> to vector<1x64xf32>
    %16 = vector.broadcast %15 : vector<1x64xf32> to vector<16x64xf32>
    %17 = arith.divf %13, %16 : vector<16x64xf32>
    %c0_10 = arith.constant 0 : index
    %c0_11 = arith.constant 0 : index
    %c0_12 = arith.constant 0 : index
    %18 = vector.load %arg4[%c0_10, %c0_11, %c0_12] : memref<1x16x64xf32, #tpu.memory_space<vmem>>, vector<1x16x64xf32>
    %19 = vector.shape_cast %18 : vector<1x16x64xf32> to vector<16x64xf32>
    %20 = vector.shape_cast %17 : vector<16x64xf32> to vector<1x16x64xf32>
    tpu.vector_store %arg4[%c0_10, %c0_11, %c0_12], %20 {strides = array<i32>} : memref<1x16x64xf32, #tpu.memory_space<vmem>>, vector<1x16x64xf32>,
    return
  }
  func.func @transform_0(%arg0: i32) -> (i32, i32, i32) {
    %c0_i32 = arith.constant 0 : i32
    %c0_i32_0 = arith.constant 0 : i32
    %c0_i32_1 = arith.constant 0 : i32
    return %arg0, %c0_i32, %c0_i32_0 : i32, i32, i32
  }
  func.func @transform_1(%arg0: i32) -> (i32, i32, i32) {
    %c0_i32 = arith.constant 0 : i32
    %c0_i32_0 = arith.constant 0 : i32
    %c0_i32_1 = arith.constant 0 : i32
    return %arg0, %c0_i32, %c0_i32_0 : i32, i32, i32
  }
  func.func @transform_2(%arg0: i32) -> (i32, i32, i32) {
    %c0_i32 = arith.constant 0 : i32
    %c0_i32_0 = arith.constant 0 : i32
    %c0_i32_1 = arith.constant 0 : i32
    return %arg0, %c0_i32, %c0_i32_0 : i32, i32, i32
  }
  func.func @transform_3(%arg0: i32) -> (i32, i32, i32) {
    %c0_i32 = arith.constant 0 : i32
    %c0_i32_0 = arith.constant 0 : i32
    %c0_i32_1 = arith.constant 0 : i32
    return %arg0, %c0_i32, %c0_i32_0 : i32, i32, i32
  }
}

module attributes {stable_mosaic.version = 11 : i64} {
  func.func @_conv_kernel(%arg0: i32, %arg1: i32, %arg2: memref<64x64xbf16, #tpu.memory_space<vmem>>, %arg3: memref<1x64x64xbf16, #tpu.memory_space<vmem>>, %arg4: memref<64x1xf32, #tpu.memory_space<vmem>>, %arg5: memref<1xf32, #tpu.memory_space<smem>>, %arg6: memref<1x64x64xf32, #tpu.memory_space<vmem>>) attributes {dimension_semantics = [#tpu.dimension_semantics<parallel>, #tpu.dimension_semantics<parallel>], iteration_bounds = array<i64: 2, 1>, scalar_prefetch = 0 : i64, scratch_operands = 0 : i64, tpu.core_type = #tpu.core_type<tc>, window_params = [{pipeline_mode = #tpu.pipeline_mode<synchronous>, transform_indices = @transform_0, window_bounds = array<i64: 64, 64>}, {transform_indices = @transform_1, window_bounds = array<i64: 1, 64, 64>}, {pipeline_mode = #tpu.pipeline_mode<synchronous>, transform_indices = @transform_2, window_bounds = array<i64: 64, 1>}, {transform_indices = @transform_3, window_bounds = array<i64: 1>}, {transform_indices = @transform_4, window_bounds = array<i64: 1, 64, 64>}]} {
    %c0 = arith.constant 0 : index
    %c0_0 = arith.constant 0 : index
    %0 = vector.load %arg2[%c0, %c0_0] : memref<64x64xbf16, #tpu.memory_space<vmem>>, vector<64x64xbf16>
    %c0_1 = arith.constant 0 : index
    %c0_2 = arith.constant 0 : index
    %c0_3 = arith.constant 0 : index
    %1 = vector.load %arg3[%c0_1, %c0_2, %c0_3] : memref<1x64x64xbf16, #tpu.memory_space<vmem>>, vector<1x64x64xbf16>
    %2 = vector.shape_cast %1 : vector<1x64x64xbf16> to vector<64x64xbf16>
    %cst = arith.constant dense<0.000000e+00> : vector<64x64xf32>
    %3 = tpu.matmul %0, %2, %cst {dimension_numbers = #tpu.dot_dimension_numbers<[1], [0], [0], [1], [0, 0, 1, 1], [], []>} : vector<64x64xbf16>, vector<64x64xbf16>, vector<64x64xf32> -> vector<64x64xf32>
    %c0_4 = arith.constant 0 : index
    %c0_5 = arith.constant 0 : index
    %4 = vector.load %arg4[%c0_4, %c0_5] : memref<64x1xf32, #tpu.memory_space<vmem>>, vector<64x1xf32>
    %5 = vector.broadcast %4 : vector<64x1xf32> to vector<64x64xf32>
    %6 = arith.addf %3, %5 : vector<64x64xf32>
    %c0_6 = arith.constant 0 : index
    %7 = memref.load %arg5[%c0_6] : memref<1xf32, #tpu.memory_space<smem>>
    %cst_7 = arith.constant 0.000000e+00 : f32
    %8 = vector.broadcast %cst_7 : f32 to vector<64x64xf32>
    %9 = arith.maximumf %6, %8 : vector<64x64xf32>
    %cst_8 = arith.constant 0.000000e+00 : f32
    %10 = vector.broadcast %cst_8 : f32 to vector<64x64xf32>
    %11 = arith.minimumf %6, %10 : vector<64x64xf32>
    %12 = vector.broadcast %7 : f32 to vector<64x64xf32>
    %13 = arith.mulf %12, %11 : vector<64x64xf32>
    %14 = arith.addf %9, %13 : vector<64x64xf32>
    %c0_9 = arith.constant 0 : index
    %c0_10 = arith.constant 0 : index
    %c0_11 = arith.constant 0 : index
    %15 = vector.load %arg6[%c0_9, %c0_10, %c0_11] : memref<1x64x64xf32, #tpu.memory_space<vmem>>, vector<1x64x64xf32>
    %16 = vector.shape_cast %15 : vector<1x64x64xf32> to vector<64x64xf32>
    %17 = vector.shape_cast %14 : vector<64x64xf32> to vector<1x64x64xf32>
    tpu.vector_store %arg6[%c0_9, %c0_10, %c0_11], %17 {strides = array<i32>} : memref<1x64x64xf32, #tpu.memory_space<vmem>>, vector<1x64x64xf32>,
    return
  }
  func.func @transform_0(%arg0: i32, %arg1: i32) -> (i32, i32) {
    %c0_i32 = arith.constant 0 : i32
    %c0_i32_0 = arith.constant 0 : i32
    %c0_i32_1 = arith.constant 0 : i32
    return %c0_i32, %c0_i32_0 : i32, i32
  }
  func.func @transform_1(%arg0: i32, %arg1: i32) -> (i32, i32, i32) {
    %c0_i32 = arith.constant 0 : i32
    %c0_i32_0 = arith.constant 0 : i32
    return %arg0, %c0_i32, %arg1 : i32, i32, i32
  }
  func.func @transform_2(%arg0: i32, %arg1: i32) -> (i32, i32) {
    %c0_i32 = arith.constant 0 : i32
    %c0_i32_0 = arith.constant 0 : i32
    %c0_i32_1 = arith.constant 0 : i32
    return %c0_i32, %c0_i32_0 : i32, i32
  }
  func.func @transform_3(%arg0: i32, %arg1: i32) -> i32 {
    %c0_i32 = arith.constant 0 : i32
    %c0_i32_0 = arith.constant 0 : i32
    return %c0_i32 : i32
  }
  func.func @transform_4(%arg0: i32, %arg1: i32) -> (i32, i32, i32) {
    %c0_i32 = arith.constant 0 : i32
    %c0_i32_0 = arith.constant 0 : i32
    return %arg0, %c0_i32, %arg1 : i32, i32, i32
  }
}

module attributes {stable_mosaic.version = 11 : i64} {
  func.func @_bmm_kernel(%arg0: i32, %arg1: i32, %arg2: memref<1x256x144xbf16, #tpu.memory_space<vmem>>, %arg3: memref<1x144x64xbf16, #tpu.memory_space<vmem>>, %arg4: memref<1x256x64xf32, #tpu.memory_space<vmem>>) attributes {dimension_semantics = [#tpu.dimension_semantics<parallel>, #tpu.dimension_semantics<parallel>], iteration_bounds = array<i64: 2, 1>, scalar_prefetch = 0 : i64, scratch_operands = 0 : i64, tpu.core_type = #tpu.core_type<tc>, window_params = [{transform_indices = @transform_0, window_bounds = array<i64: 1, 256, 144>}, {transform_indices = @transform_1, window_bounds = array<i64: 1, 144, 64>}, {transform_indices = @transform_2, window_bounds = array<i64: 1, 256, 64>}]} {
    %c0 = arith.constant 0 : index
    %c0_0 = arith.constant 0 : index
    %c0_1 = arith.constant 0 : index
    %0 = vector.load %arg2[%c0, %c0_0, %c0_1] : memref<1x256x144xbf16, #tpu.memory_space<vmem>>, vector<1x256x144xbf16>
    %1 = vector.shape_cast %0 : vector<1x256x144xbf16> to vector<256x144xbf16>
    %c0_2 = arith.constant 0 : index
    %c0_3 = arith.constant 0 : index
    %c0_4 = arith.constant 0 : index
    %2 = vector.load %arg3[%c0_2, %c0_3, %c0_4] : memref<1x144x64xbf16, #tpu.memory_space<vmem>>, vector<1x144x64xbf16>
    %3 = vector.shape_cast %2 : vector<1x144x64xbf16> to vector<144x64xbf16>
    %cst = arith.constant dense<0.000000e+00> : vector<256x64xf32>
    %4 = tpu.matmul %1, %3, %cst {dimension_numbers = #tpu.dot_dimension_numbers<[1], [0], [0], [1], [0, 0, 1, 1], [], []>} : vector<256x144xbf16>, vector<144x64xbf16>, vector<256x64xf32> -> vector<256x64xf32>
    %c0_5 = arith.constant 0 : index
    %c0_6 = arith.constant 0 : index
    %c0_7 = arith.constant 0 : index
    %5 = vector.load %arg4[%c0_5, %c0_6, %c0_7] : memref<1x256x64xf32, #tpu.memory_space<vmem>>, vector<1x256x64xf32>
    %6 = vector.shape_cast %5 : vector<1x256x64xf32> to vector<256x64xf32>
    %7 = vector.shape_cast %4 : vector<256x64xf32> to vector<1x256x64xf32>
    tpu.vector_store %arg4[%c0_5, %c0_6, %c0_7], %7 {strides = array<i32>} : memref<1x256x64xf32, #tpu.memory_space<vmem>>, vector<1x256x64xf32>,
    return
  }
  func.func @transform_0(%arg0: i32, %arg1: i32) -> (i32, i32, i32) {
    %c0_i32 = arith.constant 0 : i32
    %c0_i32_0 = arith.constant 0 : i32
    %c0_i32_1 = arith.constant 0 : i32
    return %arg0, %c0_i32, %c0_i32_0 : i32, i32, i32
  }
  func.func @transform_1(%arg0: i32, %arg1: i32) -> (i32, i32, i32) {
    %c0_i32 = arith.constant 0 : i32
    %c0_i32_0 = arith.constant 0 : i32
    return %arg0, %c0_i32, %arg1 : i32, i32, i32
  }
  func.func @transform_2(%arg0: i32, %arg1: i32) -> (i32, i32, i32) {
    %c0_i32 = arith.constant 0 : i32
    %c0_i32_0 = arith.constant 0 : i32
    return %arg0, %c0_i32, %arg1 : i32, i32, i32
  }
}

module attributes {stable_mosaic.version = 11 : i64} {
  func.func @_nla_kernel(%arg0: i32, %arg1: memref<1x64x32xf32, #tpu.memory_space<vmem>>, %arg2: memref<1x32x64xf32, #tpu.memory_space<vmem>>, %arg3: memref<1x64x64xf32, #tpu.memory_space<vmem>>, %arg4: memref<1x64x64xf32, #tpu.memory_space<vmem>>) attributes {dimension_semantics = [#tpu.dimension_semantics<parallel>], iteration_bounds = array<i64: 2>, scalar_prefetch = 0 : i64, scratch_operands = 0 : i64, tpu.core_type = #tpu.core_type<tc>, window_params = [{transform_indices = @transform_0, window_bounds = array<i64: 1, 64, 32>}, {transform_indices = @transform_1, window_bounds = array<i64: 1, 32, 64>}, {transform_indices = @transform_2, window_bounds = array<i64: 1, 64, 64>}, {transform_indices = @transform_3, window_bounds = array<i64: 1, 64, 64>}]} {
    %c0 = arith.constant 0 : index
    %c0_0 = arith.constant 0 : index
    %c0_1 = arith.constant 0 : index
    %0 = vector.load %arg1[%c0, %c0_0, %c0_1] : memref<1x64x32xf32, #tpu.memory_space<vmem>>, vector<1x64x32xf32>
    %1 = vector.shape_cast %0 : vector<1x64x32xf32> to vector<64x32xf32>
    %c0_2 = arith.constant 0 : index
    %c0_3 = arith.constant 0 : index
    %c0_4 = arith.constant 0 : index
    %2 = vector.load %arg2[%c0_2, %c0_3, %c0_4] : memref<1x32x64xf32, #tpu.memory_space<vmem>>, vector<1x32x64xf32>
    %3 = vector.shape_cast %2 : vector<1x32x64xf32> to vector<32x64xf32>
    %cst = arith.constant dense<0.000000e+00> : vector<64x64xf32>
    %4 = tpu.matmul %1, %3, %cst {dimension_numbers = #tpu.dot_dimension_numbers<[1], [0], [0], [1], [0, 0, 1, 1], [], []>} : vector<64x32xf32>, vector<32x64xf32>, vector<64x64xf32> -> vector<64x64xf32>
    %cst_5 = arith.constant dense<0xFF800000> : vector<64xf32>
    %5 = vector.multi_reduction <maximumf>, %4, %cst_5 [0] : vector<64x64xf32> to vector<64xf32>
    %6 = vector.shape_cast %5 : vector<64xf32> to vector<1x64xf32>
    %7 = vector.broadcast %6 : vector<1x64xf32> to vector<64x64xf32>
    %8 = arith.subf %4, %7 : vector<64x64xf32>
    %9 = math.exp %8 : vector<64x64xf32>
    %cst_6 = arith.constant dense<0.000000e+00> : vector<64xf32>
    %10 = vector.multi_reduction <add>, %9, %cst_6 [0] : vector<64x64xf32> to vector<64xf32>
    %11 = vector.shape_cast %10 : vector<64xf32> to vector<1x64xf32>
    %12 = vector.broadcast %11 : vector<1x64xf32> to vector<64x64xf32>
    %13 = arith.divf %9, %12 : vector<64x64xf32>
    %c0_7 = arith.constant 0 : index
    %c0_8 = arith.constant 0 : index
    %c0_9 = arith.constant 0 : index
    %14 = vector.load %arg3[%c0_7, %c0_8, %c0_9] : memref<1x64x64xf32, #tpu.memory_space<vmem>>, vector<1x64x64xf32>
    %15 = vector.shape_cast %14 : vector<1x64x64xf32> to vector<64x64xf32>
    %cst_10 = arith.constant dense<0.000000e+00> : vector<64x64xf32>
    %16 = tpu.matmul %15, %13, %cst_10 {dimension_numbers = #tpu.dot_dimension_numbers<[1], [0], [0], [1], [0, 0, 1, 1], [], []>} : vector<64x64xf32>, vector<64x64xf32>, vector<64x64xf32> -> vector<64x64xf32>
    %c0_11 = arith.constant 0 : index
    %c0_12 = arith.constant 0 : index
    %c0_13 = arith.constant 0 : index
    %17 = vector.load %arg4[%c0_11, %c0_12, %c0_13] : memref<1x64x64xf32, #tpu.memory_space<vmem>>, vector<1x64x64xf32>
    %18 = vector.shape_cast %17 : vector<1x64x64xf32> to vector<64x64xf32>
    %19 = vector.shape_cast %16 : vector<64x64xf32> to vector<1x64x64xf32>
    tpu.vector_store %arg4[%c0_11, %c0_12, %c0_13], %19 {strides = array<i32>} : memref<1x64x64xf32, #tpu.memory_space<vmem>>, vector<1x64x64xf32>,
    return
  }
  func.func @transform_0(%arg0: i32) -> (i32, i32, i32) {
    %c0_i32 = arith.constant 0 : i32
    %c0_i32_0 = arith.constant 0 : i32
    %c0_i32_1 = arith.constant 0 : i32
    return %arg0, %c0_i32, %c0_i32_0 : i32, i32, i32
  }
  func.func @transform_1(%arg0: i32) -> (i32, i32, i32) {
    %c0_i32 = arith.constant 0 : i32
    %c0_i32_0 = arith.constant 0 : i32
    %c0_i32_1 = arith.constant 0 : i32
    return %arg0, %c0_i32, %c0_i32_0 : i32, i32, i32
  }
  func.func @transform_2(%arg0: i32) -> (i32, i32, i32) {
    %c0_i32 = arith.constant 0 : i32
    %c0_i32_0 = arith.constant 0 : i32
    %c0_i32_1 = arith.constant 0 : i32
    return %arg0, %c0_i32, %c0_i32_0 : i32, i32, i32
  }
  func.func @transform_3(%arg0: i32) -> (i32, i32, i32) {
    %c0_i32 = arith.constant 0 : i32
    %c0_i32_0 = arith.constant 0 : i32
    %c0_i32_1 = arith.constant 0 : i32
    return %arg0, %c0_i32, %c0_i32_0 : i32, i32, i32
  }
}

module attributes {stable_mosaic.version = 11 : i64} {
  func.func @_conv_kernel(%arg0: i32, %arg1: i32, %arg2: memref<256x576xbf16, #tpu.memory_space<vmem>>, %arg3: memref<1x576x64xbf16, #tpu.memory_space<vmem>>, %arg4: memref<256x1xf32, #tpu.memory_space<vmem>>, %arg5: memref<1xf32, #tpu.memory_space<smem>>, %arg6: memref<1x256x64xf32, #tpu.memory_space<vmem>>) attributes {dimension_semantics = [#tpu.dimension_semantics<parallel>, #tpu.dimension_semantics<parallel>], iteration_bounds = array<i64: 2, 1>, scalar_prefetch = 0 : i64, scratch_operands = 0 : i64, tpu.core_type = #tpu.core_type<tc>, window_params = [{pipeline_mode = #tpu.pipeline_mode<synchronous>, transform_indices = @transform_0, window_bounds = array<i64: 256, 576>}, {transform_indices = @transform_1, window_bounds = array<i64: 1, 576, 64>}, {pipeline_mode = #tpu.pipeline_mode<synchronous>, transform_indices = @transform_2, window_bounds = array<i64: 256, 1>}, {transform_indices = @transform_3, window_bounds = array<i64: 1>}, {transform_indices = @transform_4, window_bounds = array<i64: 1, 256, 64>}]} {
    %c0 = arith.constant 0 : index
    %c0_0 = arith.constant 0 : index
    %0 = vector.load %arg2[%c0, %c0_0] : memref<256x576xbf16, #tpu.memory_space<vmem>>, vector<256x576xbf16>
    %c0_1 = arith.constant 0 : index
    %c0_2 = arith.constant 0 : index
    %c0_3 = arith.constant 0 : index
    %1 = vector.load %arg3[%c0_1, %c0_2, %c0_3] : memref<1x576x64xbf16, #tpu.memory_space<vmem>>, vector<1x576x64xbf16>
    %2 = vector.shape_cast %1 : vector<1x576x64xbf16> to vector<576x64xbf16>
    %cst = arith.constant dense<0.000000e+00> : vector<256x64xf32>
    %3 = tpu.matmul %0, %2, %cst {dimension_numbers = #tpu.dot_dimension_numbers<[1], [0], [0], [1], [0, 0, 1, 1], [], []>} : vector<256x576xbf16>, vector<576x64xbf16>, vector<256x64xf32> -> vector<256x64xf32>
    %c0_4 = arith.constant 0 : index
    %c0_5 = arith.constant 0 : index
    %4 = vector.load %arg4[%c0_4, %c0_5] : memref<256x1xf32, #tpu.memory_space<vmem>>, vector<256x1xf32>
    %5 = vector.broadcast %4 : vector<256x1xf32> to vector<256x64xf32>
    %6 = arith.addf %3, %5 : vector<256x64xf32>
    %c0_6 = arith.constant 0 : index
    %7 = memref.load %arg5[%c0_6] : memref<1xf32, #tpu.memory_space<smem>>
    %cst_7 = arith.constant 0.000000e+00 : f32
    %8 = vector.broadcast %cst_7 : f32 to vector<256x64xf32>
    %9 = arith.maximumf %6, %8 : vector<256x64xf32>
    %cst_8 = arith.constant 0.000000e+00 : f32
    %10 = vector.broadcast %cst_8 : f32 to vector<256x64xf32>
    %11 = arith.minimumf %6, %10 : vector<256x64xf32>
    %12 = vector.broadcast %7 : f32 to vector<256x64xf32>
    %13 = arith.mulf %12, %11 : vector<256x64xf32>
    %14 = arith.addf %9, %13 : vector<256x64xf32>
    %c0_9 = arith.constant 0 : index
    %c0_10 = arith.constant 0 : index
    %c0_11 = arith.constant 0 : index
    %15 = vector.load %arg6[%c0_9, %c0_10, %c0_11] : memref<1x256x64xf32, #tpu.memory_space<vmem>>, vector<1x256x64xf32>
    %16 = vector.shape_cast %15 : vector<1x256x64xf32> to vector<256x64xf32>
    %17 = vector.shape_cast %14 : vector<256x64xf32> to vector<1x256x64xf32>
    tpu.vector_store %arg6[%c0_9, %c0_10, %c0_11], %17 {strides = array<i32>} : memref<1x256x64xf32, #tpu.memory_space<vmem>>, vector<1x256x64xf32>,
    return
  }
  func.func @transform_0(%arg0: i32, %arg1: i32) -> (i32, i32) {
    %c0_i32 = arith.constant 0 : i32
    %c0_i32_0 = arith.constant 0 : i32
    %c0_i32_1 = arith.constant 0 : i32
    return %c0_i32, %c0_i32_0 : i32, i32
  }
  func.func @transform_1(%arg0: i32, %arg1: i32) -> (i32, i32, i32) {
    %c0_i32 = arith.constant 0 : i32
    %c0_i32_0 = arith.constant 0 : i32
    return %arg0, %c0_i32, %arg1 : i32, i32, i32
  }
  func.func @transform_2(%arg0: i32, %arg1: i32) -> (i32, i32) {
    %c0_i32 = arith.constant 0 : i32
    %c0_i32_0 = arith.constant 0 : i32
    %c0_i32_1 = arith.constant 0 : i32
    return %c0_i32, %c0_i32_0 : i32, i32
  }
  func.func @transform_3(%arg0: i32, %arg1: i32) -> i32 {
    %c0_i32 = arith.constant 0 : i32
    %c0_i32_0 = arith.constant 0 : i32
    return %c0_i32 : i32
  }
  func.func @transform_4(%arg0: i32, %arg1: i32) -> (i32, i32, i32) {
    %c0_i32 = arith.constant 0 : i32
    %c0_i32_0 = arith.constant 0 : i32
    return %arg0, %c0_i32, %arg1 : i32, i32, i32
  }
}

module attributes {stable_mosaic.version = 11 : i64} {
  func.func @_conv_kernel(%arg0: i32, %arg1: i32, %arg2: memref<64x576xbf16, #tpu.memory_space<vmem>>, %arg3: memref<1x576x256xbf16, #tpu.memory_space<vmem>>, %arg4: memref<64x1xf32, #tpu.memory_space<vmem>>, %arg5: memref<1xf32, #tpu.memory_space<smem>>, %arg6: memref<1x64x256xf32, #tpu.memory_space<vmem>>) attributes {dimension_semantics = [#tpu.dimension_semantics<parallel>, #tpu.dimension_semantics<parallel>], iteration_bounds = array<i64: 2, 1>, scalar_prefetch = 0 : i64, scratch_operands = 0 : i64, tpu.core_type = #tpu.core_type<tc>, window_params = [{pipeline_mode = #tpu.pipeline_mode<synchronous>, transform_indices = @transform_0, window_bounds = array<i64: 64, 576>}, {transform_indices = @transform_1, window_bounds = array<i64: 1, 576, 256>}, {pipeline_mode = #tpu.pipeline_mode<synchronous>, transform_indices = @transform_2, window_bounds = array<i64: 64, 1>}, {transform_indices = @transform_3, window_bounds = array<i64: 1>}, {transform_indices = @transform_4, window_bounds = array<i64: 1, 64, 256>}]} {
    %c0 = arith.constant 0 : index
    %c0_0 = arith.constant 0 : index
    %0 = vector.load %arg2[%c0, %c0_0] : memref<64x576xbf16, #tpu.memory_space<vmem>>, vector<64x576xbf16>
    %c0_1 = arith.constant 0 : index
    %c0_2 = arith.constant 0 : index
    %c0_3 = arith.constant 0 : index
    %1 = vector.load %arg3[%c0_1, %c0_2, %c0_3] : memref<1x576x256xbf16, #tpu.memory_space<vmem>>, vector<1x576x256xbf16>
    %2 = vector.shape_cast %1 : vector<1x576x256xbf16> to vector<576x256xbf16>
    %cst = arith.constant dense<0.000000e+00> : vector<64x256xf32>
    %3 = tpu.matmul %0, %2, %cst {dimension_numbers = #tpu.dot_dimension_numbers<[1], [0], [0], [1], [0, 0, 1, 1], [], []>} : vector<64x576xbf16>, vector<576x256xbf16>, vector<64x256xf32> -> vector<64x256xf32>
    %c0_4 = arith.constant 0 : index
    %c0_5 = arith.constant 0 : index
    %4 = vector.load %arg4[%c0_4, %c0_5] : memref<64x1xf32, #tpu.memory_space<vmem>>, vector<64x1xf32>
    %5 = vector.broadcast %4 : vector<64x1xf32> to vector<64x256xf32>
    %6 = arith.addf %3, %5 : vector<64x256xf32>
    %c0_6 = arith.constant 0 : index
    %7 = memref.load %arg5[%c0_6] : memref<1xf32, #tpu.memory_space<smem>>
    %cst_7 = arith.constant 0.000000e+00 : f32
    %8 = vector.broadcast %cst_7 : f32 to vector<64x256xf32>
    %9 = arith.maximumf %6, %8 : vector<64x256xf32>
    %cst_8 = arith.constant 0.000000e+00 : f32
    %10 = vector.broadcast %cst_8 : f32 to vector<64x256xf32>
    %11 = arith.minimumf %6, %10 : vector<64x256xf32>
    %12 = vector.broadcast %7 : f32 to vector<64x256xf32>
    %13 = arith.mulf %12, %11 : vector<64x256xf32>
    %14 = arith.addf %9, %13 : vector<64x256xf32>
    %c0_9 = arith.constant 0 : index
    %c0_10 = arith.constant 0 : index
    %c0_11 = arith.constant 0 : index
    %15 = vector.load %arg6[%c0_9, %c0_10, %c0_11] : memref<1x64x256xf32, #tpu.memory_space<vmem>>, vector<1x64x256xf32>
    %16 = vector.shape_cast %15 : vector<1x64x256xf32> to vector<64x256xf32>
    %17 = vector.shape_cast %14 : vector<64x256xf32> to vector<1x64x256xf32>
    tpu.vector_store %arg6[%c0_9, %c0_10, %c0_11], %17 {strides = array<i32>} : memref<1x64x256xf32, #tpu.memory_space<vmem>>, vector<1x64x256xf32>,
    return
  }
  func.func @transform_0(%arg0: i32, %arg1: i32) -> (i32, i32) {
    %c0_i32 = arith.constant 0 : i32
    %c0_i32_0 = arith.constant 0 : i32
    %c0_i32_1 = arith.constant 0 : i32
    return %c0_i32, %c0_i32_0 : i32, i32
  }
  func.func @transform_1(%arg0: i32, %arg1: i32) -> (i32, i32, i32) {
    %c0_i32 = arith.constant 0 : i32
    %c0_i32_0 = arith.constant 0 : i32
    return %arg0, %c0_i32, %arg1 : i32, i32, i32
  }
  func.func @transform_2(%arg0: i32, %arg1: i32) -> (i32, i32) {
    %c0_i32 = arith.constant 0 : i32
    %c0_i32_0 = arith.constant 0 : i32
    %c0_i32_1 = arith.constant 0 : i32
    return %c0_i32, %c0_i32_0 : i32, i32
  }
  func.func @transform_3(%arg0: i32, %arg1: i32) -> i32 {
    %c0_i32 = arith.constant 0 : i32
    %c0_i32_0 = arith.constant 0 : i32
    return %c0_i32 : i32
  }
  func.func @transform_4(%arg0: i32, %arg1: i32) -> (i32, i32, i32) {
    %c0_i32 = arith.constant 0 : i32
    %c0_i32_0 = arith.constant 0 : i32
    return %arg0, %c0_i32, %arg1 : i32, i32, i32
  }
}

module attributes {stable_mosaic.version = 11 : i64} {
  func.func @_conv_kernel(%arg0: i32, %arg1: i32, %arg2: memref<64x576xbf16, #tpu.memory_space<vmem>>, %arg3: memref<1x576x256xbf16, #tpu.memory_space<vmem>>, %arg4: memref<64x1xf32, #tpu.memory_space<vmem>>, %arg5: memref<1x64x256xf32, #tpu.memory_space<vmem>>) attributes {dimension_semantics = [#tpu.dimension_semantics<parallel>, #tpu.dimension_semantics<parallel>], iteration_bounds = array<i64: 2, 1>, scalar_prefetch = 0 : i64, scratch_operands = 0 : i64, tpu.core_type = #tpu.core_type<tc>, window_params = [{pipeline_mode = #tpu.pipeline_mode<synchronous>, transform_indices = @transform_0, window_bounds = array<i64: 64, 576>}, {transform_indices = @transform_1, window_bounds = array<i64: 1, 576, 256>}, {pipeline_mode = #tpu.pipeline_mode<synchronous>, transform_indices = @transform_2, window_bounds = array<i64: 64, 1>}, {transform_indices = @transform_3, window_bounds = array<i64: 1, 64, 256>}]} {
    %c0 = arith.constant 0 : index
    %c0_0 = arith.constant 0 : index
    %0 = vector.load %arg2[%c0, %c0_0] : memref<64x576xbf16, #tpu.memory_space<vmem>>, vector<64x576xbf16>
    %c0_1 = arith.constant 0 : index
    %c0_2 = arith.constant 0 : index
    %c0_3 = arith.constant 0 : index
    %1 = vector.load %arg3[%c0_1, %c0_2, %c0_3] : memref<1x576x256xbf16, #tpu.memory_space<vmem>>, vector<1x576x256xbf16>
    %2 = vector.shape_cast %1 : vector<1x576x256xbf16> to vector<576x256xbf16>
    %cst = arith.constant dense<0.000000e+00> : vector<64x256xf32>
    %3 = tpu.matmul %0, %2, %cst {dimension_numbers = #tpu.dot_dimension_numbers<[1], [0], [0], [1], [0, 0, 1, 1], [], []>} : vector<64x576xbf16>, vector<576x256xbf16>, vector<64x256xf32> -> vector<64x256xf32>
    %c0_4 = arith.constant 0 : index
    %c0_5 = arith.constant 0 : index
    %4 = vector.load %arg4[%c0_4, %c0_5] : memref<64x1xf32, #tpu.memory_space<vmem>>, vector<64x1xf32>
    %5 = vector.broadcast %4 : vector<64x1xf32> to vector<64x256xf32>
    %6 = arith.addf %3, %5 : vector<64x256xf32>
    %c0_6 = arith.constant 0 : index
    %c0_7 = arith.constant 0 : index
    %c0_8 = arith.constant 0 : index
    %7 = vector.load %arg5[%c0_6, %c0_7, %c0_8] : memref<1x64x256xf32, #tpu.memory_space<vmem>>, vector<1x64x256xf32>
    %8 = vector.shape_cast %7 : vector<1x64x256xf32> to vector<64x256xf32>
    %9 = vector.shape_cast %6 : vector<64x256xf32> to vector<1x64x256xf32>
    tpu.vector_store %arg5[%c0_6, %c0_7, %c0_8], %9 {strides = array<i32>} : memref<1x64x256xf32, #tpu.memory_space<vmem>>, vector<1x64x256xf32>,
    return
  }
  func.func @transform_0(%arg0: i32, %arg1: i32) -> (i32, i32) {
    %c0_i32 = arith.constant 0 : i32
    %c0_i32_0 = arith.constant 0 : i32
    %c0_i32_1 = arith.constant 0 : i32
    return %c0_i32, %c0_i32_0 : i32, i32
  }
  func.func @transform_1(%arg0: i32, %arg1: i32) -> (i32, i32, i32) {
    %c0_i32 = arith.constant 0 : i32
    %c0_i32_0 = arith.constant 0 : i32
    return %arg0, %c0_i32, %arg1 : i32, i32, i32
  }
  func.func @transform_2(%arg0: i32, %arg1: i32) -> (i32, i32) {
    %c0_i32 = arith.constant 0 : i32
    %c0_i32_0 = arith.constant 0 : i32
    %c0_i32_1 = arith.constant 0 : i32
    return %c0_i32, %c0_i32_0 : i32, i32
  }
  func.func @transform_3(%arg0: i32, %arg1: i32) -> (i32, i32, i32) {
    %c0_i32 = arith.constant 0 : i32
    %c0_i32_0 = arith.constant 0 : i32
    return %arg0, %c0_i32, %arg1 : i32, i32, i32
  }
}

</mosaic_0001>

<bundles_post_ra>
// kernel: multisource_projection.19
= control target key start
LH: loop header
LB: loop body
LE: loop exit
PB: predicated region body
PF: predicated region fallthrough
CT: control target
= control target key end

     0   :  { %s588_s17 = smov 0   ;;  %s590_s18 = smov 0   ;;  %s652_s0 = inlined_call_operand.vmem [shape: bf16[32,64], index: 0, kind: input, shape index: {}]   ;;  %s653_s1 = inlined_call_operand.vmem [shape: bf16[2,64,16], index: 1, kind: input, shape index: {}]   ;;  %s654_s2 = inlined_call_operand.vmem [shape: f32[32,1], index: 2, kind: input, shape index: {}]   ;;  %s655_s3 = inlined_call_operand.<no memory space> [shape: f32[1], index: 3, kind: input, shape index: {}]   ;;  %s656_s4 = inlined_call_operand.vmem [shape: f32[2,32,16], index: 4, kind: output, shape index: {}]  }
   0x1   :  { %9 = sst [smem:[#allocation2]] %s655_s3  ;;  %s592_s19 = smov 0  }
   0x2 LB: > { %s27_s3 = sadd.s32 1, %s553_s18  ;;  %p467_p0 = scmp.ge.s32.totalorder %s557_s19, 1  ;;  %s557_s19 = sphi %s592_s19, %s15_s19   ;;  %s553_s18 = sphi %s590_s18, %s658_s18   ;;  %s549_s17 = sphi %s588_s17, %s657_s17  }
   0x3   : > { %p29_p1 = scmp.ge.s32.totalorder %s27_s3, 2  ;;  %p182_p2 = scmp.lt.s32.totalorder %s557_s19, 3 }
   0x5   : > { %s660_s3 = smov (%p29_p1, %s27_s3), 0  ;;  %p183_p3 = pnand %p467_p0, %p182_p2 }
   0x6   : > { %p214_p4 = scmp.lt.s32.totalorder (!%p183_p3), %s549_s17, 1  ;;  %s357_s10 = sld [smem:[#allocation2]] (!%p183_p3) }
   0x7   : > { %186 = sbr.rel (%p183_p3) target bundleno = 240 (0xf0), region = 36 }
   0xc   : > { %v533_v0 = vld [vmem:[%s652_s0] sm:$0xff]   ;;  %vm301_vm0 = vcmask 523264   ;;  %s662_s17 = smov (!%p214_p4, %s549_s17), 1  ;;  %v245_v1 = vld [vmem:[%s654_s2 + $0x10] sm:$0xff]  ;;  %v559_v3 = vmov 0   ;;  %v246_v4 = vld [vmem:[%s654_s2 + $0x18] sm:$0xff]  ;;  %v366_v15 = vstv %s357_s10 }
   0xd   : > { %498 = vmatprep.mubr.msk.bf16.mxu0 %vm301_vm0, %v533_v0  ;;  %v243_v2 = vld [vmem:[%s654_s2] sm:$0xff]  ;;  %528 = vset.pattern.permute.xlu1 %v559_v3  ;;  %s482_s26 = sshll.u32 %s662_s17, 5  ;;  %v244_v5 = vld [vmem:[%s654_s2 + $0x8] sm:$0xff]  ;;  %vm375_vm1 = vcmask 130048  }
   0xe   : > { %527 = vset.pattern.permute.xlu0 %v559_v3  ;;  %259 = vperm.xlu1 %528, %v245_v1   ;;  %s221_s29 = scalar_lea.vmem %s653_s1, %s482_s26  ;;  %v534_v10 = vld [vmem:[%s652_s0 + $0x8] sm:$0xff]   ;;  %s229_s13 = scalar_lea.vmem %s656_s4, %s482_s26 }
   0xf   : > { %249 = vperm.xlu0 %527, %v243_v2   ;;  %v529_v6 = vld [vmem:[%s221_s29 + $0x18] sm:$0xff]   ;;  %v530_v7 = vld [vmem:[%s221_s29 + $0x10] sm:$0xff]   ;;  %v531_v8 = vld [vmem:[%s221_s29 + $0x8] sm:$0xff]  }
  0x10   : > { %490 = vmatprep.subr.bf16.mxu0 %v529_v6  ;;  %v532_v9 = vld [vmem:[%s221_s29] sm:$0xff]  }
  0x11   : > { %491 = vmatpush3.bf16.msra.mxu0 %v529_v6 }
  0x12   : > { %264 = vperm.xlu1 %528, %v246_v4   ;;  %492 = vmatprep.subr.bf16.mxu0 %v530_v7 }
  0x13   : > { %254 = vperm.xlu0 %527, %v244_v5  }
  0x15   : > { %493 = vmatpush3.bf16.msra.mxu0 %v530_v7 }
  0x16   : > { %494 = vmatprep.subr.bf16.mxu0 %v531_v8 }
  0x19   : > { %495 = vmatpush3.bf16.msra.mxu0 %v531_v8 }
  0x1a   : > { %496 = vmatprep.subr.bf16.mxu0 %v532_v9 }
  0x1d   : > { %497 = vmatpush3.bf16.msra.mxu0 %v532_v9 }
  0x20   : > { %499 = vmatmul.mubr.msk.bf16.vlgmr.msra.gmra.mxu0 %vm301_vm0, %v534_v10 }
  0x89   : > { %v260_v11 = vpop.permute.xlu1 %259 }
  0x8a   : > { %v250_v13 = vpop.permute.xlu0 %249 }
  0x8d   : > { %v265_v19 = vpop.permute.xlu1 %264 }
  0x8e   : > { %v255_v27 = vpop.permute.xlu0 %254 }
  0xe0   : > { %v500_v12 = vpop.f32.mrf.mxu0 }
  0xe1   : > { %v351_v14 = vadd.f32 %v500_v12, %v260_v11 }
  0xe2   : > { %v342_v16 = vpop.f32.mrf.mxu0 }
  0xe3   : > { %v364_v17 = vmin.f32 %v351_v14, 0.0  ;;  %v343_v18 = vadd.f32 %v342_v16, %v250_v13  ;;  %v360_v21 = vmax.f32 %v351_v14, 0.0 }
  0xe4   : > { %v501_v20 = vpop.f32.mrf.mxu0 }
  0xe5   : > { %v369_v22 = vmul.f32 %v366_v15, %v364_v17  ;;  %v362_v23 = vmin.f32 %v343_v18, 0.0  ;;  %v354_v24 = vadd.f32 %v501_v20, %v265_v19  ;;  %v358_v28 = vmax.f32 %v343_v18, 0.0 }
  0xe6   : > { %v345_v25 = vpop.f32.mrf.mxu0 }
  0xe7   : > { %v373_v26 = vadd.f32 %v369_v22, %v360_v21  ;;  %v367_v29 = vmul.f32 %v366_v15, %v362_v23  ;;  %v365_v30 = vmin.f32 %v354_v24, 0.0  ;;  %v346_v31 = vadd.f32 %v345_v25, %v255_v27 }
  0xe8   : > { %v361_v33 = vmax.f32 %v354_v24, 0.0 }
  0xe9   : > { %378 = vst.msk [vmem:[%s229_s13 + $0x10] sm:$0xff] %vm375_vm1, %v373_v26  ;;  %v371_v32 = vadd.f32 %v367_v29, %v358_v28  ;;  %v370_v34 = vmul.f32 %v366_v15, %v365_v30  ;;  %v363_v35 = vmin.f32 %v346_v31, 0.0  ;;  %v359_v37 = vmax.f32 %v346_v31, 0.0 }
  0xeb   : > { %376 = vst.msk [vmem:[%s229_s13] sm:$0xff] %vm375_vm1, %v371_v32  ;;  %v374_v36 = vadd.f32 %v370_v34, %v361_v33  ;;  %v368_v38 = vmul.f32 %v366_v15, %v363_v35 }
  0xed   : > { %379 = vst.msk [vmem:[%s229_s13 + $0x18] sm:$0xff] %vm375_vm1, %v374_v36  ;;  %v372_v39 = vadd.f32 %v368_v38, %v359_v37 }
  0xef   : > { %377 = vst.msk [vmem:[%s229_s13 + $0x8] sm:$0xff] %vm375_vm1, %v372_v39 }
  0xf0 PF: > { %s15_s19 = sadd.s32 1, %s557_s19   ;;  %s657_s17 = smov %s553_s18 }
  0xf1   : > { %p12_p5 = scmp.ge.s32.totalorder %s15_s19, 4   ;;  %s658_s18 = smov %s660_s3 }
  0xf3   :  { %14 = sbr.rel (!%p12_p5) target bundleno = 2 (0x2), region = 66 }

// kernel: multisource_projection.18
= control target key start
LH: loop header
LB: loop body
LE: loop exit
PB: predicated region body
PF: predicated region fallthrough
CT: control target
= control target key end

     0   :  { %s587_s17 = smov 0   ;;  %s589_s18 = smov 0   ;;  %s651_s0 = inlined_call_operand.vmem [shape: bf16[32,64], index: 0, kind: input, shape index: {}]   ;;  %s652_s1 = inlined_call_operand.vmem [shape: bf16[2,64,64], index: 1, kind: input, shape index: {}]   ;;  %s653_s2 = inlined_call_operand.vmem [shape: f32[32,1], index: 2, kind: input, shape index: {}]   ;;  %s654_s3 = inlined_call_operand.<no memory space> [shape: f32[1], index: 3, kind: input, shape index: {}]   ;;  %s655_s4 = inlined_call_operand.vmem [shape: f32[2,32,64], index: 4, kind: output, shape index: {}]  }
   0x1   :  { %9 = sst [smem:[#allocation2]] %s654_s3  ;;  %s591_s19 = smov 0  }
   0x2 LB: > { %s27_s3 = sadd.s32 1, %s552_s18  ;;  %p466_p0 = scmp.ge.s32.totalorder %s556_s19, 1  ;;  %s556_s19 = sphi %s591_s19, %s15_s19   ;;  %s552_s18 = sphi %s589_s18, %s657_s18   ;;  %s548_s17 = sphi %s587_s17, %s656_s17  }
   0x3   : > { %p29_p1 = scmp.ge.s32.totalorder %s27_s3, 2  ;;  %p182_p2 = scmp.lt.s32.totalorder %s556_s19, 3 }
   0x5   : > { %s659_s3 = smov (%p29_p1, %s27_s3), 0  ;;  %p183_p3 = pnand %p466_p0, %p182_p2 }
   0x6   : > { %p214_p4 = scmp.lt.s32.totalorder (!%p183_p3), %s548_s17, 1  ;;  %s357_s10 = sld [smem:[#allocation2]] (!%p183_p3) }
   0x7   : > { %186 = sbr.rel (%p183_p3) target bundleno = 240 (0xf0), region = 36 }
   0xc   : > { %v532_v0 = vld [vmem:[%s651_s0] sm:$0xff]   ;;  %vm301_vm0 = vcmask 523264   ;;  %s661_s17 = smov (!%p214_p4, %s548_s17), 1  ;;  %v245_v1 = vld [vmem:[%s653_s2 + $0x10] sm:$0xff]  ;;  %v558_v3 = vmov 0   ;;  %v246_v4 = vld [vmem:[%s653_s2 + $0x18] sm:$0xff]  ;;  %v366_v15 = vstv %s357_s10 }
   0xd   : > { %497 = vmatprep.mubr.msk.bf16.mxu0 %vm301_vm0, %v532_v0  ;;  %v243_v2 = vld [vmem:[%s653_s2] sm:$0xff]  ;;  %527 = vset.pattern.permute.xlu1 %v558_v3  ;;  %s481_s26 = sshll.u32 %s661_s17, 5  ;;  %v244_v5 = vld [vmem:[%s653_s2 + $0x8] sm:$0xff] }
   0xe   : > { %526 = vset.pattern.permute.xlu0 %v558_v3  ;;  %259 = vperm.xlu1 %527, %v245_v1   ;;  %s221_s29 = scalar_lea.vmem %s652_s1, %s481_s26  ;;  %v533_v10 = vld [vmem:[%s651_s0 + $0x8] sm:$0xff]   ;;  %s229_s13 = scalar_lea.vmem %s655_s4, %s481_s26 }
   0xf   : > { %249 = vperm.xlu0 %526, %v243_v2   ;;  %v528_v6 = vld [vmem:[%s221_s29 + $0x18] sm:$0xff]   ;;  %v529_v7 = vld [vmem:[%s221_s29 + $0x10] sm:$0xff]   ;;  %v530_v8 = vld [vmem:[%s221_s29 + $0x8] sm:$0xff]  }
  0x10   : > { %489 = vmatprep.subr.bf16.mxu0 %v528_v6  ;;  %v531_v9 = vld [vmem:[%s221_s29] sm:$0xff]  }
  0x11   : > { %490 = vmatpush3.bf16.msra.mxu0 %v528_v6 }
  0x12   : > { %264 = vperm.xlu1 %527, %v246_v4   ;;  %491 = vmatprep.subr.bf16.mxu0 %v529_v7 }
  0x13   : > { %254 = vperm.xlu0 %526, %v244_v5  }
  0x15   : > { %492 = vmatpush3.bf16.msra.mxu0 %v529_v7 }
  0x16   : > { %493 = vmatprep.subr.bf16.mxu0 %v530_v8 }
  0x19   : > { %494 = vmatpush3.bf16.msra.mxu0 %v530_v8 }
  0x1a   : > { %495 = vmatprep.subr.bf16.mxu0 %v531_v9 }
  0x1d   : > { %496 = vmatpush3.bf16.msra.mxu0 %v531_v9 }
  0x20   : > { %498 = vmatmul.mubr.msk.bf16.vlgmr.msra.gmra.mxu0 %vm301_vm0, %v533_v10 }
  0x89   : > { %v260_v11 = vpop.permute.xlu1 %259 }
  0x8a   : > { %v250_v13 = vpop.permute.xlu0 %249 }
  0x8d   : > { %v265_v19 = vpop.permute.xlu1 %264 }
  0x8e   : > { %v255_v27 = vpop.permute.xlu0 %254 }
  0xe0   : > { %v499_v12 = vpop.f32.mrf.mxu0 }
  0xe1   : > { %v351_v14 = vadd.f32 %v499_v12, %v260_v11 }
  0xe2   : > { %v342_v16 = vpop.f32.mrf.mxu0 }
  0xe3   : > { %v364_v17 = vmin.f32 %v351_v14, 0.0  ;;  %v343_v18 = vadd.f32 %v342_v16, %v250_v13  ;;  %v360_v21 = vmax.f32 %v351_v14, 0.0 }
  0xe4   : > { %v500_v20 = vpop.f32.mrf.mxu0 }
  0xe5   : > { %v369_v22 = vmul.f32 %v366_v15, %v364_v17  ;;  %v362_v23 = vmin.f32 %v343_v18, 0.0  ;;  %v354_v24 = vadd.f32 %v500_v20, %v265_v19  ;;  %v358_v28 = vmax.f32 %v343_v18, 0.0 }
  0xe6   : > { %v345_v25 = vpop.f32.mrf.mxu0 }
  0xe7   : > { %v373_v26 = vadd.f32 %v369_v22, %v360_v21  ;;  %v367_v29 = vmul.f32 %v366_v15, %v362_v23  ;;  %v365_v30 = vmin.f32 %v354_v24, 0.0  ;;  %v346_v31 = vadd.f32 %v345_v25, %v255_v27 }
  0xe8   : > { %v361_v33 = vmax.f32 %v354_v24, 0.0 }
  0xe9   : > { %377 = vst.msk [vmem:[%s229_s13 + $0x10] sm:$0xff] %vm301_vm0, %v373_v26  ;;  %v371_v32 = vadd.f32 %v367_v29, %v358_v28  ;;  %v370_v34 = vmul.f32 %v366_v15, %v365_v30  ;;  %v363_v35 = vmin.f32 %v346_v31, 0.0  ;;  %v359_v37 = vmax.f32 %v346_v31, 0.0 }
  0xeb   : > { %375 = vst.msk [vmem:[%s229_s13] sm:$0xff] %vm301_vm0, %v371_v32  ;;  %v374_v36 = vadd.f32 %v370_v34, %v361_v33  ;;  %v368_v38 = vmul.f32 %v366_v15, %v363_v35 }
  0xed   : > { %378 = vst.msk [vmem:[%s229_s13 + $0x18] sm:$0xff] %vm301_vm0, %v374_v36  ;;  %v372_v39 = vadd.f32 %v368_v38, %v359_v37 }
  0xef   : > { %376 = vst.msk [vmem:[%s229_s13 + $0x8] sm:$0xff] %vm301_vm0, %v372_v39 }
  0xf0 PF: > { %s15_s19 = sadd.s32 1, %s556_s19   ;;  %s656_s17 = smov %s552_s18 }
  0xf1   : > { %p12_p5 = scmp.ge.s32.totalorder %s15_s19, 4   ;;  %s657_s18 = smov %s659_s3 }
  0xf3   :  { %14 = sbr.rel (!%p12_p5) target bundleno = 2 (0x2), region = 66 }

// kernel: multisource_projection.20
= control target key start
LH: loop header
LB: loop body
LE: loop exit
PB: predicated region body
PF: predicated region fallthrough
CT: control target
= control target key end

     0   :  { %s652_s12 = smov 0   ;;  %s736_s0 = inlined_call_operand.vmem [shape: f32[2,16,288], index: 0, kind: input, shape index: {}]   ;;  %s737_s1 = inlined_call_operand.vmem [shape: f32[2,288,64], index: 1, kind: input, shape index: {}]   ;;  %s738_s2 = inlined_call_operand.vmem [shape: f32[2,16,1], index: 2, kind: input, shape index: {}]   ;;  %s739_s3 = inlined_call_operand.vmem [shape: f32[2,16,64], index: 3, kind: output, shape index: {}]  }
   0x1 LB: > { %s533_s13 = sadd.s32 4294967295, %s629_s12   ;;  %p537_p0 = scmp.ge.s32.totalorder %s629_s12, 1  ;;  %s629_s12 = sphi %s652_s12, %s13_s12  }
   0x2   : > { %p157_p1 = scmp.lt.s32.totalorder %s629_s12, 3 }
   0x4   : > { %p158_p2 = pnand %p537_p0, %p157_p1 }
   0x5   : > { %p191_p3 = scmp.lt.s32.totalorder (!%p158_p2), %s533_s13, 1 }
   0x6   : > { %161 = sbr.rel (%p158_p2) target bundleno = 319 (0x13f), region = 32 }
   0xb   : > { %v631_v0 = vmov 0   ;;  %s741_s13 = smov (!%p191_p3, %s533_s13), 1  ;;  %vm253_vm0 = vcmask 261120   ;;  %vm424_vm1 = vcmask 523264  }
   0xc   : > { %616 = vset.pattern.permute.xlu0 %v631_v0  ;;  %s606_s14 = smul.u32 288, %s741_s13  ;;  %s548_s15 = sshll.u32 %s741_s13, 4 }
   0xd   : > { %s205_s18 = scalar_lea.vmem %s738_s2, %s548_s15  ;;  %s605_s22 = smul.u32 48, %s741_s13 }
   0xe   : > { %s672_s21 = scalar_lea.vmem %s737_s1, %s606_s14  ;;  %v410_v1 = vld [vmem:[%s205_s18] sm:$0xff]  ;;  %v411_v6 = vld [vmem:[%s205_s18 + $0x8] sm:$0xff]  ;;  %s210_s28 = scalar_lea.vmem %s739_s3, %s548_s15 }
   0xf   : > { %v248_v2 = vld [vmem:[%s672_s21 + $0xf8] sm:$0xff]  ;;  %v247_v4 = vld [vmem:[%s672_s21 + $0xf0] sm:$0xff]  ;;  %414 = vperm.xlu0 %616, %v410_v1   ;;  %v246_v7 = vld [vmem:[%s672_s21 + $0xe8] sm:$0xff]  ;;  %s691_s25 = scalar_lea.vmem %s736_s0, %s605_s22 }
  0x10   : > { %v232_v3 = vld [vmem:[%s672_s21 + $0x78] sm:$0xff]  ;;  %550 = vmatprep.subr.mxu0 %v248_v2  ;;  %v231_v5 = vld [vmem:[%s672_s21 + $0x70] sm:$0xff]  ;;  %v230_v8 = vld [vmem:[%s672_s21 + $0x68] sm:$0xff] }
  0x11   : > { %551 = vmatpush3.msra.mxu0 %v232_v3  ;;  %v245_v9 = vld [vmem:[%s672_s21 + $0xe0] sm:$0xff]  ;;  %v244_v11 = vld [vmem:[%s672_s21 + $0xd8] sm:$0xff]  ;;  %v243_v13 = vld [vmem:[%s672_s21 + $0xd0] sm:$0xff] }
  0x12   : > { %552 = vmatprep.subr.mxu0 %v247_v4  ;;  %v229_v10 = vld [vmem:[%s672_s21 + $0x60] sm:$0xff]  ;;  %v228_v12 = vld [vmem:[%s672_s21 + $0x58] sm:$0xff]  ;;  %v227_v14 = vld [vmem:[%s672_s21 + $0x50] sm:$0xff] }
  0x13   : > { %553 = vmatpush3.msra.mxu0 %v231_v5  ;;  %419 = vperm.xlu0 %616, %v411_v6   ;;  %v252_v15 = vld [vmem:[%s672_s21 + $0x118] sm:$0xff]  ;;  %v242_v16 = vld [vmem:[%s672_s21 + $0xc8] sm:$0xff]  ;;  %v251_v17 = vld [vmem:[%s672_s21 + $0x110] sm:$0xff] }
  0x14   : > { %554 = vmatprep.subr.mxu0 %v246_v7  ;;  %594 = vmatprep.subr.mxu1 %v252_v15  ;;  %v226_v18 = vld [vmem:[%s672_s21 + $0x48] sm:$0xff]  ;;  %v241_v20 = vld [vmem:[%s672_s21 + $0xc0] sm:$0xff]  ;;  %v240_v23 = vld [vmem:[%s672_s21 + $0xb8] sm:$0xff] }
  0x15   : > { %555 = vmatpush3.msra.mxu0 %v230_v8  ;;  %595 = vmatpush3.msra.mxu1 %v252_v15  ;;  %v250_v19 = vld [vmem:[%s672_s21 + $0x108] sm:$0xff]  ;;  %v225_v22 = vld [vmem:[%s672_s21 + $0x40] sm:$0xff]  ;;  %v224_v25 = vld [vmem:[%s672_s21 + $0x38] sm:$0xff] }
  0x16   : > { %556 = vmatprep.subr.mxu0 %v245_v9  ;;  %596 = vmatprep.subr.mxu1 %v251_v17  ;;  %v212_v21 = vld [vmem:[%s691_s25 + $0x8] sm:$0xff]  ;;  %v249_v24 = vld [vmem:[%s672_s21 + $0x100] sm:$0xff]  ;;  %v239_v26 = vld [vmem:[%s672_s21 + $0xb0] sm:$0xff] }
  0x17   : > { %557 = vmatpush3.msra.mxu0 %v229_v10  ;;  %597 = vmatpush3.msra.mxu1 %v251_v17  ;;  %v213_v27 = vld [vmem:[%s691_s25 + $0x10] sm:$0xff]  ;;  %v216_v29 = vld [vmem:[%s691_s25 + $0x28] sm:$0xff]  ;;  %v237_v32 = vld [vmem:[%s672_s21 + $0xa0] sm:$0xff] }
  0x18   : > { %558 = vmatprep.subr.mxu0 %v244_v11  ;;  %598 = vmatprep.subr.mxu1 %v250_v19  ;;  %v223_v28 = vld [vmem:[%s672_s21 + $0x30] sm:$0xff]  ;;  %v238_v30 = vld [vmem:[%s672_s21 + $0xa8] sm:$0xff]  ;;  %v221_v33 = vld [vmem:[%s672_s21 + $0x20] sm:$0xff] }
  0x19   : > { %559 = vmatpush3.msra.mxu0 %v228_v12  ;;  %324 = vmatprep.mubr.f32.mxu0 %v212_v21  ;;  %v222_v31 = vld [vmem:[%s672_s21 + $0x28] sm:$0xff]  ;;  %v236_v34 = vld [vmem:[%s672_s21 + $0x98] sm:$0xff]  ;;  %v235_v36 = vld [vmem:[%s672_s21 + $0x90] sm:$0xff] }
  0x1a   : > { %560 = vmatprep.subr.mxu0 %v243_v13  ;;  %599 = vmatpush3.msra.mxu1 %v250_v19  ;;  %v220_v35 = vld [vmem:[%s672_s21 + $0x18] sm:$0xff]  ;;  %v219_v37 = vld [vmem:[%s672_s21 + $0x10] sm:$0xff]  ;;  %v234_v38 = vld [vmem:[%s672_s21 + $0x88] sm:$0xff] }
  0x1b   : > { %561 = vmatpush3.msra.mxu0 %v227_v14  ;;  %600 = vmatprep.subr.mxu1 %v249_v24  ;;  %v218_v39 = vld [vmem:[%s672_s21 + $0x8] sm:$0xff]  ;;  %v233_v40 = vld [vmem:[%s672_s21 + $0x80] sm:$0xff]  ;;  %v214_v44 = vld [vmem:[%s691_s25 + $0x18] sm:$0xff] }
  0x1c   : > { %562 = vmatprep.subr.mxu0 %v242_v16  ;;  %601 = vmatpush3.msra.mxu1 %v249_v24  ;;  %v217_v41 = vld [vmem:[%s672_s21] sm:$0xff] }
  0x1d   : > { %563 = vmatpush3.msra.mxu0 %v226_v18  ;;  %602 = vmatprep.mubr.msk.f32.mxu1 %vm253_vm0, %v213_v27  ;;  %v211_v42 = vld [vmem:[%s691_s25] sm:$0xff] }
  0x1e   : > { %564 = vmatprep.subr.mxu0 %v241_v20  ;;  %603 = vmatmul.mubr.msk.f32.vlgmr.msra.gmra.mxu1 %vm253_vm0, %v216_v29  ;;  %v215_v43 = vld [vmem:[%s691_s25 + $0x20] sm:$0xff] }
  0x1f   : > { %565 = vmatpush3.msra.mxu0 %v225_v22 }
  0x20   : > { %566 = vmatprep.subr.mxu0 %v240_v23 }
  0x21   : > { %567 = vmatpush3.msra.mxu0 %v224_v25 }
  0x22   : > { %568 = vmatprep.subr.mxu0 %v239_v26 }
  0x23   : > { %569 = vmatpush3.msra.mxu0 %v223_v28 }
  0x24   : > { %570 = vmatprep.subr.mxu0 %v238_v30 }
  0x25   : > { %571 = vmatpush3.msra.mxu0 %v222_v31 }
  0x26   : > { %572 = vmatprep.subr.mxu0 %v237_v32 }
  0x27   : > { %573 = vmatpush3.msra.mxu0 %v221_v33 }
  0x28   : > { %574 = vmatprep.subr.mxu0 %v236_v34 }
  0x29   : > { %575 = vmatpush3.msra.mxu0 %v220_v35 }
  0x2a   : > { %576 = vmatprep.subr.mxu0 %v235_v36 }
  0x2b   : > { %577 = vmatpush3.msra.mxu0 %v219_v37 }
  0x2c   : > { %578 = vmatprep.subr.mxu0 %v234_v38 }
  0x2d   : > { %579 = vmatpush3.msra.mxu0 %v218_v39 }
  0x2e   : > { %580 = vmatprep.subr.mxu0 %v233_v40 }
  0x2f   : > { %581 = vmatpush3.msra.mxu0 %v217_v41 }
  0x30   : > { %325 = vmatmul.mubr.f32.vlgmr.msra.gmra.mxu0 %v211_v42 }
  0x31   : > { %329 = vmatprep.mubr.f32.mxu0 %v215_v43 }
  0x34   : > { %330 = vmatmul.mubr.f32.gmra.mxu0 %v214_v44 }
  0x8a   : > { %v415_v50 = vpop.permute.xlu0 %414 }
  0x8e   : > { %v420_v57 = vpop.permute.xlu0 %419 }
  0xde   : > { %v604_v45 = vpop.f32.mrf.mxu1 }
  0xe0   : > { %v401_v48 = vpop.f32.mrf.mxu1 }
  0xf0   : > { %v582_v46 = vpop.f32.mrf.mxu0 }
  0xf2   : > { %v583_v47 = vpop.f32.mrf.mxu0 }
  0xf3   : > { %v584_v49 = vadd.f32 %v583_v47, %v582_v46 }
  0xf4   : > { %v585_v51 = vpop.f32.mrf.mxu0 }
  0xf5   : > { %v402_v52 = vadd.f32 %v584_v49, %v401_v48 }
  0xf6   : > { %v586_v53 = vpop.f32.mrf.mxu0 }
  0xf7   : > { %v587_v54 = vadd.f32 %v586_v53, %v585_v51  ;;  %v422_v55 = vmul.f32 %v415_v50, %v402_v52 }
  0xf9   : > { %v407_v56 = vadd.f32 %v604_v45, %v587_v54  ;;  %v425_v59 = vsel %vm424_vm1, %v422_v55, -inf }
  0xfb   : > { %v423_v58 = vmul.f32 %v420_v57, %v407_v56 }
  0xfd   : > { %v426_v60 = vsel %vm424_vm1, %v423_v58, -inf }
  0xfe   : > { %v427_v61 = vmax.f32 %v425_v59, %v426_v60 }
 0x100   : > { %v428_v62 = vrot.slane %v427_v61, 4 }
 0x102   : > { %v429_v63 = vmax.f32 %v427_v61, %v428_v62 }
 0x104   : > { %v430_v0 = vrot.slane %v429_v63, 2 }
 0x106   : > { %v431_v1 = vmax.f32 %v429_v63, %v430_v0 }
 0x108   : > { %v432_v2 = vrot.slane %v431_v1, 1 }
 0x10a   : > { %v433_v3 = vmax.f32 %v431_v1, %v432_v2 }
 0x10c   : > { %v434_v4 = vsub.f32 %v422_v55, %v433_v3  ;;  %v435_v5 = vsub.f32 %v423_v58, %v433_v3 }
 0x10e   : > { %v436_v6 = vmul.f32 1.442695, %v434_v4  ;;  %v438_v7 = vmul.f32 1.442695, %v435_v5 }
 0x110   : > { %617 = vpow2.f32 %v436_v6 }
 0x111   : > { %619 = vpow2.f32 %v438_v7 }
 0x11d   : > { %v618_v8 = vpop.eup %617 }
 0x11e   : > { %v620_v9 = vpop.eup %619  ;;  %v440_v10 = vsel %vm424_vm1, %v618_v8, 0.0 }
 0x11f   : > { %v441_v11 = vsel %vm424_vm1, %v620_v9, 0.0 }
 0x120   : > { %v442_v12 = vadd.f32 %v441_v11, %v440_v10 }
 0x122   : > { %v443_v13 = vrot.slane %v442_v12, 4 }
 0x124   : > { %v444_v14 = vadd.f32 %v443_v13, %v442_v12 }
 0x126   : > { %v445_v15 = vrot.slane %v444_v14, 2 }
 0x128   : > { %v446_v16 = vadd.f32 %v445_v15, %v444_v14 }
 0x12a   : > { %v447_v17 = vrot.slane %v446_v16, 1 }
 0x12c   : > { %v448_v18 = vadd.f32 %v447_v17, %v446_v16 }
 0x12e   : > { %621 = vrcp.f32 %v448_v18 }
 0x13b   : > { %v622_v19 = vpop.eup %621 }
 0x13c   : > { %v450_v20 = vmul.f32 %v622_v19, %v618_v8  ;;  %v451_v21 = vmul.f32 %v622_v19, %v620_v9 }
 0x13e   : > { %452 = vst.msk [vmem:[%s210_s28] sm:$0xff] %vm424_vm1, %v450_v20  ;;  %453 = vst.msk [vmem:[%s210_s28 + $0x8] sm:$0xff] %vm424_vm1, %v451_v21 }
 0x13f PF: > { %s13_s12 = sadd.s32 1, %s629_s12  }
 0x140   : > { %p10_p4 = scmp.ge.s32.totalorder %s13_s12, 4  }
 0x142   :  { %12 = sbr.rel (!%p10_p4) target bundleno = 1 (0x1), region = 68 }

// kernel: multisource_projection.17
= control target key start
LH: loop header
LB: loop body
LE: loop exit
PB: predicated region body
PF: predicated region fallthrough
CT: control target
= control target key end

     0   :  { %s687_s17 = smov 0   ;;  %s689_s18 = smov 0   ;;  %s782_s0 = inlined_call_operand.vmem [shape: bf16[64,64], index: 0, kind: input, shape index: {}]   ;;  %s783_s1 = inlined_call_operand.vmem [shape: bf16[2,64,64], index: 1, kind: input, shape index: {}]   ;;  %s784_s2 = inlined_call_operand.vmem [shape: f32[64,1], index: 2, kind: input, shape index: {}]   ;;  %s785_s3 = inlined_call_operand.<no memory space> [shape: f32[1], index: 3, kind: input, shape index: {}]   ;;  %s786_s4 = inlined_call_operand.vmem [shape: f32[2,64,64], index: 4, kind: output, shape index: {}]  }
   0x1   :  { %9 = sst [smem:[#allocation2]] %s785_s3  ;;  %s691_s19 = smov 0  }
   0x2 LB: > { %s27_s3 = sadd.s32 1, %s652_s18  ;;  %p546_p0 = scmp.ge.s32.totalorder %s656_s19, 1  ;;  %s656_s19 = sphi %s691_s19, %s15_s19   ;;  %s652_s18 = sphi %s689_s18, %s788_s18   ;;  %s648_s17 = sphi %s687_s17, %s787_s17  }
   0x3   : > { %p29_p1 = scmp.ge.s32.totalorder %s27_s3, 2  ;;  %p182_p2 = scmp.lt.s32.totalorder %s656_s19, 3 }
   0x5   : > { %s790_s3 = smov (%p29_p1, %s27_s3), 0  ;;  %p183_p3 = pnand %p546_p0, %p182_p2 }
   0x6   : > { %p214_p4 = scmp.lt.s32.totalorder (!%p183_p3), %s648_s17, 1  ;;  %s417_s25 = sld [smem:[#allocation2]] (!%p183_p3) }
   0x7   : > { %186 = sbr.rel (%p183_p3) target bundleno = 242 (0xf2), region = 36 }
   0xc   : > { %v630_v0 = vld [vmem:[%s782_s0] sm:$0xff]   ;;  %vm339_vm0 = vcmask 523264   ;;  %v631_v1 = vld [vmem:[%s782_s0 + $0x10] sm:$0xff]   ;;  %s792_s17 = smov (!%p214_p4, %s648_s17), 1  ;;  %v658_v2 = vmov 0   ;;  %v250_v6 = vld [vmem:[%s784_s2 + $0x18] sm:$0xff]  ;;  %v434_v28 = vstv %s417_s25 }
   0xd   : > { %583 = vmatprep.mubr.msk.bf16.mxu0 %vm339_vm0, %v630_v0  ;;  %587 = vmatprep.mubr.msk.bf16.mxu1 %vm339_vm0, %v631_v1  ;;  %s565_s24 = sshll.u32 %s792_s17, 5  ;;  %v249_v3 = vld [vmem:[%s784_s2 + $0x10] sm:$0xff]  ;;  %v247_v4 = vld [vmem:[%s784_s2] sm:$0xff]  ;;  %v248_v8 = vld [vmem:[%s784_s2 + $0x8] sm:$0xff]  ;;  %s566_s26 = sshll.u32 %s792_s17, 6 }
   0xe   : > { %625 = vset.pattern.permute.xlu1 %v658_v2  ;;  %624 = vset.pattern.permute.xlu0 %v658_v2  ;;  %s221_s5 = scalar_lea.vmem %s783_s1, %s565_s24  ;;  %v252_v10 = vld [vmem:[%s784_s2 + $0x28] sm:$0xff]  ;;  %v251_v11 = vld [vmem:[%s784_s2 + $0x20] sm:$0xff]  ;;  %v254_v13 = vld [vmem:[%s784_s2 + $0x38] sm:$0xff]  ;;  %s755_s29 = scalar_lea.vmem %s786_s4, %s566_s26 }
   0xf   : > { %267 = vperm.xlu1 %625, %v249_v3   ;;  %257 = vperm.xlu0 %624, %v247_v4   ;;  %v626_v5 = vld [vmem:[%s221_s5 + $0x18] sm:$0xff]   ;;  %v627_v7 = vld [vmem:[%s221_s5 + $0x10] sm:$0xff]   ;;  %v628_v9 = vld [vmem:[%s221_s5 + $0x8] sm:$0xff]  }
  0x10   : > { %575 = vmatprep.subr.bf16.mxu0 %v626_v5  ;;  %591 = vmatprep.subr.bf16.mxu1 %v626_v5  ;;  %v629_v12 = vld [vmem:[%s221_s5] sm:$0xff]   ;;  %v253_v14 = vld [vmem:[%s784_s2 + $0x30] sm:$0xff]  ;;  %v632_v15 = vld [vmem:[%s782_s0 + $0x8] sm:$0xff]  }
  0x11   : > { %576 = vmatpush3.bf16.msra.mxu0 %v626_v5  ;;  %595 = vmatpush3.bf16.msra.mxu1 %v626_v5  ;;  %v633_v16 = vld [vmem:[%s782_s0 + $0x18] sm:$0xff]  }
  0x12   : > { %577 = vmatprep.subr.bf16.mxu0 %v627_v7  ;;  %592 = vmatprep.subr.bf16.mxu1 %v627_v7 }
  0x13   : > { %272 = vperm.xlu1 %625, %v250_v6   ;;  %262 = vperm.xlu0 %624, %v248_v8  }
  0x15   : > { %578 = vmatpush3.bf16.msra.mxu0 %v627_v7  ;;  %596 = vmatpush3.bf16.msra.mxu1 %v627_v7 }
  0x16   : > { %579 = vmatprep.subr.bf16.mxu0 %v628_v9  ;;  %593 = vmatprep.subr.bf16.mxu1 %v628_v9 }
  0x17   : > { %282 = vperm.xlu1 %625, %v252_v10   ;;  %277 = vperm.xlu0 %624, %v251_v11  }
  0x19   : > { %580 = vmatpush3.bf16.msra.mxu0 %v628_v9  ;;  %597 = vmatpush3.bf16.msra.mxu1 %v628_v9 }
  0x1a   : > { %581 = vmatprep.subr.bf16.mxu0 %v629_v12  ;;  %594 = vmatprep.subr.bf16.mxu1 %v629_v12 }
  0x1b   : > { %292 = vperm.xlu1 %625, %v254_v13   ;;  %287 = vperm.xlu0 %624, %v253_v14  }
  0x1d   : > { %582 = vmatpush3.bf16.msra.mxu0 %v629_v12  ;;  %598 = vmatpush3.bf16.msra.mxu1 %v629_v12 }
  0x20   : > { %584 = vmatmul.mubr.msk.bf16.vlgmr.msra.gmra.mxu0 %vm339_vm0, %v632_v15  ;;  %588 = vmatmul.mubr.msk.bf16.vlgmr.msra.gmra.mxu1 %vm339_vm0, %v633_v16 }
  0x8a   : > { %v258_v17 = vpop.permute.xlu0 %257  ;;  %v268_v18 = vpop.permute.xlu1 %267 }
  0x8e   : > { %v263_v19 = vpop.permute.xlu0 %262  ;;  %v273_v20 = vpop.permute.xlu1 %272 }
  0x92   : > { %v278_v21 = vpop.permute.xlu0 %277  ;;  %v283_v22 = vpop.permute.xlu1 %282 }
  0x96   : > { %v288_v23 = vpop.permute.xlu0 %287  ;;  %v293_v31 = vpop.permute.xlu1 %292 }
  0xe0   : > { %v585_v24 = vpop.f32.mrf.mxu0  ;;  %v589_v25 = vpop.f32.mrf.mxu1 }
  0xe1   : > { %v395_v26 = vadd.f32 %v585_v24, %v268_v18  ;;  %v411_v27 = vadd.f32 %v589_v25, %v288_v23 }
  0xe2   : > { %v386_v29 = vpop.f32.mrf.mxu0  ;;  %v402_v30 = vpop.f32.mrf.mxu1 }
  0xe3   : > { %v428_v32 = vmin.f32 %v395_v26, 0.0  ;;  %v432_v33 = vmin.f32 %v411_v27, 0.0  ;;  %v420_v34 = vmax.f32 %v395_v26, 0.0  ;;  %v424_v35 = vmax.f32 %v411_v27, 0.0 }
  0xe4   : > { %v387_v36 = vadd.f32 %v386_v29, %v258_v17  ;;  %v403_v37 = vadd.f32 %v402_v30, %v278_v21  ;;  %v586_v38 = vpop.f32.mrf.mxu0  ;;  %v590_v39 = vpop.f32.mrf.mxu1 }
  0xe5   : > { %v437_v40 = vmul.f32 %v434_v28, %v428_v32  ;;  %v441_v41 = vmul.f32 %v434_v28, %v432_v33  ;;  %v398_v42 = vadd.f32 %v586_v38, %v273_v20  ;;  %v414_v43 = vadd.f32 %v590_v39, %v293_v31 }
  0xe6   : > { %v426_v44 = vmin.f32 %v387_v36, 0.0  ;;  %v430_v45 = vmin.f32 %v403_v37, 0.0  ;;  %v389_v46 = vpop.f32.mrf.mxu0  ;;  %v405_v47 = vpop.f32.mrf.mxu1  ;;  %v418_v50 = vmax.f32 %v387_v36, 0.0  ;;  %v422_v53 = vmax.f32 %v403_v37, 0.0 }
  0xe7   : > { %v445_v48 = vadd.f32 %v437_v40, %v420_v34  ;;  %v449_v49 = vadd.f32 %v441_v41, %v424_v35  ;;  %v429_v51 = vmin.f32 %v398_v42, 0.0  ;;  %v433_v55 = vmin.f32 %v414_v43, 0.0 }
  0xe8   : > { %v435_v52 = vmul.f32 %v434_v28, %v426_v44  ;;  %v439_v54 = vmul.f32 %v434_v28, %v430_v45  ;;  %v421_v56 = vmax.f32 %v398_v42, 0.0  ;;  %v390_v58 = vadd.f32 %v389_v46, %v263_v19 }
  0xe9   : > { %453 = vst.msk [vmem:[%s755_s29 + $0x10] sm:$0xff] %vm339_vm0, %v445_v48  ;;  %457 = vst.msk [vmem:[%s755_s29 + $0x30] sm:$0xff] %vm339_vm0, %v449_v49  ;;  %v438_v57 = vmul.f32 %v434_v28, %v429_v51  ;;  %v406_v59 = vadd.f32 %v405_v47, %v283_v22  ;;  %v425_v62 = vmax.f32 %v414_v43, 0.0  ;;  %v442_v63 = vmul.f32 %v434_v28, %v433_v55 }
  0xea   : > { %v443_v60 = vadd.f32 %v435_v52, %v418_v50  ;;  %v447_v61 = vadd.f32 %v439_v54, %v422_v53  ;;  %v427_v1 = vmin.f32 %v390_v58, 0.0  ;;  %v419_v4 = vmax.f32 %v390_v58, 0.0 }
  0xeb   : > { %v446_v0 = vadd.f32 %v438_v57, %v421_v56  ;;  %v450_v2 = vadd.f32 %v442_v63, %v425_v62  ;;  %v431_v3 = vmin.f32 %v406_v59, 0.0  ;;  %v423_v6 = vmax.f32 %v406_v59, 0.0 }
  0xec   : > { %451 = vst.msk [vmem:[%s755_s29] sm:$0xff] %vm339_vm0, %v443_v60  ;;  %455 = vst.msk [vmem:[%s755_s29 + $0x20] sm:$0xff] %vm339_vm0, %v447_v61  ;;  %v436_v5 = vmul.f32 %v434_v28, %v427_v1 }
  0xed   : > { %454 = vst.msk [vmem:[%s755_s29 + $0x18] sm:$0xff] %vm339_vm0, %v446_v0  ;;  %458 = vst.msk [vmem:[%s755_s29 + $0x38] sm:$0xff] %vm339_vm0, %v450_v2  ;;  %v440_v7 = vmul.f32 %v434_v28, %v431_v3 }
  0xee   : > { %v444_v8 = vadd.f32 %v436_v5, %v419_v4 }
  0xef   : > { %v448_v9 = vadd.f32 %v440_v7, %v423_v6 }
  0xf0   : > { %452 = vst.msk [vmem:[%s755_s29 + $0x8] sm:$0xff] %vm339_vm0, %v444_v8 }
  0xf1   : > { %456 = vst.msk [vmem:[%s755_s29 + $0x28] sm:$0xff] %vm339_vm0, %v448_v9 }
  0xf2 PF: > { %s15_s19 = sadd.s32 1, %s656_s19   ;;  %s787_s17 = smov %s652_s18 }
  0xf3   : > { %p12_p5 = scmp.ge.s32.totalorder %s15_s19, 4   ;;  %s788_s18 = smov %s790_s3 }
  0xf5   :  { %14 = sbr.rel (!%p12_p5) target bundleno = 2 (0x2), region = 66 }

// kernel: multisource_projection.21
= control target key start
LH: loop header
LB: loop body
LE: loop exit
PB: predicated region body
PF: predicated region fallthrough
CT: control target
= control target key end

     0   :  { %s994_s9 = smov 0   ;;  %s996_s10 = smov 0   ;;  %s1165_s0 = inlined_call_operand.vmem [shape: bf16[2,256,144], index: 0, kind: input, shape index: {}]   ;;  %s1166_s1 = inlined_call_operand.vmem [shape: bf16[2,144,64], index: 1, kind: input, shape index: {}]   ;;  %s1167_s2 = inlined_call_operand.vmem [shape: f32[2,256,64], index: 2, kind: output, shape index: {}]  }
   0x1   :  { %s998_s11 = smov 0  }
   0x2 LB: > { %s24_s12 = sadd.s32 1, %s972_s10  ;;  %p786_p0 = scmp.ge.s32.totalorder %s976_s11, 1  ;;  %s976_s11 = sphi %s998_s11, %s12_s11   ;;  %s972_s10 = sphi %s996_s10, %s1169_s10   ;;  %s968_s9 = sphi %s994_s9, %s1168_s9  }
   0x3   : > { %p26_p1 = scmp.ge.s32.totalorder %s24_s12, 2  ;;  %p141_p2 = scmp.lt.s32.totalorder %s976_s11, 3 }
   0x5   : > { %s1171_s12 = smov (%p26_p1, %s24_s12), 0  ;;  %p142_p3 = pnand %p786_p0, %p141_p2 }
   0x6   : > { %p174_p4 = scmp.lt.s32.totalorder (!%p142_p3), %s968_s9, 1 }
   0x7   : > { %145 = sbr.rel (%p142_p3) target bundleno = 307 (0x133), region = 28 }
   0xc   : > { %v978_v0 = vmov 0   ;;  %s1173_s9 = smov (!%p174_p4, %s968_s9), 1  ;;  %vm444_vm0 = vcmask 130048   ;;  %vm654_vm1 = vcmask 523264  }
   0xd   : > { %493 = vmatprep.subr.bf16.mxu0 %v978_v0  ;;  %853 = vmatprep.subr.bf16.mxu1 %v978_v0  ;;  %s851_s13 = sshll.u32 %s1173_s9, 8  ;;  %s871_s14 = smul.u32 72, %s1173_s9 }
   0xe   : > { %s1021_s17 = scalar_lea.vmem %s1165_s0, %s851_s13  ;;  %s1090_s23 = scalar_lea.vmem %s1167_s2, %s851_s13 }
   0xf   : > { %s1026_s20 = scalar_lea.vmem %s1166_s1, %s871_s14  ;;  %v908_v4 = vld [vmem:[%s1021_s17 + $0x4] ss:$8 sps:$4 sm:$0xff]   ;;  %v906_v12 = vld [vmem:[%s1021_s17] ss:$8 sps:$4 sm:$0xff]   ;;  %v912_v14 = vld [vmem:[%s1021_s17 + $0x14] ss:$8 sps:$4 sm:$0xff]  }
  0x10   : > { %v897_v1 = vld [vmem:[%s1026_s20 + $0x38] sm:$0xff]   ;;  %v898_v2 = vld [vmem:[%s1026_s20 + $0x30] sm:$0xff]   ;;  %v899_v3 = vld [vmem:[%s1026_s20 + $0x28] sm:$0xff]   ;;  %833 = vmatprep.mubr.msk.bf16.mxu0 %vm444_vm0, %v908_v4 }
  0x11   : > { %494 = vmatpush1.bf16.msra.mxu0 %v897_v1  ;;  %862 = vmatpush1.bf16.msra.mxu1 %v897_v1  ;;  %v900_v5 = vld [vmem:[%s1026_s20 + $0x20] sm:$0xff]   ;;  %v901_v7 = vld [vmem:[%s1026_s20 + $0x18] sm:$0xff]   ;;  %v902_v8 = vld [vmem:[%s1026_s20 + $0x10] sm:$0xff]  }
  0x12   : > { %495 = vmatprep.subr.bf16.mxu0 %v978_v0  ;;  %854 = vmatprep.subr.bf16.mxu1 %v978_v0  ;;  %v911_v6 = vld [vmem:[%s1021_s17 + $0x84] ss:$8 sps:$4 sm:$0xff]   ;;  %v909_v13 = vld [vmem:[%s1021_s17 + $0x80] ss:$8 sps:$4 sm:$0xff]   ;;  %v914_v15 = vld [vmem:[%s1021_s17 + $0x94] ss:$8 sps:$4 sm:$0xff]  }
  0x13   : > { %841 = vmatprep.mubr.msk.bf16.mxu1 %vm444_vm0, %v911_v6  ;;  %v903_v9 = vld [vmem:[%s1026_s20 + $0x8] sm:$0xff]   ;;  %v904_v10 = vld [vmem:[%s1026_s20] sm:$0xff]   ;;  %v916_v16 = vld [vmem:[%s1021_s17 + $0x10] ss:$8 sps:$4 sm:$0xff]  }
  0x14   : > { %v905_v11 = vld [vmem:[%s1026_s20 + $0x40] sm:$0xff]   ;;  %v917_v17 = vld [vmem:[%s1021_s17 + $0x90] ss:$8 sps:$4 sm:$0xff]   ;;  %v924_v22 = vld [vmem:[%s1021_s17 + $0x34] ss:$8 sps:$4 sm:$0xff]  }
  0x15   : > { %496 = vmatpush1.bf16.msra.mxu0 %v898_v2  ;;  %863 = vmatpush1.bf16.msra.mxu1 %v898_v2  ;;  %v918_v18 = vld [vmem:[%s1021_s17 + $0x24] ss:$8 sps:$4 sm:$0xff]   ;;  %v922_v20 = vld [vmem:[%s1021_s17 + $0x20] ss:$8 sps:$4 sm:$0xff]   ;;  %v926_v23 = vld [vmem:[%s1021_s17 + $0xb4] ss:$8 sps:$4 sm:$0xff]  }
  0x16   : > { %497 = vmatprep.subr.bf16.mxu0 %v978_v0  ;;  %855 = vmatprep.subr.bf16.mxu1 %v978_v0  ;;  %v920_v19 = vld [vmem:[%s1021_s17 + $0xa4] ss:$8 sps:$4 sm:$0xff]   ;;  %v923_v21 = vld [vmem:[%s1021_s17 + $0xa0] ss:$8 sps:$4 sm:$0xff]   ;;  %v928_v24 = vld [vmem:[%s1021_s17 + $0x30] ss:$8 sps:$4 sm:$0xff]  }
  0x17   : > { %v929_v25 = vld [vmem:[%s1021_s17 + $0xb0] ss:$8 sps:$4 sm:$0xff]   ;;  %v930_v26 = vld [vmem:[%s1021_s17 + $0x44] ss:$8 sps:$4 sm:$0xff]   ;;  %v934_v28 = vld [vmem:[%s1021_s17 + $0x40] ss:$8 sps:$4 sm:$0xff]  }
  0x18   : > { %v932_v27 = vld [vmem:[%s1021_s17 + $0xc4] ss:$8 sps:$4 sm:$0xff]   ;;  %v935_v29 = vld [vmem:[%s1021_s17 + $0xc0] ss:$8 sps:$4 sm:$0xff]   ;;  %v936_v30 = vld [vmem:[%s1021_s17 + $0x54] ss:$8 sps:$4 sm:$0xff]  }
  0x19   : > { %498 = vmatpush1.bf16.msra.mxu0 %v899_v3  ;;  %864 = vmatpush1.bf16.msra.mxu1 %v899_v3  ;;  %v938_v31 = vld [vmem:[%s1021_s17 + $0xd4] ss:$8 sps:$4 sm:$0xff]   ;;  %v940_v32 = vld [vmem:[%s1021_s17 + $0x50] ss:$8 sps:$4 sm:$0xff]   ;;  %v942_v34 = vld [vmem:[%s1021_s17 + $0x64] ss:$8 sps:$4 sm:$0xff]  }
  0x1a   : > { %499 = vmatprep.subr.bf16.mxu0 %v978_v0  ;;  %856 = vmatprep.subr.bf16.mxu1 %v978_v0  ;;  %v941_v33 = vld [vmem:[%s1021_s17 + $0xd0] ss:$8 sps:$4 sm:$0xff]   ;;  %v944_v35 = vld [vmem:[%s1021_s17 + $0xe4] ss:$8 sps:$4 sm:$0xff]   ;;  %v946_v36 = vld [vmem:[%s1021_s17 + $0x60] ss:$8 sps:$4 sm:$0xff]  }
  0x1b   : > { %v947_v37 = vld [vmem:[%s1021_s17 + $0xe0] ss:$8 sps:$4 sm:$0xff]   ;;  %v948_v38 = vld [vmem:[%s1021_s17 + $0x74] ss:$8 sps:$4 sm:$0xff]   ;;  %v952_v40 = vld [vmem:[%s1021_s17 + $0x70] ss:$8 sps:$4 sm:$0xff]  }
  0x1c   : > { %v950_v39 = vld [vmem:[%s1021_s17 + $0xf4] ss:$8 sps:$4 sm:$0xff]   ;;  %v953_v41 = vld [vmem:[%s1021_s17 + $0xf0] ss:$8 sps:$4 sm:$0xff]  }
  0x1d   : > { %500 = vmatpush1.bf16.msra.mxu0 %v900_v5  ;;  %865 = vmatpush1.bf16.msra.mxu1 %v900_v5 }
  0x1e   : > { %501 = vmatprep.subr.bf16.mxu0 %v978_v0  ;;  %857 = vmatprep.subr.bf16.mxu1 %v978_v0 }
  0x21   : > { %502 = vmatpush1.bf16.msra.mxu0 %v901_v7  ;;  %866 = vmatpush1.bf16.msra.mxu1 %v901_v7 }
  0x22   : > { %503 = vmatprep.subr.bf16.mxu0 %v978_v0  ;;  %858 = vmatprep.subr.bf16.mxu1 %v978_v0 }
  0x25   : > { %504 = vmatpush1.bf16.msra.mxu0 %v902_v8  ;;  %867 = vmatpush1.bf16.msra.mxu1 %v902_v8 }
  0x26   : > { %505 = vmatprep.subr.bf16.mxu0 %v978_v0  ;;  %859 = vmatprep.subr.bf16.mxu1 %v978_v0 }
  0x29   : > { %506 = vmatpush1.bf16.msra.mxu0 %v903_v9  ;;  %868 = vmatpush1.bf16.msra.mxu1 %v903_v9 }
  0x2a   : > { %507 = vmatprep.subr.bf16.mxu0 %v978_v0  ;;  %860 = vmatprep.subr.bf16.mxu1 %v978_v0 }
  0x2d   : > { %508 = vmatpush1.bf16.msra.mxu0 %v904_v10  ;;  %869 = vmatpush1.bf16.msra.mxu1 %v904_v10 }
  0x2e   : > { %523 = vmatprep.subr.bf16.mxu0 %v978_v0  ;;  %861 = vmatprep.subr.bf16.mxu1 %v978_v0 }
  0x31   : > { %524 = vmatpush2.bf16.msra.mxu0 %v905_v11  ;;  %870 = vmatpush2.bf16.msra.mxu1 %v905_v11 }
  0x34   : > { %526 = vmatmul.mubr.bf16.vlgmr.msra.gmra.mxu0 %v906_v12  ;;  %590 = vmatmul.mubr.bf16.vlgmr.msra.gmra.mxu1 %v909_v13 }
  0x35   : > { %834 = vmatprep.mubr.msk.bf16.mxu0 %vm444_vm0, %v912_v14  ;;  %842 = vmatprep.mubr.msk.bf16.mxu1 %vm444_vm0, %v914_v15 }
  0x3c   : > { %534 = vmatmul.mubr.bf16.gmra.mxu0 %v916_v16  ;;  %598 = vmatmul.mubr.bf16.gmra.mxu1 %v917_v17 }
  0x3d   : > { %835 = vmatprep.mubr.msk.bf16.mxu0 %vm444_vm0, %v918_v18  ;;  %843 = vmatprep.mubr.msk.bf16.mxu1 %vm444_vm0, %v920_v19 }
  0x44   : > { %542 = vmatmul.mubr.bf16.gmra.mxu0 %v922_v20  ;;  %606 = vmatmul.mubr.bf16.gmra.mxu1 %v923_v21 }
  0x45   : > { %836 = vmatprep.mubr.msk.bf16.mxu0 %vm444_vm0, %v924_v22  ;;  %844 = vmatprep.mubr.msk.bf16.mxu1 %vm444_vm0, %v926_v23 }
  0x4c   : > { %550 = vmatmul.mubr.bf16.gmra.mxu0 %v928_v24  ;;  %614 = vmatmul.mubr.bf16.gmra.mxu1 %v929_v25 }
  0x4d   : > { %837 = vmatprep.mubr.msk.bf16.mxu0 %vm444_vm0, %v930_v26  ;;  %845 = vmatprep.mubr.msk.bf16.mxu1 %vm444_vm0, %v932_v27 }
  0x54   : > { %558 = vmatmul.mubr.bf16.gmra.mxu0 %v934_v28  ;;  %622 = vmatmul.mubr.bf16.gmra.mxu1 %v935_v29 }
  0x55   : > { %838 = vmatprep.mubr.msk.bf16.mxu0 %vm444_vm0, %v936_v30  ;;  %846 = vmatprep.mubr.msk.bf16.mxu1 %vm444_vm0, %v938_v31 }
  0x5c   : > { %566 = vmatmul.mubr.bf16.gmra.mxu0 %v940_v32  ;;  %630 = vmatmul.mubr.bf16.gmra.mxu1 %v941_v33 }
  0x5d   : > { %839 = vmatprep.mubr.msk.bf16.mxu0 %vm444_vm0, %v942_v34  ;;  %847 = vmatprep.mubr.msk.bf16.mxu1 %vm444_vm0, %v944_v35 }
  0x64   : > { %574 = vmatmul.mubr.bf16.gmra.mxu0 %v946_v36  ;;  %638 = vmatmul.mubr.bf16.gmra.mxu1 %v947_v37 }
  0x65   : > { %840 = vmatprep.mubr.msk.bf16.mxu0 %vm444_vm0, %v948_v38  ;;  %848 = vmatprep.mubr.msk.bf16.mxu1 %vm444_vm0, %v950_v39 }
  0x6c   : > { %582 = vmatmul.mubr.bf16.gmra.mxu0 %v952_v40  ;;  %646 = vmatmul.mubr.bf16.gmra.mxu1 %v953_v41 }
  0xf4   : > { %v527_v42 = vpop.f32.mrf.mxu0  ;;  %v591_v43 = vpop.f32.mrf.mxu1 }
  0xf5   : > { %655 = vst.msk [vmem:[%s1090_s23] sm:$0xff] %vm654_vm1, %v527_v42  ;;  %671 = vst.msk [vmem:[%s1090_s23 + $0x80] sm:$0xff] %vm654_vm1, %v591_v43 }
  0xf6   : > { %v529_v44 = vpop.f32.mrf.mxu0  ;;  %v593_v45 = vpop.f32.mrf.mxu1 }
  0xf8   : > { %v530_v46 = vpop.f32.mrf.mxu0  ;;  %v594_v47 = vpop.f32.mrf.mxu1 }
  0xf9   : > { %656 = vst.msk [vmem:[%s1090_s23 + $0x8] sm:$0xff] %vm654_vm1, %v530_v46  ;;  %672 = vst.msk [vmem:[%s1090_s23 + $0x88] sm:$0xff] %vm654_vm1, %v594_v47 }
  0xfa   : > { %v532_v48 = vpop.f32.mrf.mxu0  ;;  %v596_v49 = vpop.f32.mrf.mxu1 }
  0xfc   : > { %v535_v50 = vpop.f32.mrf.mxu0  ;;  %v599_v51 = vpop.f32.mrf.mxu1 }
  0xfd   : > { %657 = vst.msk [vmem:[%s1090_s23 + $0x10] sm:$0xff] %vm654_vm1, %v535_v50  ;;  %673 = vst.msk [vmem:[%s1090_s23 + $0x90] sm:$0xff] %vm654_vm1, %v599_v51 }
  0xfe   : > { %v537_v52 = vpop.f32.mrf.mxu0  ;;  %v601_v53 = vpop.f32.mrf.mxu1 }
 0x100   : > { %v538_v54 = vpop.f32.mrf.mxu0  ;;  %v602_v55 = vpop.f32.mrf.mxu1 }
 0x101   : > { %658 = vst.msk [vmem:[%s1090_s23 + $0x18] sm:$0xff] %vm654_vm1, %v538_v54  ;;  %674 = vst.msk [vmem:[%s1090_s23 + $0x98] sm:$0xff] %vm654_vm1, %v602_v55 }
 0x102   : > { %v540_v56 = vpop.f32.mrf.mxu0  ;;  %v604_v57 = vpop.f32.mrf.mxu1 }
 0x104   : > { %v543_v58 = vpop.f32.mrf.mxu0  ;;  %v607_v59 = vpop.f32.mrf.mxu1 }
 0x105   : > { %659 = vst.msk [vmem:[%s1090_s23 + $0x20] sm:$0xff] %vm654_vm1, %v543_v58  ;;  %675 = vst.msk [vmem:[%s1090_s23 + $0xa0] sm:$0xff] %vm654_vm1, %v607_v59 }
 0x106   : > { %v545_v60 = vpop.f32.mrf.mxu0  ;;  %v609_v61 = vpop.f32.mrf.mxu1 }
 0x108   : > { %v546_v62 = vpop.f32.mrf.mxu0  ;;  %v610_v63 = vpop.f32.mrf.mxu1 }
 0x109   : > { %660 = vst.msk [vmem:[%s1090_s23 + $0x28] sm:$0xff] %vm654_vm1, %v546_v62  ;;  %676 = vst.msk [vmem:[%s1090_s23 + $0xa8] sm:$0xff] %vm654_vm1, %v610_v63 }
 0x10a   : > { %v548_v0 = vpop.f32.mrf.mxu0  ;;  %v612_v1 = vpop.f32.mrf.mxu1 }
 0x10c   : > { %v551_v2 = vpop.f32.mrf.mxu0  ;;  %v615_v3 = vpop.f32.mrf.mxu1 }
 0x10d   : > { %661 = vst.msk [vmem:[%s1090_s23 + $0x30] sm:$0xff] %vm654_vm1, %v551_v2  ;;  %677 = vst.msk [vmem:[%s1090_s23 + $0xb0] sm:$0xff] %vm654_vm1, %v615_v3 }
 0x10e   : > { %v553_v4 = vpop.f32.mrf.mxu0  ;;  %v617_v5 = vpop.f32.mrf.mxu1 }
 0x110   : > { %v554_v6 = vpop.f32.mrf.mxu0  ;;  %v618_v7 = vpop.f32.mrf.mxu1 }
 0x111   : > { %662 = vst.msk [vmem:[%s1090_s23 + $0x38] sm:$0xff] %vm654_vm1, %v554_v6  ;;  %678 = vst.msk [vmem:[%s1090_s23 + $0xb8] sm:$0xff] %vm654_vm1, %v618_v7 }
 0x112   : > { %v556_v8 = vpop.f32.mrf.mxu0  ;;  %v620_v9 = vpop.f32.mrf.mxu1 }
 0x114   : > { %v559_v10 = vpop.f32.mrf.mxu0  ;;  %v623_v11 = vpop.f32.mrf.mxu1 }
 0x115   : > { %663 = vst.msk [vmem:[%s1090_s23 + $0x40] sm:$0xff] %vm654_vm1, %v559_v10  ;;  %679 = vst.msk [vmem:[%s1090_s23 + $0xc0] sm:$0xff] %vm654_vm1, %v623_v11 }
 0x116   : > { %v561_v12 = vpop.f32.mrf.mxu0  ;;  %v625_v13 = vpop.f32.mrf.mxu1 }
 0x118   : > { %v562_v14 = vpop.f32.mrf.mxu0  ;;  %v626_v15 = vpop.f32.mrf.mxu1 }
 0x119   : > { %664 = vst.msk [vmem:[%s1090_s23 + $0x48] sm:$0xff] %vm654_vm1, %v562_v14  ;;  %680 = vst.msk [vmem:[%s1090_s23 + $0xc8] sm:$0xff] %vm654_vm1, %v626_v15 }
 0x11a   : > { %v564_v16 = vpop.f32.mrf.mxu0  ;;  %v628_v17 = vpop.f32.mrf.mxu1 }
 0x11c   : > { %v567_v18 = vpop.f32.mrf.mxu0  ;;  %v631_v19 = vpop.f32.mrf.mxu1 }
 0x11d   : > { %665 = vst.msk [vmem:[%s1090_s23 + $0x50] sm:$0xff] %vm654_vm1, %v567_v18  ;;  %681 = vst.msk [vmem:[%s1090_s23 + $0xd0] sm:$0xff] %vm654_vm1, %v631_v19 }
 0x11e   : > { %v569_v20 = vpop.f32.mrf.mxu0  ;;  %v633_v21 = vpop.f32.mrf.mxu1 }
 0x120   : > { %v570_v22 = vpop.f32.mrf.mxu0  ;;  %v634_v23 = vpop.f32.mrf.mxu1 }
 0x121   : > { %666 = vst.msk [vmem:[%s1090_s23 + $0x58] sm:$0xff] %vm654_vm1, %v570_v22  ;;  %682 = vst.msk [vmem:[%s1090_s23 + $0xd8] sm:$0xff] %vm654_vm1, %v634_v23 }
 0x122   : > { %v572_v24 = vpop.f32.mrf.mxu0  ;;  %v636_v25 = vpop.f32.mrf.mxu1 }
 0x124   : > { %v575_v26 = vpop.f32.mrf.mxu0  ;;  %v639_v27 = vpop.f32.mrf.mxu1 }
 0x125   : > { %667 = vst.msk [vmem:[%s1090_s23 + $0x60] sm:$0xff] %vm654_vm1, %v575_v26  ;;  %683 = vst.msk [vmem:[%s1090_s23 + $0xe0] sm:$0xff] %vm654_vm1, %v639_v27 }
 0x126   : > { %v577_v28 = vpop.f32.mrf.mxu0  ;;  %v641_v29 = vpop.f32.mrf.mxu1 }
 0x128   : > { %v578_v30 = vpop.f32.mrf.mxu0  ;;  %v642_v31 = vpop.f32.mrf.mxu1 }
 0x129   : > { %668 = vst.msk [vmem:[%s1090_s23 + $0x68] sm:$0xff] %vm654_vm1, %v578_v30  ;;  %684 = vst.msk [vmem:[%s1090_s23 + $0xe8] sm:$0xff] %vm654_vm1, %v642_v31 }
 0x12a   : > { %v580_v32 = vpop.f32.mrf.mxu0  ;;  %v644_v33 = vpop.f32.mrf.mxu1 }
 0x12c   : > { %v583_v34 = vpop.f32.mrf.mxu0  ;;  %v647_v35 = vpop.f32.mrf.mxu1 }
 0x12d   : > { %669 = vst.msk [vmem:[%s1090_s23 + $0x70] sm:$0xff] %vm654_vm1, %v583_v34  ;;  %685 = vst.msk [vmem:[%s1090_s23 + $0xf0] sm:$0xff] %vm654_vm1, %v647_v35 }
 0x12e   : > { %v585_v36 = vpop.f32.mrf.mxu0  ;;  %v649_v37 = vpop.f32.mrf.mxu1 }
 0x130   : > { %v586_v38 = vpop.f32.mrf.mxu0  ;;  %v650_v39 = vpop.f32.mrf.mxu1 }
 0x131   : > { %670 = vst.msk [vmem:[%s1090_s23 + $0x78] sm:$0xff] %vm654_vm1, %v586_v38  ;;  %686 = vst.msk [vmem:[%s1090_s23 + $0xf8] sm:$0xff] %vm654_vm1, %v650_v39 }
 0x132   : > { %v588_v40 = vpop.f32.mrf.mxu0  ;;  %v652_v41 = vpop.f32.mrf.mxu1 }
 0x133 PF: > { %s12_s11 = sadd.s32 1, %s976_s11   ;;  %s1168_s9 = smov %s972_s10 }
 0x134   : > { %p9_p5 = scmp.ge.s32.totalorder %s12_s11, 4   ;;  %s1169_s10 = smov %s1171_s12 }
 0x136   :  { %11 = sbr.rel (!%p9_p5) target bundleno = 2 (0x2), region = 61 }

// kernel: multisource_projection.15
= control target key start
LH: loop header
LB: loop body
LE: loop exit
PB: predicated region body
PF: predicated region fallthrough
CT: control target
= control target key end

     0   :  { %s834_s12 = smov 0   ;;  %s916_s0 = inlined_call_operand.vmem [shape: f32[2,64,32], index: 0, kind: input, shape index: {}]   ;;  %s917_s1 = inlined_call_operand.vmem [shape: f32[2,32,64], index: 1, kind: input, shape index: {}]   ;;  %s918_s2 = inlined_call_operand.vmem [shape: f32[2,64,64], index: 2, kind: input, shape index: {}]   ;;  %s919_s3 = inlined_call_operand.vmem [shape: f32[2,64,64], index: 3, kind: output, shape index: {}]  }
   0x1 LB: > { %s653_s13 = sadd.s32 4294967295, %s812_s12   ;;  %p657_p0 = scmp.ge.s32.totalorder %s812_s12, 1  ;;  %s812_s12 = sphi %s834_s12, %s13_s12  }
   0x2   : > { %p157_p1 = scmp.lt.s32.totalorder %s812_s12, 3 }
   0x4   : > { %p158_p2 = pnand %p657_p0, %p157_p1 }
   0x5   : > { %p191_p3 = scmp.lt.s32.totalorder (!%p158_p2), %s653_s13, 1 }
   0x6   : > { %161 = sbr.rel (%p158_p2) target bundleno = 531 (0x213), region = 32 }
   0xb   : > { %s921_s13 = smov (!%p191_p3, %s653_s13), 1  ;;  %vm223_vm0 = vcmask 261120   ;;  %vm353_vm1 = vcmask 523264  }
   0xc   : > { %s842_s14 = sshll.u32 %s921_s13, 6  ;;  %s685_s15 = sshll.u32 %s921_s13, 5 }
   0xd   : > { %s195_s18 = scalar_lea.vmem %s916_s0, %s842_s14  ;;  %s200_s21 = scalar_lea.vmem %s917_s1, %s685_s15 }
   0xe   : > { %v222_v0 = vld [vmem:[%s200_s21 + $0x18] sm:$0xff]  ;;  %v221_v1 = vld [vmem:[%s200_s21 + $0x10] sm:$0xff]  ;;  %v211_v2 = vld [vmem:[%s195_s18] sm:$0xff]  ;;  %s863_s24 = scalar_lea.vmem %s918_s2, %s842_s14  ;;  %s210_s27 = scalar_lea.vmem %s919_s3, %s842_s14 }
   0xf   : > { %716 = vmatprep.subr.mxu0 %v222_v0  ;;  %v220_v3 = vld [vmem:[%s200_s21 + $0x8] sm:$0xff]  ;;  %724 = vmatprep.mubr.msk.f32.mxu0 %vm223_vm0, %v211_v2  ;;  %v219_v4 = vld [vmem:[%s200_s21] sm:$0xff]  ;;  %v213_v6 = vld [vmem:[%s195_s18 + $0x10] sm:$0xff] }
  0x10   : > { %717 = vmatpush3.msra.mxu0 %v222_v0  ;;  %v212_v5 = vld [vmem:[%s195_s18 + $0x8] sm:$0xff]  ;;  %v214_v7 = vld [vmem:[%s195_s18 + $0x18] sm:$0xff]  ;;  %v215_v8 = vld [vmem:[%s195_s18 + $0x20] sm:$0xff] }
  0x11   : > { %718 = vmatprep.subr.mxu0 %v221_v1  ;;  %v216_v9 = vld [vmem:[%s195_s18 + $0x28] sm:$0xff]  ;;  %v217_v10 = vld [vmem:[%s195_s18 + $0x30] sm:$0xff]  ;;  %v218_v11 = vld [vmem:[%s195_s18 + $0x38] sm:$0xff] }
  0x12   : > { %719 = vmatpush3.msra.mxu0 %v221_v1  ;;  %v431_v12 = vld [vmem:[%s863_s24 + $0x10] sm:$0xff]  ;;  %v429_v13 = vld [vmem:[%s863_s24] sm:$0xff] }
  0x13   : > { %720 = vmatprep.subr.mxu0 %v220_v3  ;;  %755 = vmatprep.mubr.msk.f32.mxu1 %vm353_vm1, %v431_v12 }
  0x14   : > { %721 = vmatpush3.msra.mxu0 %v220_v3 }
  0x15   : > { %722 = vmatprep.subr.mxu0 %v219_v4 }
  0x16   : > { %723 = vmatpush3.msra.mxu0 %v219_v4 }
  0x17   : > { %725 = vmatmul.mubr.msk.f32.vlgmr.msra.gmra.mxu0 %vm223_vm0, %v212_v5 }
  0x18   : > { %727 = vmatprep.mubr.msk.f32.mxu0 %vm223_vm0, %v213_v6 }
  0x1b   : > { %728 = vmatmul.mubr.msk.f32.gmra.mxu0 %vm223_vm0, %v214_v7 }
  0x1c   : > { %730 = vmatprep.mubr.msk.f32.mxu0 %vm223_vm0, %v215_v8 }
  0x1f   : > { %731 = vmatmul.mubr.msk.f32.gmra.mxu0 %vm223_vm0, %v216_v9 }
  0x20   : > { %733 = vmatprep.mubr.msk.f32.mxu0 %vm223_vm0, %v217_v10 }
  0x23   : > { %734 = vmatmul.mubr.msk.f32.gmra.mxu0 %vm223_vm0, %v218_v11 }
  0x24   : > { %752 = vmatprep.mubr.msk.f32.mxu0 %vm353_vm1, %v429_v13 }
  0xd7   : > { %v726_v14 = vpop.f32.mrf.mxu0 }
  0xd8   : > { %v355_v27 = vsel %vm353_vm1, %v726_v14, -inf }
  0xd9   : > { %v314_v15 = vpop.f32.mrf.mxu0 }
  0xda   : > { %v354_v22 = vsel %vm353_vm1, %v314_v15, -inf }
  0xdb   : > { %v729_v16 = vpop.f32.mrf.mxu0 }
  0xdc   : > { %v357_v28 = vsel %vm353_vm1, %v729_v16, -inf }
  0xdd   : > { %v324_v17 = vpop.f32.mrf.mxu0 }
  0xde   : > { %v356_v29 = vsel %vm353_vm1, %v324_v17, -inf }
  0xdf   : > { %v732_v18 = vpop.f32.mrf.mxu0 }
  0xe0   : > { %v360_v23 = vsel %vm353_vm1, %v732_v18, -inf }
  0xe1   : > { %v334_v19 = vpop.f32.mrf.mxu0  ;;  %v361_v31 = vmax.f32 %v355_v27, %v360_v23 }
  0xe2   : > { %v358_v20 = vsel %vm353_vm1, %v334_v19, -inf }
  0xe3   : > { %v735_v21 = vpop.f32.mrf.mxu0  ;;  %v359_v25 = vmax.f32 %v354_v22, %v358_v20 }
  0xe4   : > { %v364_v24 = vsel %vm353_vm1, %v735_v21, -inf }
  0xe5   : > { %v344_v26 = vpop.f32.mrf.mxu0  ;;  %v365_v32 = vmax.f32 %v357_v28, %v364_v24  ;;  %v366_v34 = vmax.f32 %v359_v25, %v361_v31 }
  0xe6   : > { %v362_v30 = vsel %vm353_vm1, %v344_v26, -inf }
  0xe7   : > { %v363_v33 = vmax.f32 %v356_v29, %v362_v30 }
  0xe9   : > { %v367_v35 = vmax.f32 %v363_v33, %v365_v32  ;;  %v432_v33 = vld [vmem:[%s863_s24 + $0x18] sm:$0xff] }
  0xeb   : > { %v368_v36 = vmax.f32 %v366_v34, %v367_v35  ;;  %v430_v34 = vld [vmem:[%s863_s24 + $0x8] sm:$0xff]  ;;  %v433_v35 = vld [vmem:[%s863_s24 + $0x20] sm:$0xff] }
  0xed   : > { %v369_v37 = vrot.slane %v368_v36, 4 }
  0xef   : > { %v370_v38 = vmax.f32 %v368_v36, %v369_v37  ;;  %v434_v36 = vld [vmem:[%s863_s24 + $0x28] sm:$0xff]  ;;  %v435_v37 = vld [vmem:[%s863_s24 + $0x30] sm:$0xff] }
  0xf1   : > { %v371_v39 = vrot.slane %v370_v38, 2 }
  0xf3   : > { %v372_v40 = vmax.f32 %v370_v38, %v371_v39  ;;  %v436_v38 = vld [vmem:[%s863_s24 + $0x38] sm:$0xff] }
  0xf5   : > { %v373_v41 = vrot.slane %v372_v40, 1 }
  0xf7   : > { %v374_v42 = vmax.f32 %v372_v40, %v373_v41 }
  0xf9   : > { %v375_v43 = vsub.f32 %v314_v15, %v374_v42  ;;  %v376_v44 = vsub.f32 %v726_v14, %v374_v42  ;;  %v377_v45 = vsub.f32 %v324_v17, %v374_v42  ;;  %v378_v46 = vsub.f32 %v729_v16, %v374_v42 }
  0xfa   : > { %v379_v47 = vsub.f32 %v334_v19, %v374_v42  ;;  %v380_v51 = vsub.f32 %v732_v18, %v374_v42  ;;  %v381_v53 = vsub.f32 %v344_v26, %v374_v42  ;;  %v382_v55 = vsub.f32 %v735_v21, %v374_v42 }
  0xfb   : > { %v383_v48 = vmul.f32 1.442695, %v375_v43  ;;  %v385_v49 = vmul.f32 1.442695, %v376_v44  ;;  %v387_v50 = vmul.f32 1.442695, %v377_v45 }
  0xfc   : > { %v389_v52 = vmul.f32 1.442695, %v378_v46  ;;  %v391_v54 = vmul.f32 1.442695, %v379_v47  ;;  %v393_v56 = vmul.f32 1.442695, %v380_v51 }
  0xfd   : > { %788 = vpow2.f32 %v383_v48  ;;  %v395_v57 = vmul.f32 1.442695, %v381_v53  ;;  %v397_v58 = vmul.f32 1.442695, %v382_v55 }
  0xfe   : > { %790 = vpow2.f32 %v385_v49 }
  0xff   : > { %792 = vpow2.f32 %v387_v50 }
 0x100   : > { %794 = vpow2.f32 %v389_v52 }
 0x101   : > { %796 = vpow2.f32 %v391_v54 }
 0x102   : > { %798 = vpow2.f32 %v393_v56 }
 0x103   : > { %800 = vpow2.f32 %v395_v57 }
 0x104   : > { %802 = vpow2.f32 %v397_v58 }
 0x10a   : > { %v877_v59 = vpop.eup %788 }
 0x10b   : > { %v791_v60 = vpop.eup %790  ;;  %v399_v61 = vsel %vm353_vm1, %v877_v59, 0.0 }
 0x10c   : > { %v793_v62 = vpop.eup %792  ;;  %v400_v63 = vsel %vm353_vm1, %v791_v60, 0.0 }
 0x10d   : > { %v795_v0 = vpop.eup %794  ;;  %v401_v1 = vadd.f32 %v400_v63, %v399_v61  ;;  %v402_v2 = vsel %vm353_vm1, %v793_v62, 0.0 }
 0x10e   : > { %v797_v3 = vpop.eup %796  ;;  %v404_v5 = vsel %vm353_vm1, %v795_v0, 0.0 }
 0x10f   : > { %v403_v4 = vadd.f32 %v402_v2, %v401_v1  ;;  %v799_v6 = vpop.eup %798  ;;  %v406_v8 = vsel %vm353_vm1, %v797_v3, 0.0 }
 0x110   : > { %v801_v9 = vpop.eup %800  ;;  %v408_v11 = vsel %vm353_vm1, %v799_v6, 0.0 }
 0x111   : > { %v405_v7 = vadd.f32 %v404_v5, %v403_v4  ;;  %v803_v12 = vpop.eup %802  ;;  %v410_v14 = vsel %vm353_vm1, %v801_v9, 0.0 }
 0x112   : > { %v412_v16 = vsel %vm353_vm1, %v803_v12, 0.0 }
 0x113   : > { %v407_v10 = vadd.f32 %v406_v8, %v405_v7 }
 0x115   : > { %v409_v13 = vadd.f32 %v408_v11, %v407_v10 }
 0x117   : > { %v411_v15 = vadd.f32 %v410_v14, %v409_v13 }
 0x119   : > { %v413_v17 = vadd.f32 %v412_v16, %v411_v15 }
 0x11b   : > { %v414_v18 = vrot.slane %v413_v17, 4 }
 0x11d   : > { %v415_v19 = vadd.f32 %v414_v18, %v413_v17 }
 0x11f   : > { %v416_v20 = vrot.slane %v415_v19, 2 }
 0x121   : > { %v417_v21 = vadd.f32 %v416_v20, %v415_v19 }
 0x123   : > { %v418_v22 = vrot.slane %v417_v21, 1 }
 0x125   : > { %v419_v23 = vadd.f32 %v418_v22, %v417_v21 }
 0x127   : > { %804 = vrcp.f32 %v419_v23 }
 0x134   : > { %v805_v24 = vpop.eup %804 }
 0x135   : > { %v428_v25 = vmul.f32 %v805_v24, %v803_v12  ;;  %v427_v26 = vmul.f32 %v805_v24, %v801_v9  ;;  %v426_v27 = vmul.f32 %v805_v24, %v799_v6  ;;  %v425_v28 = vmul.f32 %v805_v24, %v797_v3 }
 0x136   : > { %v424_v29 = vmul.f32 %v805_v24, %v795_v0  ;;  %v423_v30 = vmul.f32 %v805_v24, %v793_v62  ;;  %v422_v31 = vmul.f32 %v805_v24, %v791_v60  ;;  %v421_v32 = vmul.f32 %v805_v24, %v877_v59 }
 0x137   : > { %736 = vmatprep.subr.mxu0 %v428_v25  ;;  %764 = vmatprep.subr.mxu1 %v428_v25 }
 0x138   : > { %737 = vmatpush3.msra.mxu0 %v428_v25  ;;  %772 = vmatpush3.msra.mxu1 %v428_v25 }
 0x139   : > { %738 = vmatprep.subr.mxu0 %v427_v26  ;;  %765 = vmatprep.subr.mxu1 %v427_v26 }
 0x13a   : > { %739 = vmatpush3.msra.mxu0 %v427_v26  ;;  %773 = vmatpush3.msra.mxu1 %v427_v26 }
 0x13b   : > { %740 = vmatprep.subr.mxu0 %v426_v27  ;;  %766 = vmatprep.subr.mxu1 %v426_v27 }
 0x13c   : > { %741 = vmatpush3.msra.mxu0 %v426_v27  ;;  %774 = vmatpush3.msra.mxu1 %v426_v27 }
 0x13d   : > { %742 = vmatprep.subr.mxu0 %v425_v28  ;;  %767 = vmatprep.subr.mxu1 %v425_v28 }
 0x13e   : > { %743 = vmatpush3.msra.mxu0 %v425_v28  ;;  %775 = vmatpush3.msra.mxu1 %v425_v28 }
 0x13f   : > { %744 = vmatprep.subr.mxu0 %v424_v29  ;;  %768 = vmatprep.subr.mxu1 %v424_v29 }
 0x140   : > { %745 = vmatpush3.msra.mxu0 %v424_v29  ;;  %776 = vmatpush3.msra.mxu1 %v424_v29 }
 0x141   : > { %746 = vmatprep.subr.mxu0 %v423_v30  ;;  %769 = vmatprep.subr.mxu1 %v423_v30 }
 0x142   : > { %747 = vmatpush3.msra.mxu0 %v423_v30  ;;  %777 = vmatpush3.msra.mxu1 %v423_v30 }
 0x143   : > { %748 = vmatprep.subr.mxu0 %v422_v31  ;;  %770 = vmatprep.subr.mxu1 %v422_v31 }
 0x144   : > { %749 = vmatpush3.msra.mxu0 %v422_v31  ;;  %778 = vmatpush3.msra.mxu1 %v422_v31 }
 0x145   : > { %750 = vmatprep.subr.mxu0 %v421_v32  ;;  %771 = vmatprep.subr.mxu1 %v421_v32 }
 0x146   : > { %751 = vmatpush3.msra.mxu0 %v421_v32  ;;  %779 = vmatpush3.msra.mxu1 %v421_v32 }
 0x147   : > { %756 = vmatmul.mubr.msk.f32.vlgmr.msra.gmra.mxu1 %vm353_vm1, %v432_v33  ;;  %753 = vmatmul.mubr.msk.f32.vlgmr.msra.gmra.mxu0 %vm353_vm1, %v430_v34 }
 0x148   : > { %758 = vmatprep.mubr.msk.f32.mxu1 %vm353_vm1, %v433_v35 }
 0x14b   : > { %759 = vmatmul.mubr.msk.f32.gmra.mxu1 %vm353_vm1, %v434_v36 }
 0x14c   : > { %761 = vmatprep.mubr.msk.f32.mxu1 %vm353_vm1, %v435_v37 }
 0x14f   : > { %762 = vmatmul.mubr.msk.f32.gmra.mxu1 %vm353_vm1, %v436_v38 }
 0x207   : > { %v757_v39 = vpop.f32.mrf.mxu1  ;;  %v754_v40 = vpop.f32.mrf.mxu0 }
 0x208   : > { %569 = vst.msk [vmem:[%s210_s27 + $0x18] sm:$0xff] %vm353_vm1, %v757_v39  ;;  %567 = vst.msk [vmem:[%s210_s27 + $0x8] sm:$0xff] %vm353_vm1, %v754_v40 }
 0x209   : > { %v537_v41 = vpop.f32.mrf.mxu1  ;;  %v527_v42 = vpop.f32.mrf.mxu0 }
 0x20a   : > { %568 = vst.msk [vmem:[%s210_s27 + $0x10] sm:$0xff] %vm353_vm1, %v537_v41  ;;  %566 = vst.msk [vmem:[%s210_s27] sm:$0xff] %vm353_vm1, %v527_v42 }
 0x20b   : > { %v760_v43 = vpop.f32.mrf.mxu1 }
 0x20c   : > { %571 = vst.msk [vmem:[%s210_s27 + $0x28] sm:$0xff] %vm353_vm1, %v760_v43 }
 0x20d   : > { %v547_v44 = vpop.f32.mrf.mxu1 }
 0x20e   : > { %570 = vst.msk [vmem:[%s210_s27 + $0x20] sm:$0xff] %vm353_vm1, %v547_v44 }
 0x20f   : > { %v763_v45 = vpop.f32.mrf.mxu1 }
 0x210   : > { %573 = vst.msk [vmem:[%s210_s27 + $0x38] sm:$0xff] %vm353_vm1, %v763_v45 }
 0x211   : > { %v557_v46 = vpop.f32.mrf.mxu1 }
 0x212   : > { %572 = vst.msk [vmem:[%s210_s27 + $0x30] sm:$0xff] %vm353_vm1, %v557_v46 }
 0x213 PF: > { %s13_s12 = sadd.s32 1, %s812_s12  }
 0x214   : > { %p10_p4 = scmp.ge.s32.totalorder %s13_s12, 4  }
 0x216   :  { %12 = sbr.rel (!%p10_p4) target bundleno = 1 (0x1), region = 68 }

// kernel: multisource_projection.16
= control target key start
LH: loop header
LB: loop body
LE: loop exit
PB: predicated region body
PF: predicated region fallthrough
CT: control target
= control target key end

     0   :  { %s2656_s17 = smov 0   ;;  %s2658_s18 = smov 0   ;;  %s3489_s0 = inlined_call_operand.vmem [shape: bf16[256,576], index: 0, kind: input, shape index: {}]   ;;  %s3490_s1 = inlined_call_operand.vmem [shape: bf16[2,576,64], index: 1, kind: input, shape index: {}]   ;;  %s3491_s2 = inlined_call_operand.vmem [shape: f32[256,1], index: 2, kind: input, shape index: {}]   ;;  %s3492_s3 = inlined_call_operand.<no memory space> [shape: f32[1], index: 3, kind: input, shape index: {}]   ;;  %s3493_s4 = inlined_call_operand.vmem [shape: f32[2,256,64], index: 4, kind: output, shape index: {}]  }
   0x1   :  { %9 = sst [smem:[#allocation2]] %s3492_s3  ;;  %s2660_s19 = smov 0  }
   0x2 LB: > { %s27_s3 = sadd.s32 1, %s2621_s18  ;;  %p1988_p0 = scmp.ge.s32.totalorder %s2625_s19, 1  ;;  %s2625_s19 = sphi %s2660_s19, %s15_s19   ;;  %s2621_s18 = sphi %s2658_s18, %s3555_s18   ;;  %s2617_s17 = sphi %s2656_s17, %s3554_s17  }
   0x3   : > { %p29_p1 = scmp.ge.s32.totalorder %s27_s3, 2  ;;  %p182_p2 = scmp.lt.s32.totalorder %s2625_s19, 3 }
   0x5   : > { %s3557_s3 = smov (%p29_p1, %s27_s3), 0  ;;  %p183_p3 = pnand %p1988_p0, %p182_p2 }
   0x7   : > { %186 = sbr.rel (%p183_p3) target bundleno = 415 (0x19f), region = 36 }
   0xc   : > { %p214_p4 = scmp.lt.s32.totalorder %s2617_s17, 1  ;;  %v2473_v0 = vld [vmem:[%s3489_s0 + $0x4] ss:$20 sps:$4 sm:$0xff]   ;;  %v2627_v1 = vmov 0   ;;  %v2471_v21 = vld [vmem:[%s3489_s0] ss:$20 sps:$4 sm:$0xff]  }
   0xd   : > { %2453 = vset.pattern.permute.xlu0 %v2627_v1  ;;  %2454 = vset.pattern.permute.xlu1 %v2627_v1  ;;  %v2476_v2 = vld [vmem:[%s3489_s0 + $0x1e4] ss:$20 sps:$4 sm:$0xff]   ;;  %v2474_v22 = vld [vmem:[%s3489_s0 + $0x1e0] ss:$20 sps:$4 sm:$0xff]   ;;  %v2486_v30 = vld [vmem:[%s3489_s0 + $0x28] ss:$20 sps:$4 sm:$0xff]  }
   0xe   : > { %s3559_s17 = smov (!%p214_p4, %s2617_s17), 1  ;;  %1288 = vmatprep.mubr.bf16.mxu0 %v2473_v0  ;;  %1384 = vmatprep.mubr.bf16.mxu1 %v2476_v2  ;;  %v2482_v25 = vld [vmem:[%s3489_s0 + $0x2c] ss:$20 sps:$4 sm:$0xff]   ;;  %v2487_v31 = vld [vmem:[%s3489_s0 + $0x208] ss:$20 sps:$4 sm:$0xff]   ;;  %v401_v34 = vld [vmem:[%s3491_s2 + $0x10] sm:$0xff] }
   0xf   : > { %s2427_s24 = smul.u32 288, %s3559_s17  ;;  %v2484_v27 = vld [vmem:[%s3489_s0 + $0x20c] ss:$20 sps:$4 sm:$0xff]   ;;  %v2492_v33 = vld [vmem:[%s3489_s0 + $0x54] ss:$20 sps:$4 sm:$0xff]   ;;  %443 = vperm.xlu1 %2454, %v401_v34   ;;  %v402_v39 = vld [vmem:[%s3491_s2 + $0x18] sm:$0xff] }
  0x10   : > { %v399_v28 = vld [vmem:[%s3491_s2] sm:$0xff]  ;;  %v400_v35 = vld [vmem:[%s3491_s2 + $0x8] sm:$0xff]  ;;  %v405_v47 = vld [vmem:[%s3491_s2 + $0x30] sm:$0xff]  ;;  %vm1207_vm0 = vcmask 523264   ;;  %s1739_s20 = sld [smem:[#allocation2]]  ;;  %s2126_s21 = sshll.u32 %s3559_s17, 8 }
  0x11   : > { %s2686_s27 = scalar_lea.vmem %s3490_s1, %s2427_s24  ;;  %433 = vperm.xlu0 %2453, %v399_v28   ;;  %v2494_v38 = vld [vmem:[%s3489_s0 + $0x234] ss:$20 sps:$4 sm:$0xff]   ;;  %v403_v40 = vld [vmem:[%s3491_s2 + $0x20] sm:$0xff]  ;;  %v2502_v48 = vld [vmem:[%s3489_s0 + $0x7c] ss:$20 sps:$4 sm:$0xff]   ;;  %s3267_s23 = scalar_lea.vmem %s3493_s4, %s2126_s21 }
  0x12   : > { %v2455_v3 = vld [vmem:[%s2686_s27 + $0x78] sm:$0xff]   ;;  %v2457_v5 = vld [vmem:[%s2686_s27 + $0x70] sm:$0xff]   ;;  %v2459_v7 = vld [vmem:[%s2686_s27 + $0x68] sm:$0xff]  }
  0x13   : > { %v2456_v4 = vld [vmem:[%s2686_s27 + $0x38] sm:$0xff]   ;;  %2127 = vmatprep.subr.bf16.mxu0 %v2455_v3  ;;  %2411 = vmatprep.subr.bf16.mxu1 %v2455_v3  ;;  %v2458_v6 = vld [vmem:[%s2686_s27 + $0x30] sm:$0xff]   ;;  %v2460_v8 = vld [vmem:[%s2686_s27 + $0x28] sm:$0xff]  }
  0x14   : > { %2128 = vmatpush3.bf16.msra.mxu0 %v2456_v4  ;;  %2419 = vmatpush3.bf16.msra.mxu1 %v2456_v4  ;;  %v2461_v9 = vld [vmem:[%s2686_s27 + $0x60] sm:$0xff]   ;;  %v2463_v11 = vld [vmem:[%s2686_s27 + $0x58] sm:$0xff]   ;;  %v2465_v13 = vld [vmem:[%s2686_s27 + $0x50] sm:$0xff]  }
  0x15   : > { %2129 = vmatprep.subr.bf16.mxu0 %v2457_v5  ;;  %2412 = vmatprep.subr.bf16.mxu1 %v2457_v5  ;;  %v2462_v10 = vld [vmem:[%s2686_s27 + $0x20] sm:$0xff]   ;;  %v2464_v12 = vld [vmem:[%s2686_s27 + $0x18] sm:$0xff]   ;;  %v2466_v14 = vld [vmem:[%s2686_s27 + $0x10] sm:$0xff]  }
  0x16   : > { %v2467_v15 = vld [vmem:[%s2686_s27 + $0x48] sm:$0xff]   ;;  %v2469_v17 = vld [vmem:[%s2686_s27 + $0x40] sm:$0xff]   ;;  %v2477_v19 = vld [vmem:[%s2686_s27 + $0xf8] sm:$0xff]   ;;  %438 = vperm.xlu0 %2453, %v400_v35   ;;  %448 = vperm.xlu1 %2454, %v402_v39  }
  0x17   : > { %v2468_v16 = vld [vmem:[%s2686_s27 + $0x8] sm:$0xff]   ;;  %v2470_v18 = vld [vmem:[%s2686_s27] sm:$0xff]   ;;  %v2480_v20 = vld [vmem:[%s2686_s27 + $0x118] sm:$0xff]  }
  0x18   : > { %2130 = vmatpush3.bf16.msra.mxu0 %v2458_v6  ;;  %2420 = vmatpush3.bf16.msra.mxu1 %v2458_v6  ;;  %v2478_v23 = vld [vmem:[%s2686_s27 + $0xb8] sm:$0xff]   ;;  %v2479_v24 = vld [vmem:[%s2686_s27 + $0xf0] sm:$0xff]   ;;  %v2488_v29 = vld [vmem:[%s2686_s27 + $0xe8] sm:$0xff]  }
  0x19   : > { %2131 = vmatprep.subr.bf16.mxu0 %v2459_v7  ;;  %2413 = vmatprep.subr.bf16.mxu1 %v2459_v7  ;;  %v2481_v26 = vld [vmem:[%s2686_s27 + $0xb0] sm:$0xff]   ;;  %v2489_v36 = vld [vmem:[%s2686_s27 + $0xa8] sm:$0xff]   ;;  %v2490_v37 = vld [vmem:[%s2686_s27 + $0xe0] sm:$0xff]  }
  0x1a   : > { %v2511_v32 = vld [vmem:[%s2686_s27 + $0x110] sm:$0xff]   ;;  %v2491_v41 = vld [vmem:[%s2686_s27 + $0xa0] sm:$0xff]   ;;  %v2498_v42 = vld [vmem:[%s2686_s27 + $0xd8] sm:$0xff]   ;;  %453 = vperm.xlu0 %2453, %v403_v40  }
  0x1b   : > { %v2496_v43 = vld [vmem:[%s3489_s0 + $0x50] ss:$20 sps:$4 sm:$0xff]   ;;  %v2499_v45 = vld [vmem:[%s2686_s27 + $0x98] sm:$0xff]   ;;  %v404_v46 = vld [vmem:[%s3491_s2 + $0x28] sm:$0xff] }
  0x1c   : > { %2132 = vmatpush3.bf16.msra.mxu0 %v2460_v8  ;;  %2421 = vmatpush3.bf16.msra.mxu1 %v2460_v8  ;;  %v2497_v44 = vld [vmem:[%s3489_s0 + $0x230] ss:$20 sps:$4 sm:$0xff]   ;;  %v406_v51 = vld [vmem:[%s3491_s2 + $0x38] sm:$0xff]  ;;  %v2531_v53 = vld [vmem:[%s2686_s27 + $0x108] sm:$0xff]  }
  0x1d   : > { %2133 = vmatprep.subr.bf16.mxu0 %v2461_v9  ;;  %2414 = vmatprep.subr.bf16.mxu1 %v2461_v9  ;;  %v2500_v49 = vld [vmem:[%s2686_s27 + $0xd0] sm:$0xff]   ;;  %v407_v52 = vld [vmem:[%s3491_s2 + $0x40] sm:$0xff]  ;;  %v2508_v55 = vld [vmem:[%s2686_s27 + $0xc8] sm:$0xff]  }
  0x1e   : > { %v2504_v50 = vld [vmem:[%s3489_s0 + $0x25c] ss:$20 sps:$4 sm:$0xff]   ;;  %458 = vperm.xlu1 %2454, %v404_v46   ;;  %463 = vperm.xlu0 %2453, %v405_v47   ;;  %v2506_v56 = vld [vmem:[%s3489_s0 + $0x78] ss:$20 sps:$4 sm:$0xff]   ;;  %v2510_v61 = vld [vmem:[%s2686_s27 + $0xc0] sm:$0xff]  }
  0x1f   : > { %v2501_v54 = vld [vmem:[%s2686_s27 + $0x90] sm:$0xff]   ;;  %v2507_v57 = vld [vmem:[%s3489_s0 + $0x258] ss:$20 sps:$4 sm:$0xff]   ;;  %v411_v1 = vld [vmem:[%s3491_s2 + $0x60] sm:$0xff] }
  0x20   : > { %2134 = vmatpush3.bf16.msra.mxu0 %v2462_v10  ;;  %2422 = vmatpush3.bf16.msra.mxu1 %v2462_v10  ;;  %v2509_v58 = vld [vmem:[%s2686_s27 + $0x88] sm:$0xff]   ;;  %v409_v60 = vld [vmem:[%s3491_s2 + $0x50] sm:$0xff]  ;;  %v2513_v62 = vld [vmem:[%s3489_s0 + $0xa4] ss:$20 sps:$4 sm:$0xff]  }
  0x21   : > { %2135 = vmatprep.subr.bf16.mxu0 %v2463_v11  ;;  %2415 = vmatprep.subr.bf16.mxu1 %v2463_v11  ;;  %v408_v59 = vld [vmem:[%s3491_s2 + $0x48] sm:$0xff]  ;;  %v410_v0 = vld [vmem:[%s3491_s2 + $0x58] sm:$0xff]  ;;  %v2512_v2 = vld [vmem:[%s2686_s27 + $0x80] sm:$0xff]  }
  0x22   : > { %468 = vperm.xlu1 %2454, %v406_v51   ;;  %473 = vperm.xlu0 %2453, %v407_v52   ;;  %v2517_v63 = vld [vmem:[%s3489_s0 + $0xc] ss:$20 sps:$4 sm:$0xff]   ;;  %v2515_v3 = vld [vmem:[%s3489_s0 + $0x8] ss:$20 sps:$4 sm:$0xff]   ;;  %v413_v7 = vld [vmem:[%s3491_s2 + $0x70] sm:$0xff] }
  0x23   : > { %v2518_v4 = vld [vmem:[%s3489_s0 + $0xa0] ss:$20 sps:$4 sm:$0xff]   ;;  %v412_v6 = vld [vmem:[%s3491_s2 + $0x68] sm:$0xff]  ;;  %v414_v10 = vld [vmem:[%s3491_s2 + $0x78] sm:$0xff] }
  0x24   : > { %2136 = vmatpush3.bf16.msra.mxu0 %v2464_v12  ;;  %2423 = vmatpush3.bf16.msra.mxu1 %v2464_v12  ;;  %v2519_v5 = vld [vmem:[%s3489_s0 + $0xcc] ss:$20 sps:$4 sm:$0xff]   ;;  %v2521_v8 = vld [vmem:[%s3489_s0 + $0x34] ss:$20 sps:$4 sm:$0xff]   ;;  %v426_v34 = vld [vmem:[%s3491_s2 + $0xd8] sm:$0xff] }
  0x25   : > { %2137 = vmatprep.subr.bf16.mxu0 %v2465_v13  ;;  %2416 = vmatprep.subr.bf16.mxu1 %v2465_v13  ;;  %v2550_v9 = vld [vmem:[%s2686_s27 + $0x100] sm:$0xff]   ;;  %v2523_v12 = vld [vmem:[%s3489_s0 + $0xc8] ss:$20 sps:$4 sm:$0xff]   ;;  %v2536_v28 = vld [vmem:[%s3489_s0 + $0x118] ss:$20 sps:$4 sm:$0xff]  }
  0x26   : > { %478 = vperm.xlu1 %2454, %v408_v59   ;;  %483 = vperm.xlu0 %2453, %v409_v60   ;;  %v415_v11 = vld [vmem:[%s3491_s2 + $0x80] sm:$0xff]  ;;  %v428_v39 = vld [vmem:[%s3491_s2 + $0xe8] sm:$0xff]  ;;  %v429_v40 = vld [vmem:[%s3491_s2 + $0xf0] sm:$0xff] }
  0x27   : > { %v2524_v13 = vld [vmem:[%s3489_s0 + $0x30] ss:$20 sps:$4 sm:$0xff]   ;;  %v2561_v51 = vld [vmem:[%s3489_s0 + $0x1b8] ss:$20 sps:$4 sm:$0xff]   ;;  %v2562_v52 = vld [vmem:[%s3489_s0 + $0x120] ss:$20 sps:$4 sm:$0xff]  }
  0x28   : > { %2138 = vmatpush3.bf16.msra.mxu0 %v2466_v14  ;;  %2424 = vmatpush3.bf16.msra.mxu1 %v2466_v14  ;;  %v2525_v14 = vld [vmem:[%s3489_s0 + $0xf4] ss:$20 sps:$4 sm:$0xff]   ;;  %v427_v35 = vld [vmem:[%s3491_s2 + $0xe0] sm:$0xff]  ;;  %v2553_v46 = vld [vmem:[%s3489_s0 + $0xfc] ss:$20 sps:$4 sm:$0xff]  }
  0x29   : > { %2139 = vmatprep.subr.bf16.mxu0 %v2467_v15  ;;  %2417 = vmatprep.subr.bf16.mxu1 %v2467_v15  ;;  %v416_v15 = vld [vmem:[%s3491_s2 + $0x88] sm:$0xff]  ;;  %v2555_v47 = vld [vmem:[%s3489_s0 + $0x190] ss:$20 sps:$4 sm:$0xff]  }
  0x2a   : > { %488 = vperm.xlu1 %2454, %v410_v0   ;;  %493 = vperm.xlu0 %2453, %v411_v1   ;;  %v2571_v59 = vld [vmem:[%s3489_s0 + $0x170] ss:$20 sps:$4 sm:$0xff]   ;;  %v2572_v60 = vld [vmem:[%s3489_s0 + $0x88] ss:$20 sps:$4 sm:$0xff]   ;;  %v2577_v0 = vld [vmem:[%s3489_s0 + $0xd8] ss:$20 sps:$4 sm:$0xff]  }
  0x2b   : > { %v2578_v1 = vld [vmem:[%s3489_s0 + $0x1c4] ss:$20 sps:$4 sm:$0xff]  }
  0x2c   : > { %2140 = vmatpush3.bf16.msra.mxu0 %v2468_v16  ;;  %2425 = vmatpush3.bf16.msra.mxu1 %v2468_v16  ;;  %v417_v16 = vld [vmem:[%s3491_s2 + $0x90] sm:$0xff] }
  0x2d   : > { %2141 = vmatprep.subr.bf16.mxu0 %v2469_v17  ;;  %2418 = vmatprep.subr.bf16.mxu1 %v2469_v17  ;;  %v2527_v17 = vld [vmem:[%s3489_s0 + $0x5c] ss:$20 sps:$4 sm:$0xff]  }
  0x2e   : > { %498 = vperm.xlu1 %2454, %v412_v6   ;;  %503 = vperm.xlu0 %2453, %v413_v7   ;;  %v2585_v6 = vld [vmem:[%s3489_s0 + $0x150] ss:$20 sps:$4 sm:$0xff]   ;;  %v2586_v7 = vld [vmem:[%s3489_s0 + $0x1e8] ss:$20 sps:$4 sm:$0xff]  }
  0x30   : > { %2142 = vmatpush3.bf16.msra.mxu0 %v2470_v18  ;;  %2426 = vmatpush3.bf16.msra.mxu1 %v2470_v18  ;;  %v418_v18 = vld [vmem:[%s3491_s2 + $0x98] sm:$0xff] }
  0x31   : > { %2239 = vmatprep.subr.bf16.mxu1 %v2477_v19  ;;  %2371 = vmatprep.subr.bf16.mxu0 %v2480_v20  ;;  %v419_v19 = vld [vmem:[%s3491_s2 + $0xa0] sm:$0xff] }
  0x32   : > { %508 = vperm.xlu1 %2454, %v414_v10   ;;  %513 = vperm.xlu0 %2453, %v415_v11   ;;  %v2590_v10 = vld [vmem:[%s3489_s0 + $0x1a0] ss:$20 sps:$4 sm:$0xff]   ;;  %v2591_v11 = vld [vmem:[%s3489_s0 + $0x210] ss:$20 sps:$4 sm:$0xff]  }
  0x33   : > { %1289 = vmatmul.mubr.bf16.vlgmr.msra.gmra.mxu0 %v2471_v21  ;;  %1385 = vmatmul.mubr.bf16.vlgmr.msra.gmra.mxu1 %v2474_v22  ;;  %v2530_v21 = vld [vmem:[%s3489_s0 + $0x58] ss:$20 sps:$4 sm:$0xff]   ;;  %v2532_v22 = vld [vmem:[%s3489_s0 + $0x11c] ss:$20 sps:$4 sm:$0xff]  }
  0x34   : > { %2240 = vmatpush3.bf16.msra.mxu1 %v2478_v23  ;;  %2372 = vmatpush3.bf16.msra.mxu0 %v2480_v20  ;;  %v2529_v20 = vld [vmem:[%s3489_s0 + $0xf0] ss:$20 sps:$4 sm:$0xff]   ;;  %v420_v23 = vld [vmem:[%s3491_s2 + $0xa8] sm:$0xff] }
  0x35   : > { %2241 = vmatprep.subr.bf16.mxu1 %v2479_v24  ;;  %1296 = vmatprep.mubr.bf16.mxu0 %v2482_v25  ;;  %v421_v24 = vld [vmem:[%s3491_s2 + $0xb0] sm:$0xff]  ;;  %v2534_v25 = vld [vmem:[%s3489_s0 + $0x84] ss:$20 sps:$4 sm:$0xff]  }
  0x36   : > { %1392 = vmatprep.mubr.bf16.mxu1 %v2484_v27  ;;  %2373 = vmatprep.subr.bf16.mxu0 %v2511_v32  ;;  %v423_v27 = vld [vmem:[%s3491_s2 + $0xc0] sm:$0xff] }
  0x37   : > { %518 = vperm.xlu1 %2454, %v416_v15   ;;  %523 = vperm.xlu0 %2453, %v417_v16   ;;  %v2596_v15 = vld [vmem:[%s3489_s0 + $0x238] ss:$20 sps:$4 sm:$0xff]  }
  0x38   : > { %2242 = vmatpush3.bf16.msra.mxu1 %v2481_v26  ;;  %2374 = vmatpush3.bf16.msra.mxu0 %v2511_v32  ;;  %v422_v26 = vld [vmem:[%s3491_s2 + $0xb8] sm:$0xff]  ;;  %v425_v32 = vld [vmem:[%s3491_s2 + $0xd0] sm:$0xff] }
  0x39   : > { %2243 = vmatprep.subr.bf16.mxu1 %v2488_v29  ;;  %2375 = vmatprep.subr.bf16.mxu0 %v2531_v53  ;;  %v2537_v29 = vld [vmem:[%s3489_s0 + $0x80] ss:$20 sps:$4 sm:$0xff]   ;;  %v2597_v16 = vld [vmem:[%s3489_s0 + $0x218] ss:$20 sps:$4 sm:$0xff]  }
  0x3b   : > { %1297 = vmatmul.mubr.bf16.gmra.mxu0 %v2486_v30  ;;  %1393 = vmatmul.mubr.bf16.gmra.mxu1 %v2487_v31  ;;  %v2538_v30 = vld [vmem:[%s3489_s0 + $0x144] ss:$20 sps:$4 sm:$0xff]   ;;  %v424_v31 = vld [vmem:[%s3491_s2 + $0xc8] sm:$0xff] }
  0x3c   : > { %2244 = vmatpush3.bf16.msra.mxu1 %v2489_v36  ;;  %1304 = vmatprep.mubr.bf16.mxu0 %v2492_v33  ;;  %v2540_v33 = vld [vmem:[%s3489_s0 + $0xac] ss:$20 sps:$4 sm:$0xff]  }
  0x3d   : > { %2245 = vmatprep.subr.bf16.mxu1 %v2490_v37  ;;  %1400 = vmatprep.mubr.bf16.mxu1 %v2494_v38  ;;  %v2542_v36 = vld [vmem:[%s3489_s0 + $0x140] ss:$20 sps:$4 sm:$0xff]   ;;  %v2543_v37 = vld [vmem:[%s3489_s0 + $0xa8] ss:$20 sps:$4 sm:$0xff]  }
  0x3e   : > { %2376 = vmatpush3.bf16.msra.mxu0 %v2531_v53  ;;  %528 = vperm.xlu1 %2454, %v418_v18   ;;  %v2544_v38 = vld [vmem:[%s3489_s0 + $0x16c] ss:$20 sps:$4 sm:$0xff]  }
  0x3f   : > { %2377 = vmatprep.subr.bf16.mxu0 %v2550_v9  ;;  %533 = vperm.xlu0 %2453, %v419_v19   ;;  %v2563_v53 = vld [vmem:[%s3489_s0 + $0x14c] ss:$20 sps:$4 sm:$0xff]  }
  0x40   : > { %2246 = vmatpush3.bf16.msra.mxu1 %v2491_v41  ;;  %v2546_v41 = vld [vmem:[%s3489_s0 + $0xd4] ss:$20 sps:$4 sm:$0xff]  }
  0x41   : > { %2247 = vmatprep.subr.bf16.mxu1 %v2498_v42  ;;  %v430_v42 = vld [vmem:[%s3491_s2 + $0xf8] sm:$0xff]  ;;  %v2600_v18 = vld [vmem:[%s3489_s0 + $0x240] ss:$20 sps:$4 sm:$0xff]  }
  0x42   : > { %2378 = vmatpush3.bf16.msra.mxu0 %v2550_v9  ;;  %538 = vperm.xlu1 %2454, %v420_v23   ;;  %v2588_v9 = vld [vmem:[%s3489_s0 + $0x214] ss:$20 sps:$4 sm:$0xff]  }
  0x43   : > { %1305 = vmatmul.mubr.bf16.gmra.mxu0 %v2496_v43  ;;  %1401 = vmatmul.mubr.bf16.gmra.mxu1 %v2497_v44  ;;  %v2548_v43 = vld [vmem:[%s3489_s0 + $0x168] ss:$20 sps:$4 sm:$0xff]   ;;  %v2549_v44 = vld [vmem:[%s3489_s0 + $0xd0] ss:$20 sps:$4 sm:$0xff]   ;;  %v2601_v19 = vld [vmem:[%s3489_s0 + $0x260] ss:$20 sps:$4 sm:$0xff]  }
  0x44   : > { %2248 = vmatpush3.bf16.msra.mxu1 %v2499_v45  ;;  %1312 = vmatprep.mubr.bf16.mxu0 %v2502_v48  ;;  %v2551_v45 = vld [vmem:[%s3489_s0 + $0x194] ss:$20 sps:$4 sm:$0xff]   ;;  %v2556_v48 = vld [vmem:[%s3489_s0 + $0xf8] ss:$20 sps:$4 sm:$0xff]  }
  0x45   : > { %2249 = vmatprep.subr.bf16.mxu1 %v2500_v49  ;;  %1408 = vmatprep.mubr.bf16.mxu1 %v2504_v50  ;;  %v2557_v49 = vld [vmem:[%s3489_s0 + $0x1bc] ss:$20 sps:$4 sm:$0xff]   ;;  %v2559_v50 = vld [vmem:[%s3489_s0 + $0x124] ss:$20 sps:$4 sm:$0xff]  }
  0x46   : > { %543 = vperm.xlu0 %2453, %v421_v24   ;;  %548 = vperm.xlu1 %2454, %v422_v26  }
  0x48   : > { %2250 = vmatpush3.bf16.msra.mxu1 %v2501_v54  ;;  %v2565_v54 = vld [vmem:[%s3489_s0 + $0x10] ss:$20 sps:$4 sm:$0xff]  }
  0x49   : > { %2251 = vmatprep.subr.bf16.mxu1 %v2508_v55  ;;  %v2566_v55 = vld [vmem:[%s3489_s0 + $0x148] ss:$20 sps:$4 sm:$0xff]  }
  0x4a   : > { %553 = vperm.xlu0 %2453, %v423_v27   ;;  %558 = vperm.xlu1 %2454, %v424_v31  }
  0x4b   : > { %1313 = vmatmul.mubr.bf16.gmra.mxu0 %v2506_v56  ;;  %1409 = vmatmul.mubr.bf16.gmra.mxu1 %v2507_v57  ;;  %v2567_v56 = vld [vmem:[%s3489_s0 + $0x38] ss:$20 sps:$4 sm:$0xff]   ;;  %v2568_v57 = vld [vmem:[%s3489_s0 + $0x174] ss:$20 sps:$4 sm:$0xff]  }
  0x4c   : > { %2252 = vmatpush3.bf16.msra.mxu1 %v2509_v58  ;;  %1320 = vmatprep.mubr.bf16.mxu0 %v2513_v62  ;;  %v2570_v58 = vld [vmem:[%s3489_s0 + $0x60] ss:$20 sps:$4 sm:$0xff]   ;;  %v2575_v62 = vld [vmem:[%s3489_s0 + $0xb0] ss:$20 sps:$4 sm:$0xff]  }
  0x4d   : > { %2253 = vmatprep.subr.bf16.mxu1 %v2510_v61  ;;  %1449 = vmatprep.mubr.bf16.mxu1 %v2517_v63  ;;  %v2573_v61 = vld [vmem:[%s3489_s0 + $0x19c] ss:$20 sps:$4 sm:$0xff]   ;;  %v2576_v63 = vld [vmem:[%s3489_s0 + $0x198] ss:$20 sps:$4 sm:$0xff]  }
  0x4e   : > { %563 = vperm.xlu0 %2453, %v425_v32   ;;  %568 = vperm.xlu1 %2454, %v426_v34  }
  0x50   : > { %2254 = vmatpush3.bf16.msra.mxu1 %v2512_v2  ;;  %v2580_v2 = vld [vmem:[%s3489_s0 + $0x100] ss:$20 sps:$4 sm:$0xff]  }
  0x52   : > { %573 = vperm.xlu0 %2453, %v427_v35   ;;  %578 = vperm.xlu1 %2454, %v428_v39  }
  0x53   : > { %1321 = vmatmul.mubr.bf16.gmra.mxu0 %v2518_v4  ;;  %1450 = vmatmul.mubr.bf16.vlgmr.msra.gmra.mxu1 %v2515_v3  ;;  %v2581_v3 = vld [vmem:[%s3489_s0 + $0x1c0] ss:$20 sps:$4 sm:$0xff]   ;;  %v2582_v4 = vld [vmem:[%s3489_s0 + $0x128] ss:$20 sps:$4 sm:$0xff]  }
  0x54   : > { %1328 = vmatprep.mubr.bf16.mxu0 %v2519_v5  ;;  %1457 = vmatprep.mubr.bf16.mxu1 %v2521_v8  ;;  %v2583_v5 = vld [vmem:[%s3489_s0 + $0x1ec] ss:$20 sps:$4 sm:$0xff]  }
  0x55   : > { %v2587_v8 = vld [vmem:[%s3489_s0 + $0x178] ss:$20 sps:$4 sm:$0xff]  }
  0x56   : > { %583 = vperm.xlu0 %2453, %v429_v40   ;;  %588 = vperm.xlu1 %2454, %v430_v42  }
  0x5b   : > { %1329 = vmatmul.mubr.bf16.gmra.mxu0 %v2523_v12  ;;  %1458 = vmatmul.mubr.bf16.gmra.mxu1 %v2524_v13  ;;  %v2592_v12 = vld [vmem:[%s3489_s0 + $0x1c8] ss:$20 sps:$4 sm:$0xff]  }
  0x5c   : > { %1336 = vmatprep.mubr.bf16.mxu0 %v2525_v14  ;;  %1465 = vmatprep.mubr.bf16.mxu1 %v2527_v17  ;;  %v2593_v13 = vld [vmem:[%s3489_s0 + $0x23c] ss:$20 sps:$4 sm:$0xff]   ;;  %v2598_v17 = vld [vmem:[%s3489_s0 + $0x264] ss:$20 sps:$4 sm:$0xff]  }
  0x5d   : > { %v2595_v14 = vld [vmem:[%s3489_s0 + $0x1f0] ss:$20 sps:$4 sm:$0xff]  }
  0x63   : > { %1337 = vmatmul.mubr.bf16.gmra.mxu0 %v2529_v20  ;;  %1466 = vmatmul.mubr.bf16.gmra.mxu1 %v2530_v21  ;;  %v2602_v20 = vld [vmem:[%s3489_s0 + $0x268] ss:$20 sps:$4 sm:$0xff]  }
  0x64   : > { %1344 = vmatprep.mubr.bf16.mxu0 %v2532_v22  ;;  %1473 = vmatprep.mubr.bf16.mxu1 %v2534_v25 }
  0x6b   : > { %1345 = vmatmul.mubr.bf16.gmra.mxu0 %v2536_v28  ;;  %1474 = vmatmul.mubr.bf16.gmra.mxu1 %v2537_v29 }
  0x6c   : > { %1352 = vmatprep.mubr.bf16.mxu0 %v2538_v30  ;;  %1481 = vmatprep.mubr.bf16.mxu1 %v2540_v33 }
  0x73   : > { %1353 = vmatmul.mubr.bf16.gmra.mxu0 %v2542_v36  ;;  %1482 = vmatmul.mubr.bf16.gmra.mxu1 %v2543_v37 }
  0x74   : > { %1360 = vmatprep.mubr.bf16.mxu0 %v2544_v38  ;;  %1489 = vmatprep.mubr.bf16.mxu1 %v2546_v41 }
  0x7b   : > { %1361 = vmatmul.mubr.bf16.gmra.mxu0 %v2548_v43  ;;  %1490 = vmatmul.mubr.bf16.gmra.mxu1 %v2549_v44 }
  0x7c   : > { %1368 = vmatprep.mubr.bf16.mxu0 %v2551_v45  ;;  %1497 = vmatprep.mubr.bf16.mxu1 %v2553_v46 }
  0x83   : > { %1369 = vmatmul.mubr.bf16.gmra.mxu0 %v2555_v47  ;;  %1498 = vmatmul.mubr.bf16.gmra.mxu1 %v2556_v48 }
  0x84   : > { %1376 = vmatprep.mubr.bf16.mxu0 %v2557_v49  ;;  %1505 = vmatprep.mubr.bf16.mxu1 %v2559_v50 }
  0x8b   : > { %1377 = vmatmul.mubr.bf16.gmra.mxu0 %v2561_v51  ;;  %1506 = vmatmul.mubr.bf16.gmra.mxu1 %v2562_v52 }
  0x8c   : > { %1513 = vmatprep.mubr.bf16.mxu1 %v2563_v53  ;;  %2379 = vmatprep.mubr.msk.bf16.mxu0 %vm1207_vm0, %v2565_v54 }
  0x93   : > { %1514 = vmatmul.mubr.bf16.gmra.mxu1 %v2566_v55  ;;  %2380 = vmatmul.mubr.msk.bf16.vlgmr.msra.gmra.mxu0 %vm1207_vm0, %v2567_v56 }
  0x94   : > { %1521 = vmatprep.mubr.bf16.mxu1 %v2568_v57  ;;  %2383 = vmatprep.mubr.msk.bf16.mxu0 %vm1207_vm0, %v2570_v58 }
  0x9b   : > { %1522 = vmatmul.mubr.bf16.gmra.mxu1 %v2571_v59  ;;  %2384 = vmatmul.mubr.msk.bf16.gmra.mxu0 %vm1207_vm0, %v2572_v60 }
  0x9c   : > { %1529 = vmatprep.mubr.bf16.mxu1 %v2573_v61  ;;  %2387 = vmatprep.mubr.msk.bf16.mxu0 %vm1207_vm0, %v2575_v62 }
  0xa3   : > { %1530 = vmatmul.mubr.bf16.gmra.mxu1 %v2576_v63  ;;  %2388 = vmatmul.mubr.msk.bf16.gmra.mxu0 %vm1207_vm0, %v2577_v0 }
  0xa4   : > { %1537 = vmatprep.mubr.bf16.mxu1 %v2578_v1  ;;  %2391 = vmatprep.mubr.msk.bf16.mxu0 %vm1207_vm0, %v2580_v2 }
  0xab   : > { %1538 = vmatmul.mubr.bf16.gmra.mxu1 %v2581_v3  ;;  %2392 = vmatmul.mubr.msk.bf16.gmra.mxu0 %vm1207_vm0, %v2582_v4 }
  0xac   : > { %1545 = vmatprep.mubr.bf16.mxu1 %v2583_v5  ;;  %2395 = vmatprep.mubr.msk.bf16.mxu0 %vm1207_vm0, %v2585_v6 }
  0xb3   : > { %1546 = vmatmul.mubr.bf16.gmra.mxu1 %v2586_v7  ;;  %2396 = vmatmul.mubr.msk.bf16.gmra.mxu0 %vm1207_vm0, %v2587_v8 }
  0xb4   : > { %1553 = vmatprep.mubr.bf16.mxu1 %v2588_v9  ;;  %2399 = vmatprep.mubr.msk.bf16.mxu0 %vm1207_vm0, %v2590_v10 }
  0xbb   : > { %1554 = vmatmul.mubr.bf16.gmra.mxu1 %v2591_v11  ;;  %2400 = vmatmul.mubr.msk.bf16.gmra.mxu0 %vm1207_vm0, %v2592_v12 }
  0xbc   : > { %1561 = vmatprep.mubr.bf16.mxu1 %v2593_v13  ;;  %2403 = vmatprep.mubr.msk.bf16.mxu0 %vm1207_vm0, %v2595_v14 }
  0xc3   : > { %1562 = vmatmul.mubr.bf16.gmra.mxu1 %v2596_v15  ;;  %2404 = vmatmul.mubr.msk.bf16.gmra.mxu0 %vm1207_vm0, %v2597_v16 }
  0xc4   : > { %1569 = vmatprep.mubr.bf16.mxu1 %v2598_v17  ;;  %2407 = vmatprep.mubr.msk.bf16.mxu0 %vm1207_vm0, %v2600_v18 }
  0xcb   : > { %1570 = vmatmul.mubr.bf16.gmra.mxu1 %v2601_v19  ;;  %2408 = vmatmul.mubr.msk.bf16.gmra.mxu0 %vm1207_vm0, %v2602_v20 }
  0xf3   : > { %v2143_v21 = vpop.f32.mrf.mxu0  ;;  %v2215_v22 = vpop.f32.mrf.mxu1 }
  0xf5   : > { %v2144_v23 = vpop.f32.mrf.mxu0  ;;  %v2216_v24 = vpop.f32.mrf.mxu1 }
  0xf6   : > { %v3070_v25 = vadd.f32 %v2144_v23, %v2143_v21  ;;  %v3072_v26 = vadd.f32 %v2216_v24, %v2215_v22 }
  0xf7   : > { %v2146_v27 = vpop.f32.mrf.mxu0  ;;  %v2218_v28 = vpop.f32.mrf.mxu1 }
  0xf8   : > { %3494 = vst [vmem:[#allocation3_spill] sm:$0xff] %v3072_v26 }
  0xf9   : > { %v2147_v29 = vpop.f32.mrf.mxu0  ;;  %v2219_v30 = vpop.f32.mrf.mxu1 }
  0xfa   : > { %v3074_v31 = vadd.f32 %v2147_v29, %v2146_v27  ;;  %v3076_v32 = vadd.f32 %v2219_v30, %v2218_v28 }
  0xfb   : > { %v2149_v33 = vpop.f32.mrf.mxu0  ;;  %v2221_v34 = vpop.f32.mrf.mxu1 }
  0xfc   : > { %3495 = vst [vmem:[#allocation4_spill] sm:$0xff] %v3076_v32 }
  0xfd   : > { %v2150_v35 = vpop.f32.mrf.mxu0  ;;  %v2222_v36 = vpop.f32.mrf.mxu1 }
  0xfe   : > { %v3078_v37 = vadd.f32 %v2150_v35, %v2149_v33  ;;  %v3080_v38 = vadd.f32 %v2222_v36, %v2221_v34 }
  0xff   : > { %v2152_v39 = vpop.f32.mrf.mxu0  ;;  %v2224_v40 = vpop.f32.mrf.mxu1 }
 0x100   : > { %3496 = vst [vmem:[#allocation5_spill] sm:$0xff] %v3080_v38 }
 0x101   : > { %v2153_v41 = vpop.f32.mrf.mxu0  ;;  %v2225_v42 = vpop.f32.mrf.mxu1 }
 0x102   : > { %v3082_v43 = vadd.f32 %v2153_v41, %v2152_v39  ;;  %v3084_v44 = vadd.f32 %v2225_v42, %v2224_v40 }
 0x103   : > { %v2155_v45 = vpop.f32.mrf.mxu0  ;;  %v2227_v46 = vpop.f32.mrf.mxu1 }
 0x104   : > { %3497 = vst [vmem:[#allocation6_spill] sm:$0xff] %v3084_v44 }
 0x105   : > { %v2156_v47 = vpop.f32.mrf.mxu0  ;;  %v2228_v48 = vpop.f32.mrf.mxu1 }
 0x106   : > { %v3086_v49 = vadd.f32 %v2156_v47, %v2155_v45  ;;  %v3088_v50 = vadd.f32 %v2228_v48, %v2227_v46 }
 0x107   : > { %v2158_v51 = vpop.f32.mrf.mxu0  ;;  %v2230_v52 = vpop.f32.mrf.mxu1 }
 0x108   : > { %3498 = vst [vmem:[#allocation7_spill] sm:$0xff] %v3088_v50 }
 0x109   : > { %v2159_v53 = vpop.f32.mrf.mxu0  ;;  %v2231_v54 = vpop.f32.mrf.mxu1 }
 0x10a   : > { %v3090_v55 = vadd.f32 %v2159_v53, %v2158_v51  ;;  %v3092_v56 = vadd.f32 %v2231_v54, %v2230_v52  ;;  %v434_v51 = vpop.permute.xlu0 %433 }
 0x10b   : > { %v2161_v57 = vpop.f32.mrf.mxu0  ;;  %v2233_v58 = vpop.f32.mrf.mxu1 }
 0x10c   : > { %3499 = vst [vmem:[#allocation8_spill] sm:$0xff] %v3092_v56 }
 0x10d   : > { %v2162_v59 = vpop.f32.mrf.mxu0  ;;  %v2234_v60 = vpop.f32.mrf.mxu1 }
 0x10e   : > { %v3094_v61 = vadd.f32 %v2162_v59, %v2161_v57  ;;  %v3096_v62 = vadd.f32 %v2234_v60, %v2233_v58  ;;  %v444_v58 = vpop.permute.xlu1 %443 }
 0x10f   : > { %v2164_v63 = vpop.f32.mrf.mxu0  ;;  %v2236_v0 = vpop.f32.mrf.mxu1 }
 0x110   : > { %3500 = vst [vmem:[#allocation9_spill] sm:$0xff] %v3096_v62 }
 0x111   : > { %v2165_v1 = vpop.f32.mrf.mxu0  ;;  %v2237_v2 = vpop.f32.mrf.mxu1 }
 0x112   : > { %v3098_v3 = vadd.f32 %v2165_v1, %v2164_v63  ;;  %v3100_v4 = vadd.f32 %v2237_v2, %v2236_v0  ;;  %v439_v63 = vpop.permute.xlu0 %438 }
 0x113   : > { %v2167_v5 = vpop.f32.mrf.mxu0  ;;  %v3102_v6 = vpop.f32.mrf.mxu1 }
 0x114   : > { %3501 = vst [vmem:[#allocation10_spill] sm:$0xff] %v3100_v4 }
 0x115   : > { %v2168_v7 = vpop.f32.mrf.mxu0  ;;  %v3104_v8 = vpop.f32.mrf.mxu1 }
 0x116   : > { %v3106_v9 = vadd.f32 %v2168_v7, %v2167_v5  ;;  %v449_v7 = vpop.permute.xlu1 %448 }
 0x117   : > { %v2170_v10 = vpop.f32.mrf.mxu0  ;;  %v3108_v11 = vpop.f32.mrf.mxu1 }
 0x119   : > { %v2171_v12 = vpop.f32.mrf.mxu0  ;;  %v3110_v13 = vpop.f32.mrf.mxu1 }
 0x11a   : > { %v3112_v14 = vadd.f32 %v2171_v12, %v2170_v10 }
 0x11b   : > { %v2173_v15 = vpop.f32.mrf.mxu0  ;;  %v3114_v16 = vpop.f32.mrf.mxu1 }
 0x11d   : > { %v2174_v17 = vpop.f32.mrf.mxu0  ;;  %v3116_v18 = vpop.f32.mrf.mxu1 }
 0x11e   : > { %v3118_v19 = vadd.f32 %v2174_v17, %v2173_v15  ;;  %v454_v15 = vpop.permute.xlu0 %453 }
 0x11f   : > { %v2176_v20 = vpop.f32.mrf.mxu0  ;;  %v3120_v21 = vpop.f32.mrf.mxu1 }
 0x121   : > { %v2177_v22 = vpop.f32.mrf.mxu0  ;;  %v3122_v23 = vpop.f32.mrf.mxu1 }
 0x122   : > { %v3124_v24 = vadd.f32 %v2177_v22, %v2176_v20  ;;  %v464_v4 = vpop.permute.xlu0 %463 }
 0x123   : > { %v2179_v27 = vpop.f32.mrf.mxu0  ;;  %v3126_v28 = vpop.f32.mrf.mxu1 }
 0x125   : > { %v2180_v29 = vpop.f32.mrf.mxu0  ;;  %v3128_v30 = vpop.f32.mrf.mxu1 }
 0x126   : > { %v3130_v33 = vadd.f32 %v2180_v29, %v2179_v27  ;;  %v459_v29 = vpop.permute.xlu1 %458 }
 0x127   : > { %v2182_v34 = vpop.f32.mrf.mxu0  ;;  %v3132_v35 = vpop.f32.mrf.mxu1 }
 0x129   : > { %v2183_v36 = vpop.f32.mrf.mxu0  ;;  %v3134_v39 = vpop.f32.mrf.mxu1 }
 0x12a   : > { %v3136_v40 = vadd.f32 %v2183_v36, %v2182_v34  ;;  %v469_v44 = vpop.permute.xlu1 %468 }
 0x12b   : > { %v3138_v41 = vpop.f32.mrf.mxu0  ;;  %v3140_v42 = vpop.f32.mrf.mxu1 }
 0x12d   : > { %v3142_v45 = vpop.f32.mrf.mxu0  ;;  %v3144_v46 = vpop.f32.mrf.mxu1 }
 0x12f   : > { %v3146_v47 = vpop.f32.mrf.mxu0  ;;  %v3148_v48 = vpop.f32.mrf.mxu1 }
 0x131   : > { %v3150_v52 = vpop.f32.mrf.mxu0  ;;  %v3152_v53 = vpop.f32.mrf.mxu1 }
 0x133   : > { %v3154_v54 = vpop.f32.mrf.mxu0  ;;  %v3156_v57 = vpop.f32.mrf.mxu1 }
 0x135   : > { %v3158_v59 = vpop.f32.mrf.mxu0  ;;  %v3160_v60 = vpop.f32.mrf.mxu1 }
 0x137   : > { %v3162_v0 = vpop.f32.mrf.mxu0  ;;  %v3164_v1 = vpop.f32.mrf.mxu1 }
 0x138   : > { %3502 = vst [vmem:[#allocation11_spill] sm:$0xff] %v3164_v1 }
 0x139   : > { %v3166_v2 = vpop.f32.mrf.mxu0  ;;  %v3168_v5 = vpop.f32.mrf.mxu1 }
 0x13a   : > { %3503 = vst [vmem:[#allocation12_spill] sm:$0xff] %v3166_v2  ;;  %3504 = vst [vmem:[#allocation13_spill] sm:$0xff] %v3168_v5  ;;  %v2266_v2 = vadd.f32 %v3122_v23, %v3120_v21  ;;  %v1318_v21 = vadd.f32 %v3098_v3, %v469_v44  ;;  %v2269_v44 = vadd.f32 %v3128_v30, %v3126_v28 }
 0x13b   : > { %v3170_v10 = vpop.f32.mrf.mxu0  ;;  %v3172_v12 = vpop.f32.mrf.mxu1 }
 0x13c   : > { %3505 = vst [vmem:[#allocation14_spill] sm:$0xff] %v3170_v10 }
 0x13d   : > { %v3174_v17 = vpop.f32.mrf.mxu0  ;;  %v3176_v20 = vpop.f32.mrf.mxu1 }
 0x13e   : > { %3506 = vst [vmem:[#allocation15_spill] sm:$0xff] %v3174_v17 }
 0x13f   : > { %v3178_v22 = vpop.f32.mrf.mxu0  ;;  %v3180_v27 = vpop.f32.mrf.mxu1 }
 0x140   : > { %3507 = vst [vmem:[#allocation16_spill] sm:$0xff] %v3178_v22  ;;  %v474_v22 = vpop.permute.xlu0 %473 }
 0x141   : > { %v3182_v34 = vpop.f32.mrf.mxu0  ;;  %v3184_v36 = vpop.f32.mrf.mxu1 }
 0x142   : > { %3508 = vst [vmem:[#allocation17_spill] sm:$0xff] %v3182_v34 }
 0x143   : > { %v3186_v62 = vpop.f32.mrf.mxu0  ;;  %v3188_v56 = vpop.f32.mrf.mxu1 }
 0x144   : > { %3509 = vst [vmem:[#allocation18_spill] sm:$0xff] %v3186_v62  ;;  %3510 = vst [vmem:[#allocation19_spill] sm:$0xff] %v3188_v56  ;;  %v479_v62 = vpop.permute.xlu1 %478 }
 0x145   : > { %v3190_v50 = vpop.f32.mrf.mxu0  ;;  %v3192_v32 = vpop.f32.mrf.mxu1 }
 0x146   : > { %3511 = vst [vmem:[#allocation20_spill] sm:$0xff] %v3190_v50  ;;  %3512 = vst [vmem:[#allocation21_spill] sm:$0xff] %v3192_v32  ;;  %v484_v32 = vpop.permute.xlu0 %483 }
 0x147   : > { %v3194_v26 = vpop.f32.mrf.mxu0  ;;  %v3196_v38 = vpop.f32.mrf.mxu1 }
 0x148   : > { %3513 = vst [vmem:[#allocation22_spill] sm:$0xff] %v3194_v26  ;;  %3514 = vst [vmem:[#allocation23_spill] sm:$0xff] %v3196_v38  ;;  %v2263_v26 = vadd.f32 %v3116_v18, %v3114_v16  ;;  %v1294_v18 = vadd.f32 %v3074_v31, %v439_v63  ;;  %v1315_v31 = vadd.f32 %v3094_v61, %v464_v4 }
 0x149   : > { %v3198_v17 = vpop.f32.mrf.mxu0  ;;  %v3200_v34 = vpop.f32.mrf.mxu1  ;;  %v3243_v63 = vadd.f32 %v3106_v9, %v474_v22 }
 0x14a   : > { %3515 = vst [vmem:[#allocation24_spill] sm:$0xff] %v3198_v17  ;;  %3516 = vst [vmem:[#allocation25_spill] sm:$0xff] %v3200_v34  ;;  %v1299_v17 = vadd.f32 %v3078_v37, %v444_v58  ;;  %v494_v58 = vpop.permute.xlu0 %493 }
 0x14b   : > { %v3202_v10 = vpop.f32.mrf.mxu0  ;;  %v3204_v5 = vpop.f32.mrf.mxu1 }
 0x14c   : > { %3517 = vst [vmem:[#allocation26_spill] sm:$0xff] %v3202_v10  ;;  %3518 = vst [vmem:[#allocation27_spill] sm:$0xff] %v3204_v5  ;;  %v2257_v10 = vadd.f32 %v3104_v8, %v3102_v6  ;;  %v1460_v16 = vadd.f32 %v2263_v26, %v1299_v17  ;;  %v3231_v8 = vstv %s1739_s20  ;;  %v1310_v26 = vadd.f32 %v3090_v55, %v459_v29 }
 0x14d   : > { %v3206_v56 = vpop.f32.mrf.mxu0  ;;  %v3208_v50 = vpop.f32.mrf.mxu1  ;;  %v3250_v55 = vadd.f32 %v3118_v19, %v484_v32  ;;  %v2272_v32 = vadd.f32 %v3134_v39, %v3132_v35  ;;  %v3273_v35 = vadd.f32 %v3130_v33, %v494_v58  ;;  %v2187_v39 = vadd.f32 %v3142_v45, %v3138_v41 }
 0x14e   : > { %3519 = vst [vmem:[#allocation28_spill] sm:$0xff] %v3206_v56  ;;  %3520 = vst [vmem:[#allocation29_spill] sm:$0xff] %v3208_v50  ;;  %v489_v56 = vpop.permute.xlu1 %488  ;;  %v1291_v50 = vadd.f32 %v3070_v25, %v434_v51  ;;  %v1307_v25 = vadd.f32 %v3086_v49, %v454_v15  ;;  %v504_v28 = vpop.permute.xlu0 %503  ;;  %v2190_v33 = vadd.f32 %v3150_v52, %v3146_v47 }
 0x14f   : > { %v3212_v38 = vpop.f32.mrf.mxu0  ;;  %v3214_v1 = vpop.f32.mrf.mxu1 }
 0x150   : > { %3521 = vst [vmem:[#allocation30_spill] sm:$0xff] %v3212_v38  ;;  %v2260_v38 = vadd.f32 %v3110_v13, %v3108_v11  ;;  %v2275_v11 = vadd.f32 %v3144_v46, %v3140_v42  ;;  %v1468_v22 = vadd.f32 %v2269_v44, %v1307_v25 }
 0x151   : > { %v3219_v34 = vpop.f32.mrf.mxu0  ;;  %v3221_v5 = vpop.f32.mrf.mxu1 }
 0x152   : > { %3522 = vst [vmem:[#allocation31_spill] sm:$0xff] %v3219_v34  ;;  %3523 = vst [vmem:[#allocation32_spill] sm:$0xff] %v3221_v5  ;;  %v1302_v34 = vadd.f32 %v3082_v43, %v449_v7  ;;  %v1452_v5 = vadd.f32 %v2257_v10, %v1291_v50  ;;  %v3247_v50 = vadd.f32 %v3112_v14, %v479_v62  ;;  %v499_v42 = vpop.permute.xlu1 %498 }
 0x153   : > { %v3229_v37 = vpop.f32.mrf.mxu1  ;;  %v2381_v6 = vpop.f32.mrf.mxu0  ;;  %v1455_v4 = vadd.f32 %v2260_v38, %v1294_v18  ;;  %v2278_v62 = vadd.f32 %v3152_v53, %v3148_v48  ;;  %v1476_v19 = vadd.f32 %v2275_v11, %v1315_v31  ;;  %v2287_v31 = vadd.f32 %v3176_v20, %v3172_v12 }
 0x154   : > { %v1621_v51 = vadd.f32 %v2381_v6, %v1460_v16  ;;  %v1463_v7 = vadd.f32 %v2266_v2, %v1302_v34  ;;  %v3258_v2 = vadd.f32 %v3124_v24, %v489_v56  ;;  %v3283_v6 = vadd.f32 %v3136_v40, %v499_v42 }
 0x155   : > { %v3240_v13 = vpop.f32.mrf.mxu1  ;;  %v1612_v23 = vpop.f32.mrf.mxu0  ;;  %v3293_v40 = vadd.f32 %v2187_v39, %v504_v28  ;;  %v2281_v42 = vadd.f32 %v3160_v60, %v3156_v57  ;;  %v3526_v39 = vld [vmem:[#allocation13_spill] sm:$0xff] }
 0x156   : > { %v1774_v43 = vmin.f32 %v1621_v51, 0.0  ;;  %v1613_v49 = vadd.f32 %v1612_v23, %v1452_v5  ;;  %v1742_v9 = vmax.f32 %v1621_v51, 0.0  ;;  %v1471_v51 = vadd.f32 %v2272_v32, %v1310_v26  ;;  %v509_v25 = vpop.permute.xlu1 %508 }
 0x157   : > { %v3254_v61 = vpop.f32.mrf.mxu1  ;;  %v2382_v3 = vpop.f32.mrf.mxu0  ;;  %v2193_v26 = vadd.f32 %v3158_v59, %v3154_v54  ;;  %v2290_v54 = vadd.f32 %v3184_v36, %v3180_v27 }
 0x158   : > { %v1807_v46 = vmul.f32 %v3231_v8, %v1774_v43  ;;  %v1772_v10 = vmin.f32 %v1613_v49, 0.0  ;;  %v1624_v5 = vadd.f32 %v2382_v3, %v1463_v7  ;;  %v1740_v56 = vmax.f32 %v1613_v49, 0.0  ;;  %v514_v3 = vpop.permute.xlu0 %513 }
 0x159   : > { %v3269_v38 = vpop.f32.mrf.mxu1  ;;  %v1615_v14 = vpop.f32.mrf.mxu0  ;;  %v1479_v43 = vadd.f32 %v2278_v62, %v1318_v21  ;;  %v1492_v62 = vadd.f32 %v2287_v31, %v3250_v55  ;;  %v1495_v31 = vadd.f32 %v2290_v54, %v3258_v2 }
 0x15a   : > { %v1839_v30 = vadd.f32 %v1807_v46, %v1742_v9  ;;  %v1805_v24 = vmul.f32 %v3231_v8, %v1772_v10  ;;  %v1775_v15 = vmin.f32 %v1624_v5, 0.0  ;;  %v1616_v48 = vadd.f32 %v1615_v14, %v1455_v4  ;;  %v3524_v14 = vld [vmem:[#allocation12_spill] sm:$0xff] }
 0x15b   : > { %v3277_v53 = vpop.f32.mrf.mxu1  ;;  %v2385_v17 = vpop.f32.mrf.mxu0  ;;  %v1743_v34 = vmax.f32 %v1624_v5, 0.0  ;;  %v3303_v4 = vadd.f32 %v2190_v33, %v509_v25  ;;  %v3527_v33 = vld [vmem:[#allocation27_spill] sm:$0xff] }
 0x15c   : > { %1871 = vst.msk [vmem:[%s3267_s23 + $0x10] sm:$0xff] %vm1207_vm0, %v1839_v30  ;;  %v1837_v29 = vadd.f32 %v1805_v24, %v1740_v56  ;;  %v1808_v16 = vmul.f32 %v3231_v8, %v1775_v15  ;;  %v1637_v18 = vadd.f32 %v2385_v17, %v1476_v19  ;;  %v1773_v41 = vmin.f32 %v1616_v48, 0.0  ;;  %v519_v24 = vpop.permute.xlu1 %518 }
 0x15d   : > { %v3287_v45 = vpop.f32.mrf.mxu1  ;;  %v1628_v58 = vpop.f32.mrf.mxu0  ;;  %v1741_v49 = vmax.f32 %v1616_v48, 0.0  ;;  %v2196_v19 = vadd.f32 %v3524_v14, %v3162_v0  ;;  %v3319_v15 = vadd.f32 %v2193_v26, %v514_v3  ;;  %v3525_v0 = vld [vmem:[#allocation11_spill] sm:$0xff] }
 0x15e   : > { %1869 = vst.msk [vmem:[%s3267_s23] sm:$0xff] %vm1207_vm0, %v1837_v29  ;;  %v1840_v11 = vadd.f32 %v1808_v16, %v1743_v34  ;;  %v1778_v23 = vmin.f32 %v1637_v18, 0.0  ;;  %v1806_v47 = vmul.f32 %v3231_v8, %v1773_v41  ;;  %v1629_v52 = vadd.f32 %v1628_v58, %v1468_v22  ;;  %v3528_v41 = vld [vmem:[#allocation29_spill] sm:$0xff] }
 0x15f   : > { %v3296_v7 = vpop.f32.mrf.mxu1  ;;  %v2386_v44 = vpop.f32.mrf.mxu0  ;;  %v1746_v12 = vmax.f32 %v1637_v18, 0.0  ;;  %v2284_v48 = vadd.f32 %v3526_v39, %v3525_v0  ;;  %v1484_v34 = vadd.f32 %v2281_v42, %v3243_v63  ;;  %v2299_v58 = vadd.f32 %v3528_v41, %v3527_v33 }
 0x160   : > { %1872 = vst.msk [vmem:[%s3267_s23 + $0x18] sm:$0xff] %vm1207_vm0, %v1840_v11  ;;  %v1811_v20 = vmul.f32 %v3231_v8, %v1778_v23  ;;  %v1640_v21 = vadd.f32 %v2386_v44, %v1479_v43  ;;  %v1838_v9 = vadd.f32 %v1806_v47, %v1741_v49  ;;  %v1776_v46 = vmin.f32 %v1629_v52, 0.0  ;;  %v524_v18 = vpop.permute.xlu0 %523  ;;  %v3530_v44 = vld [vmem:[#allocation15_spill] sm:$0xff] }
 0x161   : > { %v3307_v10 = vpop.f32.mrf.mxu1  ;;  %v1631_v5 = vpop.f32.mrf.mxu0  ;;  %v1744_v28 = vmax.f32 %v1629_v52, 0.0  ;;  %v3332_v11 = vadd.f32 %v2196_v19, %v519_v24  ;;  %v3529_v52 = vld [vmem:[#allocation14_spill] sm:$0xff]  ;;  %v1487_v54 = vadd.f32 %v2284_v48, %v3247_v50 }
 0x162   : > { %v1843_v59 = vadd.f32 %v1811_v20, %v1746_v12  ;;  %v1779_v32 = vmin.f32 %v1640_v21, 0.0  ;;  %1870 = vst.msk [vmem:[%s3267_s23 + $0x8] sm:$0xff] %vm1207_vm0, %v1838_v9  ;;  %v1809_v57 = vmul.f32 %v3231_v8, %v1776_v46  ;;  %v1632_v60 = vadd.f32 %v1631_v5, %v1471_v51  ;;  %v3531_v20 = vld [vmem:[#allocation19_spill] sm:$0xff] }
 0x163   : > { %v3317_v30 = vpop.f32.mrf.mxu1  ;;  %v2389_v56 = vpop.f32.mrf.mxu0  ;;  %v1747_v27 = vmax.f32 %v1640_v21, 0.0  ;;  %v2199_v3 = vadd.f32 %v3530_v44, %v3529_v52  ;;  %v3532_v21 = vld [vmem:[#allocation21_spill] sm:$0xff] }
 0x164   : > { %1875 = vst.msk [vmem:[%s3267_s23 + $0x30] sm:$0xff] %vm1207_vm0, %v1843_v59  ;;  %v1812_v36 = vmul.f32 %v3231_v8, %v1779_v32  ;;  %v1653_v55 = vadd.f32 %v2389_v56, %v1492_v62  ;;  %v1841_v17 = vadd.f32 %v1809_v57, %v1744_v28  ;;  %v1777_v22 = vmin.f32 %v1632_v60, 0.0  ;;  %v529_v32 = vpop.permute.xlu1 %528  ;;  %v3533_v62 = vld [vmem:[#allocation32_spill] sm:$0xff]  ;;  %v3535_v56 = vld [vmem:[#allocation17_spill] sm:$0xff]  ;;  %v534_v39 = vpop.permute.xlu0 %533 }
 0x165   : > { %v3326_v29 = vpop.f32.mrf.mxu1  ;;  %v1644_v16 = vpop.f32.mrf.mxu0  ;;  %v1745_v23 = vmax.f32 %v1632_v60, 0.0  ;;  %v2293_v42 = vadd.f32 %v3532_v21, %v3531_v20  ;;  %v2302_v14 = vadd.f32 %v3533_v62, %v3214_v1  ;;  %v1508_v57 = vadd.f32 %v2299_v58, %v3293_v40  ;;  %v3534_v60 = vld [vmem:[#allocation16_spill] sm:$0xff] }
 0x166   : > { %v1844_v51 = vadd.f32 %v1812_v36, %v1747_v27  ;;  %v1782_v25 = vmin.f32 %v1653_v55, 0.0  ;;  %1873 = vst.msk [vmem:[%s3267_s23 + $0x20] sm:$0xff] %vm1207_vm0, %v1841_v17  ;;  %v1810_v43 = vmul.f32 %v3231_v8, %v1777_v22  ;;  %v1645_v49 = vadd.f32 %v1644_v16, %v1484_v34  ;;  %v3536_v22 = vld [vmem:[#allocation23_spill] sm:$0xff]  ;;  %v3537_v34 = vld [vmem:[#allocation25_spill] sm:$0xff] }
 0x167   : > { %v3337_v47 = vpop.f32.mrf.mxu1  ;;  %v2390_v63 = vpop.f32.mrf.mxu0  ;;  %v1750_v26 = vmax.f32 %v1653_v55, 0.0  ;;  %v2202_v24 = vadd.f32 %v3535_v56, %v3534_v60  ;;  %v1363_v48 = vadd.f32 %v2199_v3, %v524_v18  ;;  %v2296_v16 = vadd.f32 %v3537_v34, %v3536_v22  ;;  %v3541_v60 = vld [vmem:[#allocation28_spill] sm:$0xff] }
 0x168   : > { %1876 = vst.msk [vmem:[%s3267_s23 + $0x38] sm:$0xff] %vm1207_vm0, %v1844_v51  ;;  %v1815_v2 = vmul.f32 %v3231_v8, %v1782_v25  ;;  %v1656_v12 = vadd.f32 %v2390_v63, %v1495_v31  ;;  %v1842_v9 = vadd.f32 %v1810_v43, %v1745_v23  ;;  %v1780_v46 = vmin.f32 %v1645_v49, 0.0 }
 0x169   : > { %v3346_v5 = vpop.f32.mrf.mxu1  ;;  %v1647_v59 = vpop.f32.mrf.mxu0  ;;  %v1748_v27 = vmax.f32 %v1645_v49, 0.0  ;;  %v1500_v51 = vadd.f32 %v2293_v42, %v3273_v35  ;;  %v2311_v18 = vadd.f32 %v3287_v45, %v3277_v53  ;;  %v1511_v43 = vadd.f32 %v2302_v14, %v3303_v4  ;;  %v3538_v35 = vld [vmem:[#allocation18_spill] sm:$0xff] }
 0x16a   : > { %v1847_v19 = vadd.f32 %v1815_v2, %v1750_v26  ;;  %v1783_v28 = vmin.f32 %v1656_v12, 0.0  ;;  %1874 = vst.msk [vmem:[%s3267_s23 + $0x28] sm:$0xff] %vm1207_vm0, %v1842_v9  ;;  %v1813_v36 = vmul.f32 %v3231_v8, %v1780_v46  ;;  %v1648_v55 = vadd.f32 %v1647_v59, %v1487_v54  ;;  %v3369_v2 = vpop.permute.xlu1 %538 }
 0x16b   : > { %v2321_v50 = vpop.f32.mrf.mxu1  ;;  %v2393_v0 = vpop.f32.mrf.mxu0  ;;  %v1751_v1 = vmax.f32 %v1656_v12, 0.0  ;;  %v1366_v49 = vadd.f32 %v2202_v24, %v529_v32  ;;  %v3539_v12 = vld [vmem:[#allocation20_spill] sm:$0xff]  ;;  %v2305_v21 = vadd.f32 %v3240_v13, %v3229_v37  ;;  %v1503_v54 = vadd.f32 %v2296_v16, %v3283_v6 }
 0x16c   : > { %1879 = vst.msk [vmem:[%s3267_s23 + $0x50] sm:$0xff] %vm1207_vm0, %v1847_v19  ;;  %v1816_v17 = vmul.f32 %v3231_v8, %v1783_v28  ;;  %v1669_v40 = vadd.f32 %v2393_v0, %v1508_v57  ;;  %v1845_v33 = vadd.f32 %v1813_v36, %v1748_v27  ;;  %v1781_v41 = vmin.f32 %v1648_v55, 0.0  ;;  %v544_v32 = vpop.permute.xlu0 %543  ;;  %v3540_v57 = vld [vmem:[#allocation26_spill] sm:$0xff] }
 0x16d   : > { %v2322_v58 = vpop.f32.mrf.mxu1  ;;  %v1660_v25 = vpop.f32.mrf.mxu0  ;;  %v1749_v63 = vmax.f32 %v1648_v55, 0.0  ;;  %v2205_v20 = vadd.f32 %v3539_v12, %v3538_v35  ;;  %v2314_v62 = vadd.f32 %v3307_v10, %v3296_v7  ;;  %v1524_v28 = vadd.f32 %v2311_v18, %v1363_v48 }
 0x16e   : > { %v1848_v31 = vadd.f32 %v1816_v17, %v1751_v1  ;;  %v1786_v23 = vmin.f32 %v1669_v40, 0.0  ;;  %1877 = vst.msk [vmem:[%s3267_s23 + $0x40] sm:$0xff] %vm1207_vm0, %v1845_v33  ;;  %v1814_v52 = vmul.f32 %v3231_v8, %v1781_v41  ;;  %v1661_v44 = vadd.f32 %v1660_v25, %v1500_v51  ;;  %v549_v34 = vpop.permute.xlu1 %548 }
 0x16f   : > { %v2324_v3 = vpop.f32.mrf.mxu1  ;;  %v2394_v26 = vpop.f32.mrf.mxu0  ;;  %v1754_v53 = vmax.f32 %v1669_v40, 0.0  ;;  %v2211_v56 = vadd.f32 %v3541_v60, %v3540_v57  ;;  %v1371_v36 = vadd.f32 %v2205_v20, %v534_v39  ;;  %v2308_v0 = vadd.f32 %v3269_v38, %v3254_v61 }
 0x170   : > { %1880 = vst.msk [vmem:[%s3267_s23 + $0x58] sm:$0xff] %vm1207_vm0, %v1848_v31  ;;  %v1819_v45 = vmul.f32 %v3231_v8, %v1786_v23  ;;  %v1672_v4 = vadd.f32 %v2394_v26, %v1511_v43  ;;  %v1846_v42 = vadd.f32 %v1814_v52, %v1749_v63  ;;  %v1784_v9 = vmin.f32 %v1661_v44, 0.0  ;;  %v3401_v23 = vpop.permute.xlu0 %553  ;;  %v3543_v43 = vld [vmem:[#allocation31_spill] sm:$0xff] }
 0x171   : > { %v2325_v46 = vpop.f32.mrf.mxu1  ;;  %v1663_v59 = vpop.f32.mrf.mxu0  ;;  %v1752_v37 = vmax.f32 %v1661_v44, 0.0  ;;  %v1516_v40 = vadd.f32 %v2305_v21, %v3319_v15  ;;  %v2323_v39 = vadd.f32 %v2322_v58, %v2321_v50  ;;  %v1527_v41 = vadd.f32 %v2314_v62, %v1366_v49  ;;  %v3542_v15 = vld [vmem:[#allocation30_spill] sm:$0xff] }
 0x172   : > { %v1851_v14 = vadd.f32 %v1819_v45, %v1754_v53  ;;  %v1787_v19 = vmin.f32 %v1672_v4, 0.0  ;;  %1878 = vst.msk [vmem:[%s3267_s23 + $0x48] sm:$0xff] %vm1207_vm0, %v1846_v42  ;;  %v1817_v13 = vmul.f32 %v3231_v8, %v1784_v9  ;;  %v1664_v24 = vadd.f32 %v1663_v59, %v1503_v54  ;;  %v3544_v42 = vld [vmem:[#allocation22_spill] sm:$0xff]  ;;  %v3545_v9 = vld [vmem:[#allocation24_spill] sm:$0xff] }
 0x173   : > { %v3386_v27 = vpop.f32.mrf.mxu1  ;;  %v2397_v6 = vpop.f32.mrf.mxu0  ;;  %v1755_v7 = vmax.f32 %v1672_v4, 0.0  ;;  %v1379_v51 = vadd.f32 %v2211_v56, %v544_v32  ;;  %v2214_v63 = vadd.f32 %v3543_v43, %v3542_v15  ;;  %v2317_v52 = vadd.f32 %v3326_v29, %v3317_v30 }
 0x174   : > { %1883 = vst.msk [vmem:[%s3267_s23 + $0x70] sm:$0xff] %vm1207_vm0, %v1851_v14  ;;  %v1820_v10 = vmul.f32 %v3231_v8, %v1787_v19  ;;  %v1685_v55 = vadd.f32 %v2397_v6, %v1524_v28  ;;  %v1849_v48 = vadd.f32 %v1817_v13, %v1752_v37  ;;  %v1785_v1 = vmin.f32 %v1664_v24, 0.0  ;;  %v559_v14 = vpop.permute.xlu1 %558  ;;  %v564_v19 = vpop.permute.xlu0 %563 }
 0x175   : > { %v3393_v17 = vpop.f32.mrf.mxu1  ;;  %v1676_v22 = vpop.f32.mrf.mxu0  ;;  %v1753_v25 = vmax.f32 %v1664_v24, 0.0  ;;  %v1519_v12 = vadd.f32 %v2308_v0, %v3332_v11  ;;  %v2326_v53 = vadd.f32 %v2325_v46, %v2324_v3  ;;  %v1540_v21 = vadd.f32 %v2323_v39, %v1379_v51 }
 0x176   : > { %v1852_v16 = vadd.f32 %v1820_v10, %v1755_v7  ;;  %v1790_v33 = vmin.f32 %v1685_v55, 0.0  ;;  %1881 = vst.msk [vmem:[%s3267_s23 + $0x60] sm:$0xff] %vm1207_vm0, %v1849_v48  ;;  %v1818_v18 = vmul.f32 %v3231_v8, %v1785_v1  ;;  %v1677_v61 = vadd.f32 %v1676_v22, %v1516_v40 }
 0x177   : > { %v3399_v38 = vpop.f32.mrf.mxu1  ;;  %v2398_v31 = vpop.f32.mrf.mxu0  ;;  %v1758_v50 = vmax.f32 %v1685_v55, 0.0  ;;  %v2208_v54 = vadd.f32 %v3545_v9, %v3544_v42  ;;  %v1382_v11 = vadd.f32 %v2214_v63, %v549_v34  ;;  %v2320_v57 = vadd.f32 %v3346_v5, %v3337_v47  ;;  %v3546_v5 = vld [vmem:[#allocation5_spill] sm:$0xff] }
 0x178   : > { %1884 = vst.msk [vmem:[%s3267_s23 + $0x78] sm:$0xff] %vm1207_vm0, %v1852_v16  ;;  %v1823_v58 = vmul.f32 %v3231_v8, %v1790_v33  ;;  %v1688_v49 = vadd.f32 %v2398_v31, %v1527_v41  ;;  %v1850_v44 = vadd.f32 %v1818_v18, %v1753_v25  ;;  %v1788_v26 = vmin.f32 %v1677_v61, 0.0  ;;  %v569_v39 = vpop.permute.xlu1 %568 }
 0x179   : > { %v3410_v35 = vpop.f32.mrf.mxu1  ;;  %v1679_v20 = vpop.f32.mrf.mxu0  ;;  %v1756_v59 = vmax.f32 %v1677_v61, 0.0  ;;  %v1532_v13 = vadd.f32 %v2317_v52, %v1371_v36  ;;  %v1543_v55 = vadd.f32 %v2326_v53, %v1382_v11  ;;  %v1374_v0 = vadd.f32 %v2208_v54, %v3369_v2 }
 0x17a   : > { %v1855_v45 = vadd.f32 %v1823_v58, %v1758_v50  ;;  %v1791_v4 = vmin.f32 %v1688_v49, 0.0  ;;  %1882 = vst.msk [vmem:[%s3267_s23 + $0x68] sm:$0xff] %vm1207_vm0, %v1850_v44  ;;  %v1821_v30 = vmul.f32 %v3231_v8, %v1788_v26  ;;  %v1680_v29 = vadd.f32 %v1679_v20, %v1519_v12  ;;  %v3547_v50 = vld [vmem:[#allocation3_spill] sm:$0xff]  ;;  %v3548_v26 = vld [vmem:[#allocation6_spill] sm:$0xff] }
 0x17b   : > { %v2333_v32 = vpop.f32.mrf.mxu1  ;;  %v2401_v62 = vpop.f32.mrf.mxu0  ;;  %v1759_v3 = vmax.f32 %v1688_v49, 0.0  ;;  %v1395_v34 = vadd.f32 %v3546_v5, %v564_v19  ;;  %v2329_v2 = vadd.f32 %v3393_v17, %v3386_v27  ;;  %v1535_v18 = vadd.f32 %v2320_v57, %v1374_v0 }
 0x17c   : > { %1887 = vst.msk [vmem:[%s3267_s23 + $0x90] sm:$0xff] %vm1207_vm0, %v1855_v45  ;;  %v1824_v46 = vmul.f32 %v3231_v8, %v1791_v4  ;;  %v1701_v28 = vadd.f32 %v2401_v62, %v1540_v21  ;;  %v1853_v60 = vadd.f32 %v1821_v30, %v1756_v59  ;;  %v1789_v56 = vmin.f32 %v1680_v29, 0.0  ;;  %v574_v59 = vpop.permute.xlu0 %573  ;;  %v3549_v62 = vld [vmem:[#allocation4_spill] sm:$0xff] }
 0x17d   : > { %v2334_v37 = vpop.f32.mrf.mxu1  ;;  %v1692_v24 = vpop.f32.mrf.mxu0  ;;  %v1757_v48 = vmax.f32 %v1680_v29, 0.0  ;;  %v1387_v58 = vadd.f32 %v3547_v50, %v3401_v23  ;;  %v1398_v12 = vadd.f32 %v3548_v26, %v569_v39  ;;  %v2332_v23 = vadd.f32 %v3410_v35, %v3399_v38 }
 0x17e   : > { %v1856_v6 = vadd.f32 %v1824_v46, %v1759_v3  ;;  %v1794_v7 = vmin.f32 %v1701_v28, 0.0  ;;  %v2335_v10 = vadd.f32 %v2334_v37, %v2333_v32  ;;  %1885 = vst.msk [vmem:[%s3267_s23 + $0x80] sm:$0xff] %vm1207_vm0, %v1853_v60  ;;  %v1822_v1 = vmul.f32 %v3231_v8, %v1789_v56 }
 0x17f   : > { %v1693_v40 = vadd.f32 %v1692_v24, %v1532_v13  ;;  %v2336_v22 = vpop.f32.mrf.mxu1  ;;  %v2402_v47 = vpop.f32.mrf.mxu0  ;;  %v1762_v36 = vmax.f32 %v1701_v28, 0.0  ;;  %v1548_v9 = vadd.f32 %v2329_v2, %v1387_v58  ;;  %v1390_v19 = vadd.f32 %v3549_v62, %v559_v14  ;;  %v3551_v2 = vld [vmem:[#allocation8_spill] sm:$0xff] }
 0x180   : > { %1888 = vst.msk [vmem:[%s3267_s23 + $0x98] sm:$0xff] %vm1207_vm0, %v1856_v6  ;;  %v1827_v16 = vmul.f32 %v3231_v8, %v1794_v7  ;;  %v1704_v33 = vadd.f32 %v2402_v47, %v1543_v55  ;;  %v1854_v41 = vadd.f32 %v1822_v1, %v1757_v48  ;;  %v1556_v63 = vadd.f32 %v2335_v10, %v1395_v34  ;;  %v3550_v7 = vld [vmem:[#allocation7_spill] sm:$0xff]  ;;  %v579_v55 = vpop.permute.xlu1 %578  ;;  %v584_v0 = vpop.permute.xlu0 %583 }
 0x181   : > { %v1792_v51 = vmin.f32 %v1693_v40, 0.0  ;;  %v2337_v25 = vpop.f32.mrf.mxu1  ;;  %v1695_v61 = vpop.f32.mrf.mxu0  ;;  %v1760_v49 = vmax.f32 %v1693_v40, 0.0  ;;  %v1551_v24 = vadd.f32 %v2332_v23, %v1390_v19  ;;  %v1403_v10 = vadd.f32 %v3550_v7, %v574_v59 }
 0x182   : > { %v1859_v31 = vadd.f32 %v1827_v16, %v1762_v36  ;;  %v1795_v15 = vmin.f32 %v1704_v33, 0.0  ;;  %v2338_v43 = vadd.f32 %v2337_v25, %v2336_v22  ;;  %1886 = vst.msk [vmem:[%s3267_s23 + $0x88] sm:$0xff] %vm1207_vm0, %v1854_v41  ;;  %v1696_v44 = vadd.f32 %v1695_v61, %v1535_v18 }
 0x183   : > { %v1825_v52 = vmul.f32 %v3231_v8, %v1792_v51  ;;  %v2339_v27 = vpop.f32.mrf.mxu1  ;;  %v2405_v17 = vpop.f32.mrf.mxu0  ;;  %v1763_v20 = vmax.f32 %v1704_v33, 0.0  ;;  %v1406_v41 = vadd.f32 %v3551_v2, %v579_v55 }
 0x184   : > { %1891 = vst.msk [vmem:[%s3267_s23 + $0xb0] sm:$0xff] %vm1207_vm0, %v1859_v31  ;;  %v1828_v53 = vmul.f32 %v3231_v8, %v1795_v15  ;;  %v1717_v45 = vadd.f32 %v2405_v17, %v1556_v63  ;;  %v1793_v21 = vmin.f32 %v1696_v44, 0.0  ;;  %v1559_v32 = vadd.f32 %v2338_v43, %v1398_v12  ;;  %v3552_v31 = vld [vmem:[#allocation9_spill] sm:$0xff]  ;;  %v589_v43 = vpop.permute.xlu1 %588 }
 0x185   : > { %v1857_v4 = vadd.f32 %v1825_v52, %v1760_v49  ;;  %v2340_v42 = vpop.f32.mrf.mxu1  ;;  %v1708_v54 = vpop.f32.mrf.mxu0  ;;  %v1761_v11 = vmax.f32 %v1696_v44, 0.0  ;;  %v1411_v15 = vadd.f32 %v3552_v31, %v584_v0 }
 0x186   : > { %v1860_v30 = vadd.f32 %v1828_v53, %v1763_v20  ;;  %v1798_v29 = vmin.f32 %v1717_v45, 0.0  ;;  %v1826_v3 = vmul.f32 %v3231_v8, %v1793_v21  ;;  %v1709_v46 = vadd.f32 %v1708_v54, %v1548_v9  ;;  %v3553_v20 = vld [vmem:[#allocation10_spill] sm:$0xff] }
 0x187   : > { %1889 = vst.msk [vmem:[%s3267_s23 + $0xa0] sm:$0xff] %vm1207_vm0, %v1857_v4  ;;  %v2342_v28 = vpop.f32.mrf.mxu1  ;;  %v2406_v38 = vpop.f32.mrf.mxu0  ;;  %v1766_v35 = vmax.f32 %v1717_v45, 0.0  ;;  %v2341_v60 = vadd.f32 %v2340_v42, %v2339_v27  ;;  %v1414_v53 = vadd.f32 %v3553_v20, %v589_v43 }
 0x188   : > { %1892 = vst.msk [vmem:[%s3267_s23 + $0xb8] sm:$0xff] %vm1207_vm0, %v1860_v30  ;;  %v1831_v57 = vmul.f32 %v3231_v8, %v1798_v29  ;;  %v1720_v56 = vadd.f32 %v2406_v38, %v1559_v32  ;;  %v1858_v37 = vadd.f32 %v1826_v3, %v1761_v11  ;;  %v1796_v13 = vmin.f32 %v1709_v46, 0.0 }
 0x189   : > { %v2343_v14 = vpop.f32.mrf.mxu1  ;;  %v1711_v6 = vpop.f32.mrf.mxu0  ;;  %v1764_v40 = vmax.f32 %v1709_v46, 0.0  ;;  %v1564_v33 = vadd.f32 %v2341_v60, %v1403_v10 }
 0x18a   : > { %v1863_v48 = vadd.f32 %v1831_v57, %v1766_v35  ;;  %v1799_v1 = vmin.f32 %v1720_v56, 0.0  ;;  %1890 = vst.msk [vmem:[%s3267_s23 + $0xa8] sm:$0xff] %vm1207_vm0, %v1858_v37  ;;  %v1829_v22 = vmul.f32 %v3231_v8, %v1796_v13  ;;  %v1712_v47 = vadd.f32 %v1711_v6, %v1551_v24 }
 0x18b   : > { %v2345_v5 = vpop.f32.mrf.mxu1  ;;  %v2409_v34 = vpop.f32.mrf.mxu0  ;;  %v1767_v39 = vmax.f32 %v1720_v56, 0.0  ;;  %v2344_v16 = vadd.f32 %v2343_v14, %v2342_v28 }
 0x18c   : > { %1895 = vst.msk [vmem:[%s3267_s23 + $0xd0] sm:$0xff] %vm1207_vm0, %v1863_v48  ;;  %v1832_v36 = vmul.f32 %v3231_v8, %v1799_v1  ;;  %v1861_v51 = vadd.f32 %v1829_v22, %v1764_v40  ;;  %v1797_v25 = vmin.f32 %v1712_v47, 0.0  ;;  %v1765_v49 = vmax.f32 %v1712_v47, 0.0 }
 0x18d   : > { %v2346_v18 = vpop.f32.mrf.mxu1  ;;  %v1724_v61 = vpop.f32.mrf.mxu0  ;;  %v1567_v12 = vadd.f32 %v2344_v16, %v1406_v41 }
 0x18e   : > { %v1864_v63 = vadd.f32 %v1832_v36, %v1767_v39  ;;  %v2347_v50 = vadd.f32 %v2346_v18, %v2345_v5  ;;  %v1725_v58 = vadd.f32 %v1724_v61, %v1564_v33  ;;  %1893 = vst.msk [vmem:[%s3267_s23 + $0xc0] sm:$0xff] %vm1207_vm0, %v1861_v51  ;;  %v1830_v52 = vmul.f32 %v3231_v8, %v1797_v25 }
 0x18f   : > { %v2348_v44 = vpop.f32.mrf.mxu1  ;;  %v2410_v27 = vpop.f32.mrf.mxu0 }
 0x190   : > { %1896 = vst.msk [vmem:[%s3267_s23 + $0xd8] sm:$0xff] %vm1207_vm0, %v1864_v63  ;;  %v1572_v17 = vadd.f32 %v2347_v50, %v1411_v15  ;;  %v1800_v26 = vmin.f32 %v1725_v58, 0.0  ;;  %v1862_v45 = vadd.f32 %v1830_v52, %v1765_v49  ;;  %v1768_v23 = vmax.f32 %v1725_v58, 0.0 }
 0x191   : > { %v2349_v4 = vpop.f32.mrf.mxu1  ;;  %v1727_v21 = vpop.f32.mrf.mxu0 }
 0x192   : > { %v1733_v42 = vadd.f32 %v2409_v34, %v1572_v17  ;;  %v1833_v9 = vmul.f32 %v3231_v8, %v1800_v26  ;;  %v2350_v54 = vadd.f32 %v2349_v4, %v2348_v44  ;;  %v1728_v59 = vadd.f32 %v1727_v21, %v1567_v12  ;;  %1894 = vst.msk [vmem:[%s3267_s23 + $0xc8] sm:$0xff] %vm1207_vm0, %v1862_v45 }
 0x194   : > { %v1802_v30 = vmin.f32 %v1733_v42, 0.0  ;;  %v1865_v29 = vadd.f32 %v1833_v9, %v1768_v23  ;;  %v1575_v32 = vadd.f32 %v2350_v54, %v1414_v53  ;;  %v1801_v62 = vmin.f32 %v1728_v59, 0.0 }
 0x195   : > { %v1770_v19 = vmax.f32 %v1733_v42, 0.0  ;;  %v1769_v46 = vmax.f32 %v1728_v59, 0.0 }
 0x196   : > { %v1835_v11 = vmul.f32 %v3231_v8, %v1802_v30  ;;  %1897 = vst.msk [vmem:[%s3267_s23 + $0xe0] sm:$0xff] %vm1207_vm0, %v1865_v29  ;;  %v1736_v3 = vadd.f32 %v2410_v27, %v1575_v32  ;;  %v1834_v28 = vmul.f32 %v3231_v8, %v1801_v62 }
 0x198   : > { %v1867_v38 = vadd.f32 %v1835_v11, %v1770_v19  ;;  %v1803_v35 = vmin.f32 %v1736_v3, 0.0  ;;  %v1866_v57 = vadd.f32 %v1834_v28, %v1769_v46  ;;  %v1771_v60 = vmax.f32 %v1736_v3, 0.0 }
 0x19a   : > { %1899 = vst.msk [vmem:[%s3267_s23 + $0xf0] sm:$0xff] %vm1207_vm0, %v1867_v38  ;;  %v1836_v56 = vmul.f32 %v3231_v8, %v1803_v35  ;;  %1898 = vst.msk [vmem:[%s3267_s23 + $0xe8] sm:$0xff] %vm1207_vm0, %v1866_v57 }
 0x19c   : > { %v1868_v37 = vadd.f32 %v1836_v56, %v1771_v60 }
 0x19e   : > { %1900 = vst.msk [vmem:[%s3267_s23 + $0xf8] sm:$0xff] %vm1207_vm0, %v1868_v37 }
 0x19f PF: > { %s15_s19 = sadd.s32 1, %s2625_s19   ;;  %s3554_s17 = smov %s2621_s18 }
 0x1a0   : > { %p12_p5 = scmp.ge.s32.totalorder %s15_s19, 4   ;;  %s3555_s18 = smov %s3557_s3 }
 0x1a2   :  { %14 = sbr.rel (!%p12_p5) target bundleno = 2 (0x2), region = 66 }

// kernel: multisource_projection.22
= control target key start
LH: loop header
LB: loop body
LE: loop exit
PB: predicated region body
PF: predicated region fallthrough
CT: control target
= control target key end

     0   :  { %s1576_s17 = smov 0   ;;  %s1578_s18 = smov 0   ;;  %s1831_s0 = inlined_call_operand.vmem [shape: bf16[64,576], index: 0, kind: input, shape index: {}]   ;;  %s1832_s1 = inlined_call_operand.vmem [shape: bf16[2,576,256], index: 1, kind: input, shape index: {}]   ;;  %s1833_s2 = inlined_call_operand.vmem [shape: f32[64,1], index: 2, kind: input, shape index: {}]   ;;  %s1834_s3 = inlined_call_operand.<no memory space> [shape: f32[1], index: 3, kind: input, shape index: {}]   ;;  %s1835_s4 = inlined_call_operand.vmem [shape: f32[2,64,256], index: 4, kind: output, shape index: {}]  }
   0x1   :  { %9 = sst [smem:[#allocation2]] %s1834_s3  ;;  %s1580_s19 = smov 0  }
   0x2 LB: > { %s27_s3 = sadd.s32 1, %s1541_s18  ;;  %p1248_p0 = scmp.ge.s32.totalorder %s1545_s19, 1  ;;  %s1545_s19 = sphi %s1580_s19, %s15_s19   ;;  %s1541_s18 = sphi %s1578_s18, %s1837_s18   ;;  %s1537_s17 = sphi %s1576_s17, %s1836_s17  }
   0x3   : > { %p29_p1 = scmp.ge.s32.totalorder %s27_s3, 2  ;;  %p184_p2 = scmp.lt.s32.totalorder %s1545_s19, 3 }
   0x5   : > { %s1839_s3 = smov (%p29_p1, %s27_s3), 0  ;;  %p185_p3 = pnand %p1248_p0, %p184_p2 }
   0x6   : > { %p219_p4 = scmp.lt.s32.totalorder (!%p185_p3), %s1537_s17, 1  ;;  %s1075_s9 = sld [smem:[#allocation2]] (!%p185_p3) }
   0x7   : > { %188 = sbr.rel (%p185_p3) target bundleno = 332 (0x14c), region = 36 }
   0xc   : > { %v1485_v0 = vld [vmem:[%s1831_s0 + $0x4] ss:$20 sps:$4 sm:$0xff]   ;;  %v1547_v1 = vmov 0   ;;  %s1841_s17 = smov (!%p219_p4, %s1537_s17), 1  ;;  %v1488_v2 = vld [vmem:[%s1831_s0 + $0xc] ss:$20 sps:$4 sm:$0xff]  }
   0xd   : > { %1385 = vset.pattern.permute.xlu0 %v1547_v1  ;;  %1386 = vset.pattern.permute.xlu1 %v1547_v1  ;;  %s1359_s24 = smul.u32 576, %s1841_s17  ;;  %v335_v61 = vld [vmem:[%s1833_s2] sm:$0xff]  ;;  %vm843_vm0 = vcmask 523264   ;;  %s1350_s10 = sshll.u32 %s1841_s17, 7 }
   0xe   : > { %888 = vmatprep.mubr.bf16.mxu0 %v1485_v0  ;;  %961 = vmatprep.mubr.bf16.mxu1 %v1488_v2  ;;  %v337_v0 = vld [vmem:[%s1833_s2 + $0x10] sm:$0xff]  ;;  %s1784_s13 = scalar_lea.vmem %s1835_s4, %s1350_s10 }
   0xf   : > { %s1608_s27 = scalar_lea.vmem %s1832_s1, %s1359_s24  ;;  %345 = vperm.xlu0 %1385, %v335_v61   ;;  %355 = vperm.xlu1 %1386, %v337_v0  }
  0x10   : > { %v1387_v3 = vld [vmem:[%s1608_s27 + $0x74] ss:$8 sps:$4 sm:$0xff]   ;;  %v1391_v5 = vld [vmem:[%s1608_s27 + $0x70] ss:$8 sps:$4 sm:$0xff]   ;;  %v1393_v7 = vld [vmem:[%s1608_s27 + $0x64] ss:$8 sps:$4 sm:$0xff]  }
  0x11   : > { %v1389_v4 = vld [vmem:[%s1608_s27 + $0x174] ss:$8 sps:$4 sm:$0xff]   ;;  %856 = vmatprep.subr.bf16.mxu0 %v1387_v3  ;;  %v1392_v6 = vld [vmem:[%s1608_s27 + $0x170] ss:$8 sps:$4 sm:$0xff]   ;;  %v1395_v8 = vld [vmem:[%s1608_s27 + $0x164] ss:$8 sps:$4 sm:$0xff]  }
  0x12   : > { %929 = vmatprep.subr.bf16.mxu1 %v1389_v4  ;;  %857 = vmatpush1.bf16.msra.mxu0 %v1391_v5  ;;  %v1397_v9 = vld [vmem:[%s1608_s27 + $0x60] ss:$8 sps:$4 sm:$0xff]   ;;  %v1399_v11 = vld [vmem:[%s1608_s27 + $0x54] ss:$8 sps:$4 sm:$0xff]   ;;  %v1403_v13 = vld [vmem:[%s1608_s27 + $0x50] ss:$8 sps:$4 sm:$0xff]  }
  0x13   : > { %930 = vmatpush1.bf16.msra.mxu1 %v1392_v6  ;;  %858 = vmatprep.subr.bf16.mxu0 %v1393_v7  ;;  %v1398_v10 = vld [vmem:[%s1608_s27 + $0x160] ss:$8 sps:$4 sm:$0xff]   ;;  %v1401_v12 = vld [vmem:[%s1608_s27 + $0x154] ss:$8 sps:$4 sm:$0xff]   ;;  %v1404_v14 = vld [vmem:[%s1608_s27 + $0x150] ss:$8 sps:$4 sm:$0xff]  }
  0x14   : > { %931 = vmatprep.subr.bf16.mxu1 %v1395_v8  ;;  %v1405_v15 = vld [vmem:[%s1608_s27 + $0x44] ss:$8 sps:$4 sm:$0xff]   ;;  %v1409_v17 = vld [vmem:[%s1608_s27 + $0x40] ss:$8 sps:$4 sm:$0xff]   ;;  %v1411_v19 = vld [vmem:[%s1608_s27 + $0x34] ss:$8 sps:$4 sm:$0xff]  }
  0x15   : > { %v1407_v16 = vld [vmem:[%s1608_s27 + $0x144] ss:$8 sps:$4 sm:$0xff]   ;;  %v1410_v18 = vld [vmem:[%s1608_s27 + $0x140] ss:$8 sps:$4 sm:$0xff]   ;;  %v1413_v20 = vld [vmem:[%s1608_s27 + $0x134] ss:$8 sps:$4 sm:$0xff]  }
  0x16   : > { %859 = vmatpush1.bf16.msra.mxu0 %v1397_v9  ;;  %v1415_v21 = vld [vmem:[%s1608_s27 + $0x30] ss:$8 sps:$4 sm:$0xff]   ;;  %v1417_v23 = vld [vmem:[%s1608_s27 + $0x24] ss:$8 sps:$4 sm:$0xff]   ;;  %v1421_v25 = vld [vmem:[%s1608_s27 + $0x20] ss:$8 sps:$4 sm:$0xff]  }
  0x17   : > { %932 = vmatpush1.bf16.msra.mxu1 %v1398_v10  ;;  %860 = vmatprep.subr.bf16.mxu0 %v1399_v11  ;;  %v1416_v22 = vld [vmem:[%s1608_s27 + $0x130] ss:$8 sps:$4 sm:$0xff]   ;;  %v1419_v24 = vld [vmem:[%s1608_s27 + $0x124] ss:$8 sps:$4 sm:$0xff]   ;;  %v1422_v26 = vld [vmem:[%s1608_s27 + $0x120] ss:$8 sps:$4 sm:$0xff]  }
  0x18   : > { %933 = vmatprep.subr.bf16.mxu1 %v1401_v12  ;;  %v1423_v27 = vld [vmem:[%s1608_s27 + $0x14] ss:$8 sps:$4 sm:$0xff]   ;;  %v1427_v29 = vld [vmem:[%s1608_s27 + $0x10] ss:$8 sps:$4 sm:$0xff]   ;;  %v1429_v31 = vld [vmem:[%s1608_s27 + $0x4] ss:$8 sps:$4 sm:$0xff]  }
  0x19   : > { %v1425_v28 = vld [vmem:[%s1608_s27 + $0x114] ss:$8 sps:$4 sm:$0xff]   ;;  %v1428_v30 = vld [vmem:[%s1608_s27 + $0x110] ss:$8 sps:$4 sm:$0xff]   ;;  %v1431_v32 = vld [vmem:[%s1608_s27 + $0x104] ss:$8 sps:$4 sm:$0xff]  }
  0x1a   : > { %861 = vmatpush1.bf16.msra.mxu0 %v1403_v13  ;;  %v1433_v33 = vld [vmem:[%s1608_s27] ss:$8 sps:$4 sm:$0xff]   ;;  %v1435_v35 = vld [vmem:[%s1608_s27 + $0xf4] ss:$8 sps:$4 sm:$0xff]   ;;  %v1439_v37 = vld [vmem:[%s1608_s27 + $0xf0] ss:$8 sps:$4 sm:$0xff]  }
  0x1b   : > { %934 = vmatpush1.bf16.msra.mxu1 %v1404_v14  ;;  %862 = vmatprep.subr.bf16.mxu0 %v1405_v15  ;;  %v1434_v34 = vld [vmem:[%s1608_s27 + $0x100] ss:$8 sps:$4 sm:$0xff]   ;;  %v1437_v36 = vld [vmem:[%s1608_s27 + $0x1f4] ss:$8 sps:$4 sm:$0xff]   ;;  %v1440_v38 = vld [vmem:[%s1608_s27 + $0x1f0] ss:$8 sps:$4 sm:$0xff]  }
  0x1c   : > { %935 = vmatprep.subr.bf16.mxu1 %v1407_v16  ;;  %v1441_v39 = vld [vmem:[%s1608_s27 + $0xe4] ss:$8 sps:$4 sm:$0xff]   ;;  %v1445_v41 = vld [vmem:[%s1608_s27 + $0xe0] ss:$8 sps:$4 sm:$0xff]   ;;  %v1447_v43 = vld [vmem:[%s1608_s27 + $0xd4] ss:$8 sps:$4 sm:$0xff]  }
  0x1d   : > { %v1443_v40 = vld [vmem:[%s1608_s27 + $0x1e4] ss:$8 sps:$4 sm:$0xff]   ;;  %v1446_v42 = vld [vmem:[%s1608_s27 + $0x1e0] ss:$8 sps:$4 sm:$0xff]   ;;  %v1449_v44 = vld [vmem:[%s1608_s27 + $0x1d4] ss:$8 sps:$4 sm:$0xff]  }
  0x1e   : > { %863 = vmatpush1.bf16.msra.mxu0 %v1409_v17  ;;  %v1451_v45 = vld [vmem:[%s1608_s27 + $0xd0] ss:$8 sps:$4 sm:$0xff]   ;;  %v1453_v47 = vld [vmem:[%s1608_s27 + $0xc4] ss:$8 sps:$4 sm:$0xff]   ;;  %v1457_v49 = vld [vmem:[%s1608_s27 + $0xc0] ss:$8 sps:$4 sm:$0xff]  }
  0x1f   : > { %936 = vmatpush1.bf16.msra.mxu1 %v1410_v18  ;;  %864 = vmatprep.subr.bf16.mxu0 %v1411_v19  ;;  %v1452_v46 = vld [vmem:[%s1608_s27 + $0x1d0] ss:$8 sps:$4 sm:$0xff]   ;;  %v1455_v48 = vld [vmem:[%s1608_s27 + $0x1c4] ss:$8 sps:$4 sm:$0xff]   ;;  %v1458_v50 = vld [vmem:[%s1608_s27 + $0x1c0] ss:$8 sps:$4 sm:$0xff]  }
  0x20   : > { %937 = vmatprep.subr.bf16.mxu1 %v1413_v20  ;;  %v1459_v51 = vld [vmem:[%s1608_s27 + $0xb4] ss:$8 sps:$4 sm:$0xff]   ;;  %v1463_v53 = vld [vmem:[%s1608_s27 + $0xb0] ss:$8 sps:$4 sm:$0xff]   ;;  %v1465_v55 = vld [vmem:[%s1608_s27 + $0xa4] ss:$8 sps:$4 sm:$0xff]  }
  0x21   : > { %v1461_v52 = vld [vmem:[%s1608_s27 + $0x1b4] ss:$8 sps:$4 sm:$0xff]   ;;  %v1464_v54 = vld [vmem:[%s1608_s27 + $0x1b0] ss:$8 sps:$4 sm:$0xff]   ;;  %v1467_v56 = vld [vmem:[%s1608_s27 + $0x1a4] ss:$8 sps:$4 sm:$0xff]  }
  0x22   : > { %865 = vmatpush1.bf16.msra.mxu0 %v1415_v21  ;;  %v1469_v57 = vld [vmem:[%s1608_s27 + $0xa0] ss:$8 sps:$4 sm:$0xff]   ;;  %v1471_v59 = vld [vmem:[%s1608_s27 + $0x94] ss:$8 sps:$4 sm:$0xff]   ;;  %v1475_v62 = vld [vmem:[%s1608_s27 + $0x90] ss:$8 sps:$4 sm:$0xff]  }
  0x23   : > { %938 = vmatpush1.bf16.msra.mxu1 %v1416_v22  ;;  %866 = vmatprep.subr.bf16.mxu0 %v1417_v23  ;;  %v1470_v58 = vld [vmem:[%s1608_s27 + $0x1a0] ss:$8 sps:$4 sm:$0xff]   ;;  %v1473_v60 = vld [vmem:[%s1608_s27 + $0x194] ss:$8 sps:$4 sm:$0xff]   ;;  %v1476_v63 = vld [vmem:[%s1608_s27 + $0x190] ss:$8 sps:$4 sm:$0xff]  }
  0x24   : > { %939 = vmatprep.subr.bf16.mxu1 %v1419_v24  ;;  %v1477_v2 = vld [vmem:[%s1608_s27 + $0x84] ss:$8 sps:$4 sm:$0xff]   ;;  %v338_v5 = vld [vmem:[%s1833_s2 + $0x18] sm:$0xff]  ;;  %v1481_v6 = vld [vmem:[%s1608_s27 + $0x80] ss:$8 sps:$4 sm:$0xff]  }
  0x25   : > { %v1479_v3 = vld [vmem:[%s1608_s27 + $0x184] ss:$8 sps:$4 sm:$0xff]   ;;  %v1482_v7 = vld [vmem:[%s1608_s27 + $0x180] ss:$8 sps:$4 sm:$0xff]   ;;  %v1491_v8 = vld [vmem:[%s1608_s27 + $0x234] ss:$8 sps:$4 sm:$0xff]   ;;  %360 = vperm.xlu1 %1386, %v338_v5  }
  0x26   : > { %867 = vmatpush1.bf16.msra.mxu0 %v1421_v25  ;;  %v336_v4 = vld [vmem:[%s1833_s2 + $0x8] sm:$0xff]  ;;  %v1483_v9 = vld [vmem:[%s1831_s0] ss:$20 sps:$4 sm:$0xff]   ;;  %v1489_v13 = vld [vmem:[%s1608_s27 + $0x230] ss:$8 sps:$4 sm:$0xff]  }
  0x27   : > { %940 = vmatpush1.bf16.msra.mxu1 %v1422_v26  ;;  %868 = vmatprep.subr.bf16.mxu0 %v1423_v27  ;;  %v1486_v10 = vld [vmem:[%s1831_s0 + $0x8] ss:$20 sps:$4 sm:$0xff]   ;;  %v339_v11 = vld [vmem:[%s1833_s2 + $0x20] sm:$0xff]  ;;  %v341_v18 = vld [vmem:[%s1833_s2 + $0x30] sm:$0xff] }
  0x28   : > { %941 = vmatprep.subr.bf16.mxu1 %v1425_v28  ;;  %350 = vperm.xlu0 %1385, %v336_v4   ;;  %v340_v12 = vld [vmem:[%s1833_s2 + $0x28] sm:$0xff]  ;;  %v342_v19 = vld [vmem:[%s1833_s2 + $0x38] sm:$0xff]  ;;  %v1497_v22 = vld [vmem:[%s1831_s0 + $0x30] ss:$20 sps:$4 sm:$0xff]  }
  0x29   : > { %v1492_v14 = vld [vmem:[%s1831_s0 + $0x2c] ss:$20 sps:$4 sm:$0xff]   ;;  %v1494_v15 = vld [vmem:[%s1831_s0 + $0x34] ss:$20 sps:$4 sm:$0xff]   ;;  %370 = vperm.xlu1 %1386, %v340_v12   ;;  %v1503_v24 = vld [vmem:[%s1831_s0 + $0x5c] ss:$20 sps:$4 sm:$0xff]  }
  0x2a   : > { %869 = vmatpush1.bf16.msra.mxu0 %v1427_v29  ;;  %v1500_v16 = vld [vmem:[%s1608_s27 + $0x224] ss:$8 sps:$4 sm:$0xff]   ;;  %v1498_v17 = vld [vmem:[%s1608_s27 + $0x220] ss:$8 sps:$4 sm:$0xff]   ;;  %v1509_v20 = vld [vmem:[%s1608_s27 + $0x214] ss:$8 sps:$4 sm:$0xff]  }
  0x2b   : > { %942 = vmatpush1.bf16.msra.mxu1 %v1428_v30  ;;  %870 = vmatprep.subr.bf16.mxu0 %v1429_v31  ;;  %v1496_v21 = vld [vmem:[%s1831_s0 + $0x28] ss:$20 sps:$4 sm:$0xff]   ;;  %v1507_v25 = vld [vmem:[%s1608_s27 + $0x210] ss:$8 sps:$4 sm:$0xff]   ;;  %v1518_v26 = vld [vmem:[%s1608_s27 + $0x204] ss:$8 sps:$4 sm:$0xff]  }
  0x2c   : > { %943 = vmatprep.subr.bf16.mxu1 %v1431_v32  ;;  %365 = vperm.xlu0 %1385, %v339_v11   ;;  %v1501_v23 = vld [vmem:[%s1831_s0 + $0x54] ss:$20 sps:$4 sm:$0xff]   ;;  %v1505_v28 = vld [vmem:[%s1831_s0 + $0x50] ss:$20 sps:$4 sm:$0xff]   ;;  %v1506_v29 = vld [vmem:[%s1831_s0 + $0x58] ss:$20 sps:$4 sm:$0xff]  }
  0x2d   : > { %380 = vperm.xlu1 %1386, %v342_v19   ;;  %v1516_v27 = vld [vmem:[%s1608_s27 + $0x200] ss:$8 sps:$4 sm:$0xff]   ;;  %v1510_v30 = vld [vmem:[%s1831_s0 + $0x7c] ss:$20 sps:$4 sm:$0xff]   ;;  %v1512_v31 = vld [vmem:[%s1831_s0 + $0x84] ss:$20 sps:$4 sm:$0xff]  }
  0x2e   : > { %871 = vmatpush1.bf16.msra.mxu0 %v1433_v33  ;;  %v1514_v32 = vld [vmem:[%s1831_s0 + $0x78] ss:$20 sps:$4 sm:$0xff]   ;;  %v1515_v33 = vld [vmem:[%s1831_s0 + $0x80] ss:$20 sps:$4 sm:$0xff]  }
  0x2f   : > { %944 = vmatpush1.bf16.msra.mxu1 %v1434_v34  ;;  %872 = vmatprep.subr.bf16.mxu0 %v1435_v35  ;;  %v1519_v34 = vld [vmem:[%s1831_s0 + $0x10] ss:$20 sps:$4 sm:$0xff]   ;;  %v1520_v35 = vld [vmem:[%s1831_s0 + $0x60] ss:$20 sps:$4 sm:$0xff]  }
  0x30   : > { %945 = vmatprep.subr.bf16.mxu1 %v1437_v36  ;;  %375 = vperm.xlu0 %1385, %v341_v18   ;;  %v1521_v36 = vld [vmem:[%s1831_s0 + $0x38] ss:$20 sps:$4 sm:$0xff]  }
  0x32   : > { %873 = vmatpush2.bf16.msra.mxu0 %v1439_v37  ;;  %v1522_v37 = vld [vmem:[%s1831_s0 + $0x88] ss:$20 sps:$4 sm:$0xff]  }
  0x33   : > { %946 = vmatpush2.bf16.msra.mxu1 %v1440_v38  ;;  %874 = vmatprep.subr.bf16.mxu0 %v1441_v39 }
  0x34   : > { %947 = vmatprep.subr.bf16.mxu1 %v1443_v40 }
  0x36   : > { %875 = vmatpush2.bf16.msra.mxu0 %v1445_v41 }
  0x37   : > { %948 = vmatpush2.bf16.msra.mxu1 %v1446_v42  ;;  %876 = vmatprep.subr.bf16.mxu0 %v1447_v43 }
  0x38   : > { %949 = vmatprep.subr.bf16.mxu1 %v1449_v44 }
  0x3a   : > { %877 = vmatpush2.bf16.msra.mxu0 %v1451_v45 }
  0x3b   : > { %950 = vmatpush2.bf16.msra.mxu1 %v1452_v46  ;;  %878 = vmatprep.subr.bf16.mxu0 %v1453_v47 }
  0x3c   : > { %951 = vmatprep.subr.bf16.mxu1 %v1455_v48 }
  0x3e   : > { %879 = vmatpush2.bf16.msra.mxu0 %v1457_v49 }
  0x3f   : > { %952 = vmatpush2.bf16.msra.mxu1 %v1458_v50  ;;  %880 = vmatprep.subr.bf16.mxu0 %v1459_v51 }
  0x40   : > { %953 = vmatprep.subr.bf16.mxu1 %v1461_v52 }
  0x42   : > { %881 = vmatpush2.bf16.msra.mxu0 %v1463_v53 }
  0x43   : > { %954 = vmatpush2.bf16.msra.mxu1 %v1464_v54  ;;  %882 = vmatprep.subr.bf16.mxu0 %v1465_v55 }
  0x44   : > { %955 = vmatprep.subr.bf16.mxu1 %v1467_v56 }
  0x46   : > { %883 = vmatpush2.bf16.msra.mxu0 %v1469_v57 }
  0x47   : > { %956 = vmatpush2.bf16.msra.mxu1 %v1470_v58  ;;  %884 = vmatprep.subr.bf16.mxu0 %v1471_v59 }
  0x48   : > { %957 = vmatprep.subr.bf16.mxu1 %v1473_v60 }
  0x4a   : > { %885 = vmatpush2.bf16.msra.mxu0 %v1475_v62 }
  0x4b   : > { %958 = vmatpush2.bf16.msra.mxu1 %v1476_v63  ;;  %886 = vmatprep.subr.bf16.mxu0 %v1477_v2 }
  0x4c   : > { %959 = vmatprep.subr.bf16.mxu1 %v1479_v3 }
  0x4e   : > { %887 = vmatpush2.bf16.msra.mxu0 %v1481_v6 }
  0x4f   : > { %960 = vmatpush2.bf16.msra.mxu1 %v1482_v7  ;;  %1010 = vmatprep.subr.bf16.mxu0 %v1491_v8 }
  0x50   : > { %1351 = vmatprep.subr.bf16.mxu1 %v1491_v8 }
  0x51   : > { %889 = vmatmul.mubr.bf16.vlgmr.msra.gmra.mxu0 %v1483_v9 }
  0x52   : > { %962 = vmatmul.mubr.bf16.vlgmr.msra.gmra.mxu1 %v1486_v10  ;;  %1011 = vmatpush1.bf16.msra.mxu0 %v1489_v13 }
  0x53   : > { %1355 = vmatpush1.bf16.msra.mxu1 %v1489_v13  ;;  %898 = vmatprep.mubr.bf16.mxu0 %v1492_v14 }
  0x54   : > { %971 = vmatprep.mubr.bf16.mxu1 %v1494_v15  ;;  %1012 = vmatprep.subr.bf16.mxu0 %v1500_v16 }
  0x55   : > { %1352 = vmatprep.subr.bf16.mxu1 %v1500_v16 }
  0x56   : > { %1013 = vmatpush1.bf16.msra.mxu0 %v1498_v17 }
  0x57   : > { %1356 = vmatpush1.bf16.msra.mxu1 %v1498_v17  ;;  %1014 = vmatprep.subr.bf16.mxu0 %v1509_v20 }
  0x58   : > { %1353 = vmatprep.subr.bf16.mxu1 %v1509_v20 }
  0x59   : > { %899 = vmatmul.mubr.bf16.gmra.mxu0 %v1496_v21 }
  0x5a   : > { %972 = vmatmul.mubr.bf16.gmra.mxu1 %v1497_v22  ;;  %908 = vmatprep.mubr.bf16.mxu0 %v1501_v23  ;;  %v1764_v23 = vstv %s1075_s9 }
  0x5b   : > { %981 = vmatprep.mubr.bf16.mxu1 %v1503_v24  ;;  %1015 = vmatpush1.bf16.msra.mxu0 %v1507_v25 }
  0x5c   : > { %1357 = vmatpush1.bf16.msra.mxu1 %v1507_v25  ;;  %1016 = vmatprep.subr.bf16.mxu0 %v1518_v26 }
  0x5d   : > { %1354 = vmatprep.subr.bf16.mxu1 %v1518_v26 }
  0x5f   : > { %1017 = vmatpush1.bf16.msra.mxu0 %v1516_v27 }
  0x60   : > { %1358 = vmatpush1.bf16.msra.mxu1 %v1516_v27 }
  0x61   : > { %909 = vmatmul.mubr.bf16.gmra.mxu0 %v1505_v28 }
  0x62   : > { %982 = vmatmul.mubr.bf16.gmra.mxu1 %v1506_v29  ;;  %918 = vmatprep.mubr.bf16.mxu0 %v1510_v30 }
  0x63   : > { %991 = vmatprep.mubr.bf16.mxu1 %v1512_v31 }
  0x69   : > { %919 = vmatmul.mubr.bf16.gmra.mxu0 %v1514_v32 }
  0x6a   : > { %992 = vmatmul.mubr.bf16.gmra.mxu1 %v1515_v33  ;;  %1034 = vmatprep.mubr.bf16.mxu0 %v1547_v1 }
  0x6b   : > { %1054 = vmatprep.mubr.bf16.mxu1 %v1547_v1 }
  0x71   : > { %1344 = vmatmul.mubr.msk.bf16.vlgmr.msra.gmra.mxu0 %vm843_vm0, %v1519_v34 }
  0x72   : > { %1346 = vmatmul.mubr.msk.bf16.vlgmr.msra.gmra.mxu1 %vm843_vm0, %v1520_v35  ;;  %1044 = vmatprep.mubr.bf16.mxu0 %v1547_v1 }
  0x73   : > { %1064 = vmatprep.mubr.bf16.mxu1 %v1547_v1 }
  0x79   : > { %1345 = vmatmul.mubr.msk.bf16.gmra.mxu0 %vm843_vm0, %v1521_v36 }
  0x7a   : > { %1347 = vmatmul.mubr.msk.bf16.gmra.mxu1 %vm843_vm0, %v1522_v37 }
  0x8a   : > { %v346_v51 = vpop.permute.xlu0 %345  ;;  %v356_v52 = vpop.permute.xlu1 %355 }
  0xa0   : > { %v361_v60 = vpop.permute.xlu1 %360 }
  0xa3   : > { %v351_v59 = vpop.permute.xlu0 %350 }
  0xa4   : > { %v371_v3 = vpop.permute.xlu1 %370 }
  0xa7   : > { %v366_v2 = vpop.permute.xlu0 %365 }
  0xa8   : > { %v381_v13 = vpop.permute.xlu1 %380 }
  0xab   : > { %v376_v12 = vpop.permute.xlu0 %375 }
 0x111   : > { %v890_v38 = vpop.f32.mrf.mxu0 }
 0x112   : > { %v963_v39 = vpop.f32.mrf.mxu1  ;;  %v891_v6 = vadd.f32 %v890_v38, %v346_v51 }
 0x113   : > { %v892_v40 = vpop.f32.mrf.mxu0 }
 0x114   : > { %v965_v41 = vpop.f32.mrf.mxu1  ;;  %v893_v9 = vadd.f32 %v892_v40, %v346_v51  ;;  %v964_v20 = vadd.f32 %v963_v39, %v891_v6 }
 0x115   : > { %v894_v42 = vpop.f32.mrf.mxu0 }
 0x116   : > { %v967_v43 = vpop.f32.mrf.mxu1  ;;  %v895_v10 = vadd.f32 %v894_v42, %v351_v59  ;;  %v966_v30 = vadd.f32 %v965_v41, %v893_v9 }
 0x117   : > { %v896_v44 = vpop.f32.mrf.mxu0 }
 0x118   : > { %v969_v45 = vpop.f32.mrf.mxu1  ;;  %v897_v14 = vadd.f32 %v896_v44, %v351_v59  ;;  %v968_v31 = vadd.f32 %v967_v43, %v895_v10 }
 0x119   : > { %v900_v46 = vpop.f32.mrf.mxu0 }
 0x11a   : > { %v973_v1 = vpop.f32.mrf.mxu1  ;;  %v901_v15 = vadd.f32 %v900_v46, %v356_v52  ;;  %v970_v34 = vadd.f32 %v969_v45, %v897_v14 }
 0x11b   : > { %v902_v47 = vpop.f32.mrf.mxu0 }
 0x11c   : > { %v975_v48 = vpop.f32.mrf.mxu1  ;;  %v903_v16 = vadd.f32 %v902_v47, %v356_v52  ;;  %v974_v35 = vadd.f32 %v973_v1, %v901_v15 }
 0x11d   : > { %v904_v49 = vpop.f32.mrf.mxu0 }
 0x11e   : > { %v977_v50 = vpop.f32.mrf.mxu1  ;;  %v905_v17 = vadd.f32 %v904_v49, %v361_v60  ;;  %v1768_v36 = vadd.f32 %v975_v48, %v903_v16 }
 0x11f   : > { %v906_v53 = vpop.f32.mrf.mxu0 }
 0x120   : > { %v979_v54 = vpop.f32.mrf.mxu1  ;;  %v907_v21 = vadd.f32 %v906_v53, %v361_v60  ;;  %v1770_v37 = vadd.f32 %v977_v50, %v905_v17 }
 0x121   : > { %v910_v55 = vpop.f32.mrf.mxu0 }
 0x122   : > { %v983_v56 = vpop.f32.mrf.mxu1  ;;  %v911_v11 = vadd.f32 %v910_v55, %v366_v2  ;;  %v1772_v40 = vadd.f32 %v979_v54, %v907_v21 }
 0x123   : > { %v912_v57 = vpop.f32.mrf.mxu0 }
 0x124   : > { %v985_v58 = vpop.f32.mrf.mxu1  ;;  %v913_v22 = vadd.f32 %v912_v57, %v366_v2  ;;  %v984_v32 = vadd.f32 %v983_v56, %v911_v11 }
 0x125   : > { %v914_v61 = vpop.f32.mrf.mxu0 }
 0x126   : > { %v987_v62 = vpop.f32.mrf.mxu1  ;;  %v915_v24 = vadd.f32 %v914_v61, %v371_v3  ;;  %v986_v42 = vadd.f32 %v985_v58, %v913_v22 }
 0x127   : > { %v916_v63 = vpop.f32.mrf.mxu0 }
 0x128   : > { %v989_v0 = vpop.f32.mrf.mxu1  ;;  %v917_v25 = vadd.f32 %v916_v63, %v371_v3  ;;  %v988_v47 = vadd.f32 %v987_v62, %v915_v24 }
 0x129   : > { %v920_v4 = vpop.f32.mrf.mxu0 }
 0x12a   : > { %v993_v5 = vpop.f32.mrf.mxu1  ;;  %v921_v26 = vadd.f32 %v920_v4, %v376_v12  ;;  %v990_v49 = vadd.f32 %v989_v0, %v917_v25 }
 0x12b   : > { %v922_v7 = vpop.f32.mrf.mxu0 }
 0x12c   : > { %v995_v8 = vpop.f32.mrf.mxu1  ;;  %v923_v27 = vadd.f32 %v922_v7, %v376_v12  ;;  %v994_v41 = vadd.f32 %v993_v5, %v921_v26 }
 0x12d   : > { %v924_v18 = vpop.f32.mrf.mxu0 }
 0x12e   : > { %v997_v19 = vpop.f32.mrf.mxu1  ;;  %v925_v33 = vadd.f32 %v924_v18, %v381_v13  ;;  %v1774_v43 = vadd.f32 %v995_v8, %v923_v27 }
 0x12f   : > { %v926_v28 = vpop.f32.mrf.mxu0 }
 0x130   : > { %v1766_v29 = vpop.f32.mrf.mxu1  ;;  %v1776_v1 = vadd.f32 %v997_v19, %v925_v33  ;;  %v927_v48 = vadd.f32 %v926_v28, %v381_v13 }
 0x131   : > { %v1036_v38 = vpop.f32.mrf.mxu0 }
 0x132   : > { %v1056_v39 = vpop.f32.mrf.mxu1  ;;  %v1037_v44 = vadd.f32 %v1036_v38, %v964_v20  ;;  %v1000_v27 = vadd.f32 %v1766_v29, %v927_v48 }
 0x133   : > { %v1057_v46 = vadd.f32 %v1056_v39, %v984_v32  ;;  %v1038_v51 = vpop.f32.mrf.mxu0 }
 0x134   : > { %v1058_v45 = vpop.f32.mrf.mxu1  ;;  %v1092_v50 = vmin.f32 %v1037_v44, 0.0  ;;  %v1076_v53 = vmax.f32 %v1037_v44, 0.0  ;;  %v1039_v54 = vadd.f32 %v1038_v51, %v966_v30 }
 0x135   : > { %v1100_v52 = vmin.f32 %v1057_v46, 0.0  ;;  %v1084_v55 = vmax.f32 %v1057_v46, 0.0  ;;  %v1059_v56 = vadd.f32 %v1058_v45, %v986_v42  ;;  %v1040_v57 = vpop.f32.mrf.mxu0 }
 0x136   : > { %v1060_v58 = vpop.f32.mrf.mxu1  ;;  %v1109_v59 = vmul.f32 %v1764_v23, %v1092_v50  ;;  %v1041_v61 = vadd.f32 %v1040_v57, %v968_v31  ;;  %v1077_v63 = vmax.f32 %v1039_v54, 0.0  ;;  %v1093_v0 = vmin.f32 %v1039_v54, 0.0 }
 0x137   : > { %v1117_v60 = vmul.f32 %v1764_v23, %v1100_v52  ;;  %v1061_v62 = vadd.f32 %v1060_v58, %v988_v47  ;;  %v1085_v2 = vmax.f32 %v1059_v56, 0.0  ;;  %v1101_v3 = vmin.f32 %v1059_v56, 0.0  ;;  %v1042_v4 = vpop.f32.mrf.mxu0 }
 0x138   : > { %v1062_v5 = vpop.f32.mrf.mxu1  ;;  %v1125_v6 = vadd.f32 %v1109_v59, %v1076_v53  ;;  %v1078_v8 = vmax.f32 %v1041_v61, 0.0  ;;  %v1094_v9 = vmin.f32 %v1041_v61, 0.0  ;;  %v1110_v10 = vmul.f32 %v1764_v23, %v1093_v0 }
 0x139   : > { %v1133_v7 = vadd.f32 %v1117_v60, %v1084_v55  ;;  %v1118_v11 = vmul.f32 %v1764_v23, %v1101_v3  ;;  %v1086_v12 = vmax.f32 %v1061_v62, 0.0  ;;  %v1102_v13 = vmin.f32 %v1061_v62, 0.0  ;;  %v1046_v14 = vpop.f32.mrf.mxu0 }
 0x13a   : > { %v1066_v15 = vpop.f32.mrf.mxu1  ;;  %1141 = vst [vmem:[%s1784_s13] sm:$0xff] %v1125_v6  ;;  %v1111_v16 = vmul.f32 %v1764_v23, %v1094_v9  ;;  %v1043_v17 = vadd.f32 %v1042_v4, %v970_v34  ;;  %v1063_v18 = vadd.f32 %v1062_v5, %v990_v49  ;;  %v1047_v19 = vadd.f32 %v1046_v14, %v974_v35 }
 0x13b   : > { %1149 = vst [vmem:[%s1784_s13 + $0x40] sm:$0xff] %v1133_v7  ;;  %v1126_v20 = vadd.f32 %v1110_v10, %v1077_v63  ;;  %v1134_v21 = vadd.f32 %v1118_v11, %v1085_v2  ;;  %v1119_v22 = vmul.f32 %v1764_v23, %v1102_v13  ;;  %v1067_v24 = vadd.f32 %v1066_v15, %v994_v41  ;;  %v1048_v25 = vpop.f32.mrf.mxu0 }
 0x13c   : > { %v1068_v26 = vpop.f32.mrf.mxu1  ;;  %v1127_v28 = vadd.f32 %v1111_v16, %v1078_v8  ;;  %v1079_v30 = vmax.f32 %v1043_v17, 0.0  ;;  %v1095_v31 = vmin.f32 %v1043_v17, 0.0  ;;  %v1087_v33 = vmax.f32 %v1063_v18, 0.0 }
 0x13d   : > { %1142 = vst [vmem:[%s1784_s13 + $0x8] sm:$0xff] %v1126_v20  ;;  %1150 = vst [vmem:[%s1784_s13 + $0x48] sm:$0xff] %v1134_v21  ;;  %v1135_v32 = vadd.f32 %v1119_v22, %v1086_v12  ;;  %v1103_v34 = vmin.f32 %v1063_v18, 0.0  ;;  %v1096_v35 = vmin.f32 %v1047_v19, 0.0  ;;  %v1050_v38 = vpop.f32.mrf.mxu0  ;;  %v1080_v44 = vmax.f32 %v1047_v19, 0.0 }
 0x13e   : > { %v1070_v39 = vpop.f32.mrf.mxu1  ;;  %1143 = vst [vmem:[%s1784_s13 + $0x10] sm:$0xff] %v1127_v28  ;;  %v1112_v42 = vmul.f32 %v1764_v23, %v1095_v31  ;;  %v1104_v46 = vmin.f32 %v1067_v24, 0.0  ;;  %v1049_v47 = vadd.f32 %v1048_v25, %v1768_v36  ;;  %v1069_v41 = vadd.f32 %v1068_v26, %v1774_v43 }
 0x13f   : > { %1151 = vst [vmem:[%s1784_s13 + $0x50] sm:$0xff] %v1135_v32  ;;  %v1120_v29 = vmul.f32 %v1764_v23, %v1103_v34  ;;  %v1113_v49 = vmul.f32 %v1764_v23, %v1096_v35  ;;  %v1051_v51 = vadd.f32 %v1050_v38, %v1770_v37  ;;  %v1088_v48 = vmax.f32 %v1067_v24, 0.0  ;;  %v1052_v53 = vpop.f32.mrf.mxu0 }
 0x140   : > { %v1128_v45 = vadd.f32 %v1112_v42, %v1079_v30  ;;  %v1121_v50 = vmul.f32 %v1764_v23, %v1104_v46  ;;  %v1097_v52 = vmin.f32 %v1049_v47, 0.0  ;;  %v1072_v55 = vpop.f32.mrf.mxu1  ;;  %v1081_v56 = vmax.f32 %v1049_v47, 0.0 }
 0x141   : > { %v1136_v36 = vadd.f32 %v1120_v29, %v1087_v33  ;;  %v1129_v54 = vadd.f32 %v1113_v49, %v1080_v44  ;;  %v1105_v57 = vmin.f32 %v1069_v41, 0.0  ;;  %v1089_v37 = vmax.f32 %v1069_v41, 0.0 }
 0x142   : > { %1144 = vst [vmem:[%s1784_s13 + $0x18] sm:$0xff] %v1128_v45  ;;  %v1137_v58 = vadd.f32 %v1121_v50, %v1088_v48  ;;  %v1114_v43 = vmul.f32 %v1764_v23, %v1097_v52  ;;  %v1098_v59 = vmin.f32 %v1051_v51, 0.0  ;;  %v1071_v61 = vadd.f32 %v1070_v39, %v1776_v1 }
 0x143   : > { %1152 = vst [vmem:[%s1784_s13 + $0x58] sm:$0xff] %v1136_v36  ;;  %1145 = vst [vmem:[%s1784_s13 + $0x20] sm:$0xff] %v1129_v54  ;;  %v1122_v60 = vmul.f32 %v1764_v23, %v1105_v57  ;;  %v1053_v62 = vadd.f32 %v1052_v53, %v1772_v40  ;;  %v1073_v63 = vadd.f32 %v1072_v55, %v1000_v27  ;;  %v1082_v2 = vmax.f32 %v1051_v51, 0.0 }
 0x144   : > { %1153 = vst [vmem:[%s1784_s13 + $0x60] sm:$0xff] %v1137_v58  ;;  %v1130_v0 = vadd.f32 %v1114_v43, %v1081_v56  ;;  %v1115_v3 = vmul.f32 %v1764_v23, %v1098_v59  ;;  %v1106_v5 = vmin.f32 %v1071_v61, 0.0  ;;  %v1090_v1 = vmax.f32 %v1071_v61, 0.0 }
 0x145   : > { %v1138_v4 = vadd.f32 %v1122_v60, %v1089_v37  ;;  %v1099_v7 = vmin.f32 %v1053_v62, 0.0  ;;  %v1107_v8 = vmin.f32 %v1073_v63, 0.0  ;;  %v1083_v40 = vmax.f32 %v1053_v62, 0.0 }
 0x146   : > { %1146 = vst [vmem:[%s1784_s13 + $0x28] sm:$0xff] %v1130_v0  ;;  %v1131_v6 = vadd.f32 %v1115_v3, %v1082_v2  ;;  %v1123_v9 = vmul.f32 %v1764_v23, %v1106_v5  ;;  %v1091_v11 = vmax.f32 %v1073_v63, 0.0 }
 0x147   : > { %1154 = vst [vmem:[%s1784_s13 + $0x68] sm:$0xff] %v1138_v4  ;;  %v1116_v10 = vmul.f32 %v1764_v23, %v1099_v7  ;;  %v1124_v12 = vmul.f32 %v1764_v23, %v1107_v8 }
 0x148   : > { %1147 = vst [vmem:[%s1784_s13 + $0x30] sm:$0xff] %v1131_v6  ;;  %v1139_v13 = vadd.f32 %v1123_v9, %v1090_v1 }
 0x149   : > { %v1132_v14 = vadd.f32 %v1116_v10, %v1083_v40  ;;  %v1140_v15 = vadd.f32 %v1124_v12, %v1091_v11 }
 0x14a   : > { %1155 = vst [vmem:[%s1784_s13 + $0x70] sm:$0xff] %v1139_v13 }
 0x14b   : > { %1148 = vst [vmem:[%s1784_s13 + $0x38] sm:$0xff] %v1132_v14  ;;  %1156 = vst [vmem:[%s1784_s13 + $0x78] sm:$0xff] %v1140_v15 }
 0x14c PF: > { %s15_s19 = sadd.s32 1, %s1545_s19   ;;  %s1836_s17 = smov %s1541_s18 }
 0x14d   : > { %p12_p5 = scmp.ge.s32.totalorder %s15_s19, 4   ;;  %s1837_s18 = smov %s1839_s3 }
 0x14f   :  { %14 = sbr.rel (!%p12_p5) target bundleno = 2 (0x2), region = 66 }

// kernel: multisource_projection.23
= control target key start
LH: loop header
LB: loop body
LE: loop exit
PB: predicated region body
PF: predicated region fallthrough
CT: control target
= control target key end

     0   :  { %s1474_s12 = smov 0   ;;  %s1476_s13 = smov 0   ;;  %s1717_s0 = inlined_call_operand.vmem [shape: bf16[64,576], index: 0, kind: input, shape index: {}]   ;;  %s1718_s1 = inlined_call_operand.vmem [shape: bf16[2,576,256], index: 1, kind: input, shape index: {}]   ;;  %s1719_s2 = inlined_call_operand.vmem [shape: f32[64,1], index: 2, kind: input, shape index: {}]   ;;  %s1720_s3 = inlined_call_operand.vmem [shape: f32[2,64,256], index: 3, kind: output, shape index: {}]  }
   0x1   :  { %s1478_s14 = smov 0  }
   0x2 LB: > { %s25_s15 = sadd.s32 1, %s1447_s13  ;;  %p1154_p0 = scmp.ge.s32.totalorder %s1451_s14, 1  ;;  %s1451_s14 = sphi %s1478_s14, %s13_s14   ;;  %s1447_s13 = sphi %s1476_s13, %s1722_s13   ;;  %s1443_s12 = sphi %s1474_s12, %s1721_s12  }
   0x3   : > { %p27_p1 = scmp.ge.s32.totalorder %s25_s15, 2  ;;  %p158_p2 = scmp.lt.s32.totalorder %s1451_s14, 3 }
   0x5   : > { %s1724_s15 = smov (%p27_p1, %s25_s15), 0  ;;  %p159_p3 = pnand %p1154_p0, %p158_p2 }
   0x6   : > { %p191_p4 = scmp.lt.s32.totalorder (!%p159_p3), %s1443_s12, 1 }
   0x7   : > { %162 = sbr.rel (%p159_p3) target bundleno = 324 (0x144), region = 32 }
   0xc   : > { %v1391_v0 = vld [vmem:[%s1717_s0 + $0x4] ss:$20 sps:$4 sm:$0xff]   ;;  %v1453_v1 = vmov 0   ;;  %s1726_s12 = smov (!%p191_p4, %s1443_s12), 1  ;;  %v1394_v2 = vld [vmem:[%s1717_s0 + $0xc] ss:$20 sps:$4 sm:$0xff]  }
   0xd   : > { %1291 = vset.pattern.permute.xlu0 %v1453_v1  ;;  %1292 = vset.pattern.permute.xlu1 %v1453_v1  ;;  %s1265_s20 = smul.u32 576, %s1726_s12  ;;  %v307_v61 = vld [vmem:[%s1719_s2] sm:$0xff]  ;;  %vm815_vm0 = vcmask 523264   ;;  %s1256_s4 = sshll.u32 %s1726_s12, 7 }
   0xe   : > { %860 = vmatprep.mubr.bf16.mxu0 %v1391_v0  ;;  %933 = vmatprep.mubr.bf16.mxu1 %v1394_v2  ;;  %v309_v0 = vld [vmem:[%s1719_s2 + $0x10] sm:$0xff]  ;;  %s1682_s7 = scalar_lea.vmem %s1720_s3, %s1256_s4 }
   0xf   : > { %s1506_s23 = scalar_lea.vmem %s1718_s1, %s1265_s20  ;;  %317 = vperm.xlu0 %1291, %v307_v61   ;;  %327 = vperm.xlu1 %1292, %v309_v0  }
  0x10   : > { %v1293_v3 = vld [vmem:[%s1506_s23 + $0x74] ss:$8 sps:$4 sm:$0xff]   ;;  %v1297_v5 = vld [vmem:[%s1506_s23 + $0x70] ss:$8 sps:$4 sm:$0xff]   ;;  %v1299_v7 = vld [vmem:[%s1506_s23 + $0x64] ss:$8 sps:$4 sm:$0xff]  }
  0x11   : > { %v1295_v4 = vld [vmem:[%s1506_s23 + $0x174] ss:$8 sps:$4 sm:$0xff]   ;;  %828 = vmatprep.subr.bf16.mxu0 %v1293_v3  ;;  %v1298_v6 = vld [vmem:[%s1506_s23 + $0x170] ss:$8 sps:$4 sm:$0xff]   ;;  %v1301_v8 = vld [vmem:[%s1506_s23 + $0x164] ss:$8 sps:$4 sm:$0xff]  }
  0x12   : > { %901 = vmatprep.subr.bf16.mxu1 %v1295_v4  ;;  %829 = vmatpush1.bf16.msra.mxu0 %v1297_v5  ;;  %v1303_v9 = vld [vmem:[%s1506_s23 + $0x60] ss:$8 sps:$4 sm:$0xff]   ;;  %v1305_v11 = vld [vmem:[%s1506_s23 + $0x54] ss:$8 sps:$4 sm:$0xff]   ;;  %v1309_v13 = vld [vmem:[%s1506_s23 + $0x50] ss:$8 sps:$4 sm:$0xff]  }
  0x13   : > { %902 = vmatpush1.bf16.msra.mxu1 %v1298_v6  ;;  %830 = vmatprep.subr.bf16.mxu0 %v1299_v7  ;;  %v1304_v10 = vld [vmem:[%s1506_s23 + $0x160] ss:$8 sps:$4 sm:$0xff]   ;;  %v1307_v12 = vld [vmem:[%s1506_s23 + $0x154] ss:$8 sps:$4 sm:$0xff]   ;;  %v1310_v14 = vld [vmem:[%s1506_s23 + $0x150] ss:$8 sps:$4 sm:$0xff]  }
  0x14   : > { %903 = vmatprep.subr.bf16.mxu1 %v1301_v8  ;;  %v1311_v15 = vld [vmem:[%s1506_s23 + $0x44] ss:$8 sps:$4 sm:$0xff]   ;;  %v1315_v17 = vld [vmem:[%s1506_s23 + $0x40] ss:$8 sps:$4 sm:$0xff]   ;;  %v1317_v19 = vld [vmem:[%s1506_s23 + $0x34] ss:$8 sps:$4 sm:$0xff]  }
  0x15   : > { %v1313_v16 = vld [vmem:[%s1506_s23 + $0x144] ss:$8 sps:$4 sm:$0xff]   ;;  %v1316_v18 = vld [vmem:[%s1506_s23 + $0x140] ss:$8 sps:$4 sm:$0xff]   ;;  %v1319_v20 = vld [vmem:[%s1506_s23 + $0x134] ss:$8 sps:$4 sm:$0xff]  }
  0x16   : > { %831 = vmatpush1.bf16.msra.mxu0 %v1303_v9  ;;  %v1321_v21 = vld [vmem:[%s1506_s23 + $0x30] ss:$8 sps:$4 sm:$0xff]   ;;  %v1323_v23 = vld [vmem:[%s1506_s23 + $0x24] ss:$8 sps:$4 sm:$0xff]   ;;  %v1327_v25 = vld [vmem:[%s1506_s23 + $0x20] ss:$8 sps:$4 sm:$0xff]  }
  0x17   : > { %904 = vmatpush1.bf16.msra.mxu1 %v1304_v10  ;;  %832 = vmatprep.subr.bf16.mxu0 %v1305_v11  ;;  %v1322_v22 = vld [vmem:[%s1506_s23 + $0x130] ss:$8 sps:$4 sm:$0xff]   ;;  %v1325_v24 = vld [vmem:[%s1506_s23 + $0x124] ss:$8 sps:$4 sm:$0xff]   ;;  %v1328_v26 = vld [vmem:[%s1506_s23 + $0x120] ss:$8 sps:$4 sm:$0xff]  }
  0x18   : > { %905 = vmatprep.subr.bf16.mxu1 %v1307_v12  ;;  %v1329_v27 = vld [vmem:[%s1506_s23 + $0x14] ss:$8 sps:$4 sm:$0xff]   ;;  %v1333_v29 = vld [vmem:[%s1506_s23 + $0x10] ss:$8 sps:$4 sm:$0xff]   ;;  %v1335_v31 = vld [vmem:[%s1506_s23 + $0x4] ss:$8 sps:$4 sm:$0xff]  }
  0x19   : > { %v1331_v28 = vld [vmem:[%s1506_s23 + $0x114] ss:$8 sps:$4 sm:$0xff]   ;;  %v1334_v30 = vld [vmem:[%s1506_s23 + $0x110] ss:$8 sps:$4 sm:$0xff]   ;;  %v1337_v32 = vld [vmem:[%s1506_s23 + $0x104] ss:$8 sps:$4 sm:$0xff]  }
  0x1a   : > { %833 = vmatpush1.bf16.msra.mxu0 %v1309_v13  ;;  %v1339_v33 = vld [vmem:[%s1506_s23] ss:$8 sps:$4 sm:$0xff]   ;;  %v1341_v35 = vld [vmem:[%s1506_s23 + $0xf4] ss:$8 sps:$4 sm:$0xff]   ;;  %v1345_v37 = vld [vmem:[%s1506_s23 + $0xf0] ss:$8 sps:$4 sm:$0xff]  }
  0x1b   : > { %906 = vmatpush1.bf16.msra.mxu1 %v1310_v14  ;;  %834 = vmatprep.subr.bf16.mxu0 %v1311_v15  ;;  %v1340_v34 = vld [vmem:[%s1506_s23 + $0x100] ss:$8 sps:$4 sm:$0xff]   ;;  %v1343_v36 = vld [vmem:[%s1506_s23 + $0x1f4] ss:$8 sps:$4 sm:$0xff]   ;;  %v1346_v38 = vld [vmem:[%s1506_s23 + $0x1f0] ss:$8 sps:$4 sm:$0xff]  }
  0x1c   : > { %907 = vmatprep.subr.bf16.mxu1 %v1313_v16  ;;  %v1347_v39 = vld [vmem:[%s1506_s23 + $0xe4] ss:$8 sps:$4 sm:$0xff]   ;;  %v1351_v41 = vld [vmem:[%s1506_s23 + $0xe0] ss:$8 sps:$4 sm:$0xff]   ;;  %v1353_v43 = vld [vmem:[%s1506_s23 + $0xd4] ss:$8 sps:$4 sm:$0xff]  }
  0x1d   : > { %v1349_v40 = vld [vmem:[%s1506_s23 + $0x1e4] ss:$8 sps:$4 sm:$0xff]   ;;  %v1352_v42 = vld [vmem:[%s1506_s23 + $0x1e0] ss:$8 sps:$4 sm:$0xff]   ;;  %v1355_v44 = vld [vmem:[%s1506_s23 + $0x1d4] ss:$8 sps:$4 sm:$0xff]  }
  0x1e   : > { %835 = vmatpush1.bf16.msra.mxu0 %v1315_v17  ;;  %v1357_v45 = vld [vmem:[%s1506_s23 + $0xd0] ss:$8 sps:$4 sm:$0xff]   ;;  %v1359_v47 = vld [vmem:[%s1506_s23 + $0xc4] ss:$8 sps:$4 sm:$0xff]   ;;  %v1363_v49 = vld [vmem:[%s1506_s23 + $0xc0] ss:$8 sps:$4 sm:$0xff]  }
  0x1f   : > { %908 = vmatpush1.bf16.msra.mxu1 %v1316_v18  ;;  %836 = vmatprep.subr.bf16.mxu0 %v1317_v19  ;;  %v1358_v46 = vld [vmem:[%s1506_s23 + $0x1d0] ss:$8 sps:$4 sm:$0xff]   ;;  %v1361_v48 = vld [vmem:[%s1506_s23 + $0x1c4] ss:$8 sps:$4 sm:$0xff]   ;;  %v1364_v50 = vld [vmem:[%s1506_s23 + $0x1c0] ss:$8 sps:$4 sm:$0xff]  }
  0x20   : > { %909 = vmatprep.subr.bf16.mxu1 %v1319_v20  ;;  %v1365_v51 = vld [vmem:[%s1506_s23 + $0xb4] ss:$8 sps:$4 sm:$0xff]   ;;  %v1369_v53 = vld [vmem:[%s1506_s23 + $0xb0] ss:$8 sps:$4 sm:$0xff]   ;;  %v1371_v55 = vld [vmem:[%s1506_s23 + $0xa4] ss:$8 sps:$4 sm:$0xff]  }
  0x21   : > { %v1367_v52 = vld [vmem:[%s1506_s23 + $0x1b4] ss:$8 sps:$4 sm:$0xff]   ;;  %v1370_v54 = vld [vmem:[%s1506_s23 + $0x1b0] ss:$8 sps:$4 sm:$0xff]   ;;  %v1373_v56 = vld [vmem:[%s1506_s23 + $0x1a4] ss:$8 sps:$4 sm:$0xff]  }
  0x22   : > { %837 = vmatpush1.bf16.msra.mxu0 %v1321_v21  ;;  %v1375_v57 = vld [vmem:[%s1506_s23 + $0xa0] ss:$8 sps:$4 sm:$0xff]   ;;  %v1377_v59 = vld [vmem:[%s1506_s23 + $0x94] ss:$8 sps:$4 sm:$0xff]   ;;  %v1381_v62 = vld [vmem:[%s1506_s23 + $0x90] ss:$8 sps:$4 sm:$0xff]  }
  0x23   : > { %910 = vmatpush1.bf16.msra.mxu1 %v1322_v22  ;;  %838 = vmatprep.subr.bf16.mxu0 %v1323_v23  ;;  %v1376_v58 = vld [vmem:[%s1506_s23 + $0x1a0] ss:$8 sps:$4 sm:$0xff]   ;;  %v1379_v60 = vld [vmem:[%s1506_s23 + $0x194] ss:$8 sps:$4 sm:$0xff]   ;;  %v1382_v63 = vld [vmem:[%s1506_s23 + $0x190] ss:$8 sps:$4 sm:$0xff]  }
  0x24   : > { %911 = vmatprep.subr.bf16.mxu1 %v1325_v24  ;;  %v1383_v2 = vld [vmem:[%s1506_s23 + $0x84] ss:$8 sps:$4 sm:$0xff]   ;;  %v310_v5 = vld [vmem:[%s1719_s2 + $0x18] sm:$0xff]  ;;  %v1387_v6 = vld [vmem:[%s1506_s23 + $0x80] ss:$8 sps:$4 sm:$0xff]  }
  0x25   : > { %v1385_v3 = vld [vmem:[%s1506_s23 + $0x184] ss:$8 sps:$4 sm:$0xff]   ;;  %v1388_v7 = vld [vmem:[%s1506_s23 + $0x180] ss:$8 sps:$4 sm:$0xff]   ;;  %v1397_v8 = vld [vmem:[%s1506_s23 + $0x234] ss:$8 sps:$4 sm:$0xff]   ;;  %332 = vperm.xlu1 %1292, %v310_v5  }
  0x26   : > { %839 = vmatpush1.bf16.msra.mxu0 %v1327_v25  ;;  %v308_v4 = vld [vmem:[%s1719_s2 + $0x8] sm:$0xff]  ;;  %v1389_v9 = vld [vmem:[%s1717_s0] ss:$20 sps:$4 sm:$0xff]   ;;  %v1395_v13 = vld [vmem:[%s1506_s23 + $0x230] ss:$8 sps:$4 sm:$0xff]  }
  0x27   : > { %912 = vmatpush1.bf16.msra.mxu1 %v1328_v26  ;;  %840 = vmatprep.subr.bf16.mxu0 %v1329_v27  ;;  %v1392_v10 = vld [vmem:[%s1717_s0 + $0x8] ss:$20 sps:$4 sm:$0xff]   ;;  %v311_v11 = vld [vmem:[%s1719_s2 + $0x20] sm:$0xff]  ;;  %v313_v18 = vld [vmem:[%s1719_s2 + $0x30] sm:$0xff] }
  0x28   : > { %913 = vmatprep.subr.bf16.mxu1 %v1331_v28  ;;  %322 = vperm.xlu0 %1291, %v308_v4   ;;  %v312_v12 = vld [vmem:[%s1719_s2 + $0x28] sm:$0xff]  ;;  %v314_v19 = vld [vmem:[%s1719_s2 + $0x38] sm:$0xff]  ;;  %v1403_v22 = vld [vmem:[%s1717_s0 + $0x30] ss:$20 sps:$4 sm:$0xff]  }
  0x29   : > { %v1398_v14 = vld [vmem:[%s1717_s0 + $0x2c] ss:$20 sps:$4 sm:$0xff]   ;;  %v1400_v15 = vld [vmem:[%s1717_s0 + $0x34] ss:$20 sps:$4 sm:$0xff]   ;;  %342 = vperm.xlu1 %1292, %v312_v12   ;;  %v1409_v24 = vld [vmem:[%s1717_s0 + $0x5c] ss:$20 sps:$4 sm:$0xff]  }
  0x2a   : > { %841 = vmatpush1.bf16.msra.mxu0 %v1333_v29  ;;  %v1406_v16 = vld [vmem:[%s1506_s23 + $0x224] ss:$8 sps:$4 sm:$0xff]   ;;  %v1404_v17 = vld [vmem:[%s1506_s23 + $0x220] ss:$8 sps:$4 sm:$0xff]   ;;  %v1415_v20 = vld [vmem:[%s1506_s23 + $0x214] ss:$8 sps:$4 sm:$0xff]  }
  0x2b   : > { %914 = vmatpush1.bf16.msra.mxu1 %v1334_v30  ;;  %842 = vmatprep.subr.bf16.mxu0 %v1335_v31  ;;  %v1402_v21 = vld [vmem:[%s1717_s0 + $0x28] ss:$20 sps:$4 sm:$0xff]   ;;  %v1413_v25 = vld [vmem:[%s1506_s23 + $0x210] ss:$8 sps:$4 sm:$0xff]   ;;  %v1424_v26 = vld [vmem:[%s1506_s23 + $0x204] ss:$8 sps:$4 sm:$0xff]  }
  0x2c   : > { %915 = vmatprep.subr.bf16.mxu1 %v1337_v32  ;;  %337 = vperm.xlu0 %1291, %v311_v11   ;;  %v1407_v23 = vld [vmem:[%s1717_s0 + $0x54] ss:$20 sps:$4 sm:$0xff]   ;;  %v1411_v28 = vld [vmem:[%s1717_s0 + $0x50] ss:$20 sps:$4 sm:$0xff]   ;;  %v1412_v29 = vld [vmem:[%s1717_s0 + $0x58] ss:$20 sps:$4 sm:$0xff]  }
  0x2d   : > { %352 = vperm.xlu1 %1292, %v314_v19   ;;  %v1422_v27 = vld [vmem:[%s1506_s23 + $0x200] ss:$8 sps:$4 sm:$0xff]   ;;  %v1416_v30 = vld [vmem:[%s1717_s0 + $0x7c] ss:$20 sps:$4 sm:$0xff]   ;;  %v1418_v31 = vld [vmem:[%s1717_s0 + $0x84] ss:$20 sps:$4 sm:$0xff]  }
  0x2e   : > { %843 = vmatpush1.bf16.msra.mxu0 %v1339_v33  ;;  %v1420_v32 = vld [vmem:[%s1717_s0 + $0x78] ss:$20 sps:$4 sm:$0xff]   ;;  %v1421_v33 = vld [vmem:[%s1717_s0 + $0x80] ss:$20 sps:$4 sm:$0xff]  }
  0x2f   : > { %916 = vmatpush1.bf16.msra.mxu1 %v1340_v34  ;;  %844 = vmatprep.subr.bf16.mxu0 %v1341_v35  ;;  %v1425_v34 = vld [vmem:[%s1717_s0 + $0x10] ss:$20 sps:$4 sm:$0xff]   ;;  %v1426_v35 = vld [vmem:[%s1717_s0 + $0x60] ss:$20 sps:$4 sm:$0xff]  }
  0x30   : > { %917 = vmatprep.subr.bf16.mxu1 %v1343_v36  ;;  %347 = vperm.xlu0 %1291, %v313_v18   ;;  %v1427_v36 = vld [vmem:[%s1717_s0 + $0x38] ss:$20 sps:$4 sm:$0xff]  }
  0x32   : > { %845 = vmatpush2.bf16.msra.mxu0 %v1345_v37  ;;  %v1428_v37 = vld [vmem:[%s1717_s0 + $0x88] ss:$20 sps:$4 sm:$0xff]  }
  0x33   : > { %918 = vmatpush2.bf16.msra.mxu1 %v1346_v38  ;;  %846 = vmatprep.subr.bf16.mxu0 %v1347_v39 }
  0x34   : > { %919 = vmatprep.subr.bf16.mxu1 %v1349_v40 }
  0x36   : > { %847 = vmatpush2.bf16.msra.mxu0 %v1351_v41 }
  0x37   : > { %920 = vmatpush2.bf16.msra.mxu1 %v1352_v42  ;;  %848 = vmatprep.subr.bf16.mxu0 %v1353_v43 }
  0x38   : > { %921 = vmatprep.subr.bf16.mxu1 %v1355_v44 }
  0x3a   : > { %849 = vmatpush2.bf16.msra.mxu0 %v1357_v45 }
  0x3b   : > { %922 = vmatpush2.bf16.msra.mxu1 %v1358_v46  ;;  %850 = vmatprep.subr.bf16.mxu0 %v1359_v47 }
  0x3c   : > { %923 = vmatprep.subr.bf16.mxu1 %v1361_v48 }
  0x3e   : > { %851 = vmatpush2.bf16.msra.mxu0 %v1363_v49 }
  0x3f   : > { %924 = vmatpush2.bf16.msra.mxu1 %v1364_v50  ;;  %852 = vmatprep.subr.bf16.mxu0 %v1365_v51 }
  0x40   : > { %925 = vmatprep.subr.bf16.mxu1 %v1367_v52 }
  0x42   : > { %853 = vmatpush2.bf16.msra.mxu0 %v1369_v53 }
  0x43   : > { %926 = vmatpush2.bf16.msra.mxu1 %v1370_v54  ;;  %854 = vmatprep.subr.bf16.mxu0 %v1371_v55 }
  0x44   : > { %927 = vmatprep.subr.bf16.mxu1 %v1373_v56 }
  0x46   : > { %855 = vmatpush2.bf16.msra.mxu0 %v1375_v57 }
  0x47   : > { %928 = vmatpush2.bf16.msra.mxu1 %v1376_v58  ;;  %856 = vmatprep.subr.bf16.mxu0 %v1377_v59 }
  0x48   : > { %929 = vmatprep.subr.bf16.mxu1 %v1379_v60 }
  0x4a   : > { %857 = vmatpush2.bf16.msra.mxu0 %v1381_v62 }
  0x4b   : > { %930 = vmatpush2.bf16.msra.mxu1 %v1382_v63  ;;  %858 = vmatprep.subr.bf16.mxu0 %v1383_v2 }
  0x4c   : > { %931 = vmatprep.subr.bf16.mxu1 %v1385_v3 }
  0x4e   : > { %859 = vmatpush2.bf16.msra.mxu0 %v1387_v6 }
  0x4f   : > { %932 = vmatpush2.bf16.msra.mxu1 %v1388_v7  ;;  %982 = vmatprep.subr.bf16.mxu0 %v1397_v8 }
  0x50   : > { %1257 = vmatprep.subr.bf16.mxu1 %v1397_v8 }
  0x51   : > { %861 = vmatmul.mubr.bf16.vlgmr.msra.gmra.mxu0 %v1389_v9 }
  0x52   : > { %934 = vmatmul.mubr.bf16.vlgmr.msra.gmra.mxu1 %v1392_v10  ;;  %983 = vmatpush1.bf16.msra.mxu0 %v1395_v13 }
  0x53   : > { %1261 = vmatpush1.bf16.msra.mxu1 %v1395_v13  ;;  %870 = vmatprep.mubr.bf16.mxu0 %v1398_v14 }
  0x54   : > { %943 = vmatprep.mubr.bf16.mxu1 %v1400_v15  ;;  %984 = vmatprep.subr.bf16.mxu0 %v1406_v16 }
  0x55   : > { %1258 = vmatprep.subr.bf16.mxu1 %v1406_v16 }
  0x56   : > { %985 = vmatpush1.bf16.msra.mxu0 %v1404_v17 }
  0x57   : > { %1262 = vmatpush1.bf16.msra.mxu1 %v1404_v17  ;;  %986 = vmatprep.subr.bf16.mxu0 %v1415_v20 }
  0x58   : > { %1259 = vmatprep.subr.bf16.mxu1 %v1415_v20 }
  0x59   : > { %871 = vmatmul.mubr.bf16.gmra.mxu0 %v1402_v21 }
  0x5a   : > { %944 = vmatmul.mubr.bf16.gmra.mxu1 %v1403_v22  ;;  %880 = vmatprep.mubr.bf16.mxu0 %v1407_v23 }
  0x5b   : > { %953 = vmatprep.mubr.bf16.mxu1 %v1409_v24  ;;  %987 = vmatpush1.bf16.msra.mxu0 %v1413_v25 }
  0x5c   : > { %1263 = vmatpush1.bf16.msra.mxu1 %v1413_v25  ;;  %988 = vmatprep.subr.bf16.mxu0 %v1424_v26 }
  0x5d   : > { %1260 = vmatprep.subr.bf16.mxu1 %v1424_v26 }
  0x5f   : > { %989 = vmatpush1.bf16.msra.mxu0 %v1422_v27 }
  0x60   : > { %1264 = vmatpush1.bf16.msra.mxu1 %v1422_v27 }
  0x61   : > { %881 = vmatmul.mubr.bf16.gmra.mxu0 %v1411_v28 }
  0x62   : > { %954 = vmatmul.mubr.bf16.gmra.mxu1 %v1412_v29  ;;  %890 = vmatprep.mubr.bf16.mxu0 %v1416_v30 }
  0x63   : > { %963 = vmatprep.mubr.bf16.mxu1 %v1418_v31 }
  0x69   : > { %891 = vmatmul.mubr.bf16.gmra.mxu0 %v1420_v32 }
  0x6a   : > { %964 = vmatmul.mubr.bf16.gmra.mxu1 %v1421_v33  ;;  %1006 = vmatprep.mubr.bf16.mxu0 %v1453_v1 }
  0x6b   : > { %1026 = vmatprep.mubr.bf16.mxu1 %v1453_v1 }
  0x71   : > { %1250 = vmatmul.mubr.msk.bf16.vlgmr.msra.gmra.mxu0 %vm815_vm0, %v1425_v34 }
  0x72   : > { %1252 = vmatmul.mubr.msk.bf16.vlgmr.msra.gmra.mxu1 %vm815_vm0, %v1426_v35  ;;  %1016 = vmatprep.mubr.bf16.mxu0 %v1453_v1 }
  0x73   : > { %1036 = vmatprep.mubr.bf16.mxu1 %v1453_v1 }
  0x79   : > { %1251 = vmatmul.mubr.msk.bf16.gmra.mxu0 %vm815_vm0, %v1427_v36 }
  0x7a   : > { %1253 = vmatmul.mubr.msk.bf16.gmra.mxu1 %vm815_vm0, %v1428_v37 }
  0x8a   : > { %v318_v51 = vpop.permute.xlu0 %317  ;;  %v328_v56 = vpop.permute.xlu1 %327 }
  0xa0   : > { %v333_v0 = vpop.permute.xlu1 %332 }
  0xa3   : > { %v323_v59 = vpop.permute.xlu0 %322 }
  0xa4   : > { %v343_v9 = vpop.permute.xlu1 %342 }
  0xa7   : > { %v338_v2 = vpop.permute.xlu0 %337 }
  0xa8   : > { %v353_v35 = vpop.permute.xlu1 %352 }
  0xab   : > { %v348_v20 = vpop.permute.xlu0 %347 }
 0x111   : > { %v862_v38 = vpop.f32.mrf.mxu0 }
 0x112   : > { %v935_v39 = vpop.f32.mrf.mxu1  ;;  %v863_v7 = vadd.f32 %v862_v38, %v318_v51 }
 0x113   : > { %v864_v40 = vpop.f32.mrf.mxu0 }
 0x114   : > { %v937_v41 = vpop.f32.mrf.mxu1  ;;  %v865_v10 = vadd.f32 %v864_v40, %v318_v51  ;;  %v936_v17 = vadd.f32 %v935_v39, %v863_v7 }
 0x115   : > { %v866_v42 = vpop.f32.mrf.mxu0 }
 0x116   : > { %v939_v43 = vpop.f32.mrf.mxu1  ;;  %v867_v14 = vadd.f32 %v866_v42, %v323_v59  ;;  %v938_v21 = vadd.f32 %v937_v41, %v865_v10 }
 0x117   : > { %v868_v44 = vpop.f32.mrf.mxu0 }
 0x118   : > { %v941_v45 = vpop.f32.mrf.mxu1  ;;  %v869_v22 = vadd.f32 %v868_v44, %v323_v59  ;;  %v940_v29 = vadd.f32 %v939_v43, %v867_v14 }
 0x119   : > { %v872_v46 = vpop.f32.mrf.mxu0 }
 0x11a   : > { %v1662_v1 = vpop.f32.mrf.mxu1  ;;  %v873_v30 = vadd.f32 %v872_v46, %v328_v56  ;;  %v942_v38 = vadd.f32 %v941_v45, %v869_v22 }
 0x11b   : > { %v874_v47 = vpop.f32.mrf.mxu0 }
 0x11c   : > { %v1664_v48 = vpop.f32.mrf.mxu1  ;;  %v875_v39 = vadd.f32 %v874_v47, %v328_v56  ;;  %v946_v51 = vadd.f32 %v1662_v1, %v873_v30 }
 0x11d   : > { %v1666_v49 = vpop.f32.mrf.mxu0 }
 0x11e   : > { %v1668_v50 = vpop.f32.mrf.mxu1  ;;  %v948_v59 = vadd.f32 %v1664_v48, %v875_v39 }
 0x11f   : > { %v1670_v52 = vpop.f32.mrf.mxu0 }
 0x120   : > { %v1672_v53 = vpop.f32.mrf.mxu1 }
 0x121   : > { %v882_v54 = vpop.f32.mrf.mxu0 }
 0x122   : > { %v955_v55 = vpop.f32.mrf.mxu1  ;;  %v883_v8 = vadd.f32 %v882_v54, %v338_v2  ;;  %v877_v54 = vadd.f32 %v1666_v49, %v333_v0 }
 0x123   : > { %v884_v57 = vpop.f32.mrf.mxu0 }
 0x124   : > { %v957_v58 = vpop.f32.mrf.mxu1  ;;  %v885_v13 = vadd.f32 %v884_v57, %v338_v2  ;;  %v956_v18 = vadd.f32 %v955_v55, %v883_v8 }
 0x125   : > { %v886_v60 = vpop.f32.mrf.mxu0 }
 0x126   : > { %v959_v61 = vpop.f32.mrf.mxu1  ;;  %v887_v19 = vadd.f32 %v886_v60, %v343_v9  ;;  %v958_v25 = vadd.f32 %v957_v58, %v885_v13  ;;  %v879_v60 = vadd.f32 %v1670_v52, %v333_v0 }
 0x127   : > { %v888_v62 = vpop.f32.mrf.mxu0 }
 0x128   : > { %v961_v63 = vpop.f32.mrf.mxu1  ;;  %v889_v26 = vadd.f32 %v888_v62, %v343_v9  ;;  %v960_v33 = vadd.f32 %v959_v61, %v887_v19  ;;  %v952_v8 = vadd.f32 %v1672_v53, %v879_v60 }
 0x129   : > { %v892_v3 = vpop.f32.mrf.mxu0 }
 0x12a   : > { %v965_v4 = vpop.f32.mrf.mxu1  ;;  %v893_v34 = vadd.f32 %v892_v3, %v348_v20  ;;  %v962_v42 = vadd.f32 %v961_v63, %v889_v26 }
 0x12b   : > { %v894_v5 = vpop.f32.mrf.mxu0 }
 0x12c   : > { %v967_v6 = vpop.f32.mrf.mxu1  ;;  %v895_v43 = vadd.f32 %v894_v5, %v348_v20  ;;  %v966_v45 = vadd.f32 %v965_v4, %v893_v34  ;;  %v950_v5 = vadd.f32 %v1668_v50, %v877_v54 }
 0x12d   : > { %v896_v11 = vpop.f32.mrf.mxu0 }
 0x12e   : > { %v1674_v12 = vpop.f32.mrf.mxu1  ;;  %v897_v58 = vadd.f32 %v896_v11, %v353_v35  ;;  %v968_v62 = vadd.f32 %v967_v6, %v895_v43 }
 0x12f   : > { %v898_v15 = vpop.f32.mrf.mxu0 }
 0x130   : > { %v1677_v16 = vpop.f32.mrf.mxu1  ;;  %v899_v63 = vadd.f32 %v898_v15, %v353_v35  ;;  %v970_v7 = vadd.f32 %v1674_v12, %v897_v58 }
 0x131   : > { %v1008_v23 = vpop.f32.mrf.mxu0 }
 0x132   : > { %v1028_v24 = vpop.f32.mrf.mxu1  ;;  %v1009_v27 = vadd.f32 %v1008_v23, %v936_v17  ;;  %v972_v9 = vadd.f32 %v1677_v16, %v899_v63 }
 0x133   : > { %v1029_v28 = vadd.f32 %v1028_v24, %v956_v18  ;;  %v1010_v31 = vpop.f32.mrf.mxu0 }
 0x134   : > { %v1030_v32 = vpop.f32.mrf.mxu1  ;;  %1047 = vst [vmem:[%s1682_s7] sm:$0xff] %v1009_v27  ;;  %v1011_v36 = vadd.f32 %v1010_v31, %v938_v21 }
 0x135   : > { %1055 = vst [vmem:[%s1682_s7 + $0x40] sm:$0xff] %v1029_v28  ;;  %v1031_v37 = vadd.f32 %v1030_v32, %v958_v25  ;;  %v1012_v40 = vpop.f32.mrf.mxu0 }
 0x136   : > { %v1032_v41 = vpop.f32.mrf.mxu1  ;;  %1048 = vst [vmem:[%s1682_s7 + $0x8] sm:$0xff] %v1011_v36  ;;  %v1013_v44 = vadd.f32 %v1012_v40, %v940_v29 }
 0x137   : > { %1056 = vst [vmem:[%s1682_s7 + $0x48] sm:$0xff] %v1031_v37  ;;  %v1033_v46 = vadd.f32 %v1032_v41, %v960_v33  ;;  %v1014_v55 = vpop.f32.mrf.mxu0 }
 0x138   : > { %v1034_v57 = vpop.f32.mrf.mxu1  ;;  %1049 = vst [vmem:[%s1682_s7 + $0x10] sm:$0xff] %v1013_v44  ;;  %v1015_v47 = vadd.f32 %v1014_v55, %v942_v38 }
 0x139   : > { %1057 = vst [vmem:[%s1682_s7 + $0x50] sm:$0xff] %v1033_v46  ;;  %v1035_v56 = vadd.f32 %v1034_v57, %v962_v42  ;;  %v1018_v61 = vpop.f32.mrf.mxu0 }
 0x13a   : > { %v1038_v1 = vpop.f32.mrf.mxu1  ;;  %1050 = vst [vmem:[%s1682_s7 + $0x18] sm:$0xff] %v1015_v47  ;;  %v1019_v49 = vadd.f32 %v1018_v61, %v946_v51 }
 0x13b   : > { %1058 = vst [vmem:[%s1682_s7 + $0x58] sm:$0xff] %v1035_v56  ;;  %v1039_v2 = vadd.f32 %v1038_v1, %v966_v45  ;;  %v1020_v3 = vpop.f32.mrf.mxu0 }
 0x13c   : > { %v1040_v4 = vpop.f32.mrf.mxu1  ;;  %1051 = vst [vmem:[%s1682_s7 + $0x20] sm:$0xff] %v1019_v49  ;;  %v1021_v48 = vadd.f32 %v1020_v3, %v948_v59 }
 0x13d   : > { %1059 = vst [vmem:[%s1682_s7 + $0x60] sm:$0xff] %v1039_v2  ;;  %v1041_v52 = vadd.f32 %v1040_v4, %v968_v62  ;;  %v1022_v0 = vpop.f32.mrf.mxu0 }
 0x13e   : > { %v1042_v6 = vpop.f32.mrf.mxu1  ;;  %1052 = vst [vmem:[%s1682_s7 + $0x28] sm:$0xff] %v1021_v48  ;;  %v1023_v10 = vadd.f32 %v1022_v0, %v950_v5 }
 0x13f   : > { %1060 = vst [vmem:[%s1682_s7 + $0x68] sm:$0xff] %v1041_v52  ;;  %v1043_v50 = vadd.f32 %v1042_v6, %v970_v7  ;;  %v1024_v11 = vpop.f32.mrf.mxu0 }
 0x140   : > { %v1044_v13 = vpop.f32.mrf.mxu1  ;;  %1053 = vst [vmem:[%s1682_s7 + $0x30] sm:$0xff] %v1023_v10  ;;  %v1025_v12 = vadd.f32 %v1024_v11, %v952_v8 }
 0x141   : > { %1061 = vst [vmem:[%s1682_s7 + $0x70] sm:$0xff] %v1043_v50  ;;  %v1045_v14 = vadd.f32 %v1044_v13, %v972_v9 }
 0x142   : > { %1054 = vst [vmem:[%s1682_s7 + $0x38] sm:$0xff] %v1025_v12 }
 0x143   : > { %1062 = vst [vmem:[%s1682_s7 + $0x78] sm:$0xff] %v1045_v14 }
 0x144 PF: > { %s13_s14 = sadd.s32 1, %s1451_s14   ;;  %s1721_s12 = smov %s1447_s13 }
 0x145   : > { %p10_p5 = scmp.ge.s32.totalorder %s13_s14, 4   ;;  %s1722_s13 = smov %s1724_s15 }
 0x147   :  { %12 = sbr.rel (!%p10_p5) target bundleno = 2 (0x2), region = 62 }

</bundles_post_ra>
